<compile_context>
chip_gen: v7x
topology: tpu7x:2x2x1
jax: 0.10.0
libtpu: 0.0.40
codegen_flags: <defaults>
</compile_context>

<pallas_src>
import jax
import jax.numpy as jnp
from jax.experimental import pallas as pl
from jax.experimental.pallas import tpu as pltpu

KH = KW = 5                 # Conv_DCF kernel size
PAD = 2                     # 'same' padding for 5x5
SPATIAL = (28, 14, 7)       # per-conv-layer input spatial size (28x28 MNIST input)


# ------------------------------- fused kernel --------------------------------
def _dcf_net_kernel(x_ref,
                    b1_ref, bias1_ref, pw1_ref, ph1_ref, sc1_ref, sh1_ref,
                    b2_ref, bias2_ref, pw2_ref, ph2_ref, sc2_ref, sh2_ref,
                    b3_ref, bias3_ref, pw3_ref, ph3_ref, sc3_ref, sh3_ref,
                    w1h_ref, fc1b_ref, fc2w_ref, fc2b_ref,
                    o_ref,
                    slab1_ref, slab2_ref, slab3_ref):
    """Forward for a block of B images (the grid iterates over batch blocks).

    Activations use batch-stacked padded slabs: (B*(H+4), (W+4)*C), image b in rows
    [b*(H+4), (b+1)*(H+4)); rows/cols outside the real (H, W*C) window are zero and
    implement the conv's 'same' zero padding.  conv == sum_dh slab[dh:dh+L] @ band[dh]
    with L = B*(H+4)-4 stacked MXU rows.
    """
    B = x_ref.shape[0]
    H1 = x_ref.shape[1]
    Hp1 = H1 + 2 * PAD

    # Stage the raw images into the zero-bordered layer-1 slab.  The slab is fully
    # rewritten every step, so this is safe under "parallel" grid semantics.
    slab1_ref[...] = jnp.zeros(slab1_ref.shape, slab1_ref.dtype)
    for b in range(B):
        slab1_ref[pl.ds(b * Hp1 + PAD, H1), pl.ds(0, H1)] = (
            x_ref[b].astype(slab1_ref.dtype))

    def conv_pool(slab_ref, band_ref, bias_ref, pw_ref, ph_ref):
        # 'same' 5x5 conv over the whole batch-stacked slab: 5 row-shifted matmuls.
        L = slab_ref.shape[0] - (KH - 1)
        acc = jnp.dot(slab_ref[pl.ds(0, L), :].astype(jnp.bfloat16), band_ref[0],
                      preferred_element_type=jnp.float32)
        for dh in range(1, KH):
            acc = acc + jnp.dot(slab_ref[pl.ds(dh, L), :].astype(jnp.bfloat16),
                                band_ref[dh], preferred_element_type=jnp.float32)
        y = jnp.maximum(acc + bias_ref[...], 0.0)          # conv bias, then ReLU
        # AvgPool2d(2,2): W-pool as a right matmul (zero-padded to the next slab's
        # width), H-pool as one batched left matmul that also re-stacks the pooled
        # rows at the next slab's padded row offsets (zero rows land on the padding).
        yp = jnp.dot(y.astype(jnp.bfloat16), pw_ref[...],
                     preferred_element_type=jnp.float32)
        return jnp.dot(ph_ref[...], yp.astype(jnp.bfloat16),
                       preferred_element_type=jnp.float32)

    # conv -> ReLU -> BN -> pool; the per-channel BN affine commutes with the average
    # pool, so it is applied after pooling (scale/shift are zero on the padding,
    # keeping the next slab's borders exactly zero).
    z1 = conv_pool(slab1_ref, b1_ref, bias1_ref, pw1_ref, ph1_ref)
    slab2_ref[...] = z1 * sc1_ref[...] + sh1_ref[...]          # (B*18, 18*M)
    z2 = conv_pool(slab2_ref, b2_ref, bias2_ref, pw2_ref, ph2_ref)
    slab3_ref[...] = z2 * sc2_ref[...] + sh2_ref[...]          # (B*11, 11*2M)
    z3 = conv_pool(slab3_ref, b3_ref, bias3_ref, pw3_ref, ph3_ref)
    feat = z3 * sc3_ref[...] + sh3_ref[...]                    # (3*B, 3*4M) features

    # fc1 + ReLU: feat row h*B+b holds pooled row h of image b; contract the 3 rows.
    acc = fc1b_ref[...]
    for h in range(feat.shape[0] // B):
        acc = acc + jnp.dot(feat[h * B:(h + 1) * B, :].astype(jnp.bfloat16),
                            w1h_ref[h], preferred_element_type=jnp.float32)
    hvec = jnp.maximum(acc, 0.0)
    # Dropout(0.5) is identity in eval mode.
    # TODO(synk): training-mode dropout (pltpu.prng_* mask) is not implemented.
    o_ref[...] = (jnp.dot(hvec.astype(jnp.bfloat16), fc2w_ref[...],
                          preferred_element_type=jnp.float32) + fc2b_ref[...])


# --------------------- parameter setup (plain JAX, done once) ----------------
def _bn_scale_shift(gamma, beta, mean, var, eps=1e-5):
    scale = gamma / jnp.sqrt(var + eps)
    return scale, beta - mean * scale


def _band_matrices(w_eff, W):
    """(O, C, 5, 5) OIHW conv weight -> (5, (W+4)*C, W*O) banded matrices B with
    B[dh, j*C+c, w*O+o] = w_eff[o, c, dh, j-w+2] (0 when the kw offset is out of
    range), so out[h, w*O+o] = sum_dh slab[h+dh, :] @ B[dh] is the 'same' conv."""
    O, C, _, _ = w_eff.shape
    Wp = W + KW - 1
    jj = jnp.arange(Wp)[:, None]
    ww = jnp.arange(W)[None, :]
    dw = jj - ww + PAD                                        # (Wp, W)
    valid = (dw >= 0) & (dw < KW)
    k = jnp.transpose(w_eff, (2, 3, 1, 0))                    # (kh, kw, C, O)
    k_sel = k[:, jnp.clip(dw, 0, KW - 1), :, :]               # (5, Wp, W, C, O)
    k_sel = jnp.where(valid[None, :, :, None, None], k_sel, 0.0)
    return jnp.transpose(k_sel, (0, 1, 3, 2, 4)).reshape(KH, Wp * C, W * O)


def _pool_w_matrix(W, C):
    """(W*C, (W//2)*C): 0.5 where output (w2, c) pools input (w, c), w in {2w2, 2w2+1}."""
    W2 = W // 2
    w = jnp.arange(W)[:, None]
    w2 = jnp.arange(W2)[None, :]
    pw = jnp.where((w // 2 == w2) & (w < 2 * W2), 0.5, 0.0)
    return jnp.einsum("ab,cd->acbd", pw, jnp.eye(C)).reshape(W * C, W2 * C)


def _pool_h_stack(B, Hp_in, H_out, Hp_out):
    """(B*Hp_out, B*Hp_in-4) 0/0.5 matrix: averages vertical row pairs of the valid
    conv rows of every image in the batch-stacked layout and places them at the next
    padded slab's row offsets (the next slab's padding rows come out exactly zero)."""
    L = B * Hp_in - (KH - 1)
    rr = jnp.arange(B * Hp_out)
    b, p = rr // Hp_out, rr % Hp_out
    h2 = p - PAD
    valid = (h2 >= 0) & (h2 < H_out)
    src = b * Hp_in + 2 * h2
    cc = jnp.arange(L)[None, :]
    hit = (cc == src[:, None]) | (cc == src[:, None] + 1)
    return jnp.where(hit & valid[:, None], 0.5, 0.0)


def _pool_h_feat(B, Hp_in, H_out):
    """(H_out*B, B*Hp_in-4): same row-pair average, stacked h-major for the FC stage."""
    L = B * Hp_in - (KH - 1)
    rr = jnp.arange(H_out * B)
    h2, b = rr // B, rr % B
    src = b * Hp_in + 2 * h2
    cc = jnp.arange(L)[None, :]
    hit = (cc == src[:, None]) | (cc == src[:, None] + 1)
    return jnp.where(hit, 0.5, 0.0)


def init_params(key, M=8, Kb=5):
    """Synthetic parameters with MNIST_DCF_Net shapes/semantics (eval mode)."""
    keys = iter(jax.random.split(key, 32))
    conv = []
    for cin, cout in [(1, M), (M, 2 * M), (2 * M, 4 * M)]:
        bases = jax.random.normal(next(keys), (Kb, KH, KW), jnp.float32) * 0.2
        coef = jax.random.normal(next(keys), (cout, cin * Kb), jnp.float32) * 0.1
        # DCFNet: effective conv weight = sum_b coef[o, c, b] * bases[b]  (OIHW)
        w_eff = jnp.einsum("ocb,bhw->ochw", coef.reshape(cout, cin, Kb), bases)
        bias = jax.random.normal(next(keys), (cout,), jnp.float32) * 0.05
        gamma = 1.0 + 0.1 * jax.random.normal(next(keys), (cout,), jnp.float32)
        beta = 0.1 * jax.random.normal(next(keys), (cout,), jnp.float32)
        rmean = 0.1 * jax.random.normal(next(keys), (cout,), jnp.float32)
        rvar = jnp.abs(jax.random.normal(next(keys), (cout,), jnp.float32)) + 0.5
        scale, shift = _bn_scale_shift(gamma, beta, rmean, rvar)
        conv.append(dict(w_eff=w_eff, bias=bias, scale=scale, shift=shift, cout=cout))
    feat = 3 * 3 * 4 * M
    return dict(
        conv=conv,
        fc1_w=jax.random.normal(next(keys), (64, feat), jnp.float32) / jnp.sqrt(feat),
        fc1_b=jax.random.normal(next(keys), (64,), jnp.float32) * 0.05,
        fc2_w=jax.random.normal(next(keys), (10, 64), jnp.float32) / 8.0,
        fc2_b=jax.random.normal(next(keys), (10,), jnp.float32) * 0.05,
    )


def pack_params(params, B):
    """Precompute every kernel operand once: banded conv matrices, batched pooling
    matrices (MXU operands -> bf16), bias / BN rows+slabs (f32), reordered fc1 and
    zero-padded lane-dense fc2 (so the output store is an unmasked (B, 128) slab)."""
    ops = []
    for li, (layer, H) in enumerate(zip(params["conv"], SPATIAL)):
        O, H2, Hp = layer["cout"], H // 2, H + 2 * PAD
        band = _band_matrices(layer["w_eff"], H).astype(jnp.bfloat16)
        bias_row = jnp.tile(layer["bias"], H).reshape(1, H * O).astype(jnp.float32)
        pw = _pool_w_matrix(H, O)                              # (H*O, H2*O)
        scale_row = jnp.tile(layer["scale"], H2)
        shift_row = jnp.tile(layer["shift"], H2)
        if li < 2:
            # Widen to the next layer's padded slab width: the zero columns become the
            # next conv's right zero padding; the shift slab is zero on padding rows.
            Hp_next = H2 + 2 * PAD
            wid = Hp_next * O
            pw = jnp.pad(pw, ((0, 0), (0, wid - H2 * O)))
            scale_row = jnp.pad(scale_row, (0, wid - H2 * O))
            shift_row = jnp.pad(shift_row, (0, wid - H2 * O))
            rows = jnp.arange(B * Hp_next) % Hp_next
            valid = (rows >= PAD) & (rows < PAD + H2)
            shift = jnp.where(valid[:, None], shift_row[None, :], 0.0)
            ph = _pool_h_stack(B, Hp, H2, Hp_next)
        else:
            shift = shift_row.reshape(1, H2 * O)
            ph = _pool_h_feat(B, Hp, H2)
        ops += [band, bias_row,
                pw.astype(jnp.bfloat16), ph.astype(jnp.bfloat16),
                scale_row.reshape(1, -1).astype(jnp.float32),
                shift.astype(jnp.float32)]
    c3 = params["conv"][2]["cout"]                             # 4*M channels
    # PyTorch flattens NCHW -> (c, h, w); reorder fc1 to the kernel's (h, w*C+c) rows.
    w1 = params["fc1_w"].reshape(64, c3, 3, 3)
    w1 = jnp.transpose(w1, (2, 3, 1, 0)).reshape(3, 3 * c3, 64)
    fc2w = jnp.zeros((64, 128), jnp.float32).at[:, :10].set(params["fc2_w"].T)
    fc2b = jnp.zeros((1, 128), jnp.float32).at[:, :10].set(params["fc2_b"][None, :])
    ops += [w1.astype(jnp.bfloat16),
            params["fc1_b"].reshape(1, 64).astype(jnp.float32),
            fc2w.astype(jnp.bfloat16), fc2b]
    return tuple(ops)


# ------------------------------- forward wrapper ------------------------------
def mnist_dcf_forward(x_nchw, kernel_ops, M=8, batch_block=8):
    """Run the fused net: batch_block images per grid step (stacked into the MXU M
    dimension); the batch is zero-padded up to a multiple of batch_block."""
    N = x_nchw.shape[0]
    B = batch_block
    Np = pl.cdiv(N, B) * B
    H1 = SPATIAL[0]
    x = x_nchw[:, 0, :, :].astype(jnp.bfloat16)                # raw images, bf16 DMA
    if Np != N:
        x = jnp.concatenate([x, jnp.zeros((Np - N, H1, H1), jnp.bfloat16)], axis=0)

    def _const_spec(a):
        nd = a.ndim
        return pl.BlockSpec(a.shape, lambda n: (0,) * nd)      # resident across grid

    slab_shapes = [(B * (h + 2 * PAD), (h + 2 * PAD) * c)
                   for h, c in zip(SPATIAL, (1, M, 2 * M))]

    out = pl.pallas_call(
        _dcf_net_kernel,
        out_shape=jax.ShapeDtypeStruct((Np, 128), jnp.float32),
        grid_spec=pltpu.PrefetchScalarGridSpec(
            num_scalar_prefetch=0,
            grid=(Np // B,),                                   # B images per grid step
            in_specs=[pl.BlockSpec((B, H1, H1), lambda n: (n, 0, 0))] +
                     [_const_spec(a) for a in kernel_ops],
            out_specs=pl.BlockSpec((B, 128), lambda n: (n, 0)),
            scratch_shapes=[pltpu.VMEM(s, jnp.float32) for s in slab_shapes]),
        compiler_params=pltpu.CompilerParams(
            dimension_semantics=("parallel",),                 # batch blocks across TCs
            vmem_limit_bytes=32 * 1024 * 1024),
    )(x, *kernel_ops)
    return out[:N, :10]


# -------------------------- pure-JAX reference (check) ------------------------
def _reference_forward(x_nchw, params):
    x = x_nchw.astype(jnp.float32)
    for layer in params["conv"]:
        x = jax.lax.conv_general_dilated(
            x, layer["w_eff"], window_strides=(1, 1),
            padding=((PAD, PAD), (PAD, PAD)),
            dimension_numbers=("NCHW", "OIHW", "NCHW"))
        x = x + layer["bias"][None, :, None, None]
        x = jnp.maximum(x, 0.0)
        x = x * layer["scale"][None, :, None, None] + layer["shift"][None, :, None, None]
        n, c, h, w = x.shape
        x = x[:, :, :h // 2 * 2, :w // 2 * 2].reshape(n, c, h // 2, 2, w // 2, 2).mean(axis=(3, 5))
    feat = x.reshape(x.shape[0], -1)
    h1 = jnp.maximum(feat @ params["fc1_w"].T + params["fc1_b"], 0.0)
    return h1 @ params["fc2_w"].T + params["fc2_b"]


if __name__ == "__main__":
    key = jax.random.PRNGKey(0)
    k_param, k_x = jax.random.split(key)

    M = 8                                       # small num_features (PyTorch default 32)
    B = 8                                       # images per grid step (multiple of 8)
    params = init_params(k_param, M=M, Kb=5)
    kernel_ops = pack_params(params, B=B)

    # MNIST-like input: batch=2, 1 channel, 28x28 (28 -> 14 -> 7 -> 3 after 3 pools).
    x = jax.random.normal(k_x, (2, 1, 28, 28), jnp.float32)

    logits = mnist_dcf_forward(x, kernel_ops, M=M, batch_block=B)
    logits = jax.block_until_ready(logits)
    assert logits.shape == (2, 10), logits.shape
    assert bool(jnp.all(jnp.isfinite(logits)))

    # sanity-check the fused kernel against a pure-JAX reference (loose: bf16 matmuls)
    ref = _reference_forward(x, params)
    err = float(jnp.max(jnp.abs(logits - ref)))
    tol = 5e-2 * (1.0 + float(jnp.max(jnp.abs(ref))))
    assert err < tol, f"kernel vs reference mismatch: {err} (tol {tol})"

    print("KERNEL_OK")
</pallas_src>

<mosaic_0001>
module attributes {stable_mosaic.version = 11 : i64} {
  func.func @_dcf_net_kernel(%arg0: i32, %arg1: memref<8x28x28xbf16, #tpu.memory_space<vmem>>, %arg2: memref<5x32x224xbf16, #tpu.memory_space<vmem>>, %arg3: memref<1x224xf32, #tpu.memory_space<vmem>>, %arg4: memref<224x144xbf16, #tpu.memory_space<vmem>>, %arg5: memref<144x252xbf16, #tpu.memory_space<vmem>>, %arg6: memref<1x144xf32, #tpu.memory_space<vmem>>, %arg7: memref<144x144xf32, #tpu.memory_space<vmem>>, %arg8: memref<5x144x224xbf16, #tpu.memory_space<vmem>>, %arg9: memref<1x224xf32, #tpu.memory_space<vmem>>, %arg10: memref<224x176xbf16, #tpu.memory_space<vmem>>, %arg11: memref<88x140xbf16, #tpu.memory_space<vmem>>, %arg12: memref<1x176xf32, #tpu.memory_space<vmem>>, %arg13: memref<88x176xf32, #tpu.memory_space<vmem>>, %arg14: memref<5x176x224xbf16, #tpu.memory_space<vmem>>, %arg15: memref<1x224xf32, #tpu.memory_space<vmem>>, %arg16: memref<224x96xbf16, #tpu.memory_space<vmem>>, %arg17: memref<24x84xbf16, #tpu.memory_space<vmem>>, %arg18: memref<1x96xf32, #tpu.memory_space<vmem>>, %arg19: memref<1x96xf32, #tpu.memory_space<vmem>>, %arg20: memref<3x96x64xbf16, #tpu.memory_space<vmem>>, %arg21: memref<1x64xf32, #tpu.memory_space<vmem>>, %arg22: memref<64x128xbf16, #tpu.memory_space<vmem>>, %arg23: memref<1x128xf32, #tpu.memory_space<vmem>>, %arg24: memref<8x128xf32, #tpu.memory_space<vmem>>, %arg25: memref<256x32xf32, #tpu.memory_space<vmem>>, %arg26: memref<144x144xf32, #tpu.memory_space<vmem>>, %arg27: memref<88x176xf32, #tpu.memory_space<vmem>>) attributes {dimension_semantics = [#tpu.dimension_semantics<parallel>], iteration_bounds = array<i64: 1>, scalar_prefetch = 0 : i64, scratch_operands = 3 : i64, tpu.core_type = #tpu.core_type<tc>, window_params = [{transform_indices = @transform_0, window_bounds = array<i64: 8, 28, 28>}, {pipeline_mode = #tpu.pipeline_mode<synchronous>, transform_indices = @transform_1, window_bounds = array<i64: 5, 32, 224>}, {pipeline_mode = #tpu.pipeline_mode<synchronous>, transform_indices = @transform_2, window_bounds = array<i64: 1, 224>}, {pipeline_mode = #tpu.pipeline_mode<synchronous>, transform_indices = @transform_3, window_bounds = array<i64: 224, 144>}, {pipeline_mode = #tpu.pipeline_mode<synchronous>, transform_indices = @transform_4, window_bounds = array<i64: 144, 252>}, {pipeline_mode = #tpu.pipeline_mode<synchronous>, transform_indices = @transform_5, window_bounds = array<i64: 1, 144>}, {pipeline_mode = #tpu.pipeline_mode<synchronous>, transform_indices = @transform_6, window_bounds = array<i64: 144, 144>}, {pipeline_mode = #tpu.pipeline_mode<synchronous>, transform_indices = @transform_7, window_bounds = array<i64: 5, 144, 224>}, {pipeline_mode = #tpu.pipeline_mode<synchronous>, transform_indices = @transform_8, window_bounds = array<i64: 1, 224>}, {pipeline_mode = #tpu.pipeline_mode<synchronous>, transform_indices = @transform_9, window_bounds = array<i64: 224, 176>}, {pipeline_mode = #tpu.pipeline_mode<synchronous>, transform_indices = @transform_10, window_bounds = array<i64: 88, 140>}, {pipeline_mode = #tpu.pipeline_mode<synchronous>, transform_indices = @transform_11, window_bounds = array<i64: 1, 176>}, {pipeline_mode = #tpu.pipeline_mode<synchronous>, transform_indices = @transform_12, window_bounds = array<i64: 88, 176>}, {pipeline_mode = #tpu.pipeline_mode<synchronous>, transform_indices = @transform_13, window_bounds = array<i64: 5, 176, 224>}, {pipeline_mode = #tpu.pipeline_mode<synchronous>, transform_indices = @transform_14, window_bounds = array<i64: 1, 224>}, {pipeline_mode = #tpu.pipeline_mode<synchronous>, transform_indices = @transform_15, window_bounds = array<i64: 224, 96>}, {pipeline_mode = #tpu.pipeline_mode<synchronous>, transform_indices = @transform_16, window_bounds = array<i64: 24, 84>}, {pipeline_mode = #tpu.pipeline_mode<synchronous>, transform_indices = @transform_17, window_bounds = array<i64: 1, 96>}, {pipeline_mode = #tpu.pipeline_mode<synchronous>, transform_indices = @transform_18, window_bounds = array<i64: 1, 96>}, {pipeline_mode = #tpu.pipeline_mode<synchronous>, transform_indices = @transform_19, window_bounds = array<i64: 3, 96, 64>}, {pipeline_mode = #tpu.pipeline_mode<synchronous>, transform_indices = @transform_20, window_bounds = array<i64: 1, 64>}, {pipeline_mode = #tpu.pipeline_mode<synchronous>, transform_indices = @transform_21, window_bounds = array<i64: 64, 128>}, {pipeline_mode = #tpu.pipeline_mode<synchronous>, transform_indices = @transform_22, window_bounds = array<i64: 1, 128>}, {transform_indices = @transform_23, window_bounds = array<i64: 8, 128>}]} {
    %cst = arith.constant 0.000000e+00 : f32
    %0 = vector.broadcast %cst : f32 to vector<256x32xf32>
    %c0 = arith.constant 0 : index
    %c0_0 = arith.constant 0 : index
    %1 = vector.load %arg25[%c0, %c0_0] : memref<256x32xf32, #tpu.memory_space<vmem>>, vector<256x32xf32>
    tpu.vector_store %arg25[%c0, %c0_0], %0 {strides = array<i32>} : memref<256x32xf32, #tpu.memory_space<vmem>>, vector<256x32xf32>,
    %c0_1 = arith.constant 0 : index
    %c0_2 = arith.constant 0 : index
    %c0_3 = arith.constant 0 : index
    %2 = vector.load %arg1[%c0_1, %c0_2, %c0_3] : memref<8x28x28xbf16, #tpu.memory_space<vmem>>, vector<1x28x28xbf16>
    %3 = vector.shape_cast %2 : vector<1x28x28xbf16> to vector<28x28xbf16>
    %4 = arith.extf %3 : vector<28x28xbf16> to vector<28x28xf32>
    %c2 = arith.constant 2 : index
    %c0_4 = arith.constant 0 : index
    %5 = vector.load %arg25[%c2, %c0_4] : memref<256x32xf32, #tpu.memory_space<vmem>>, vector<28x28xf32>
    tpu.vector_store %arg25[%c2, %c0_4], %4 {strides = array<i32>} : memref<256x32xf32, #tpu.memory_space<vmem>>, vector<28x28xf32>,
    %c1 = arith.constant 1 : index
    %c0_5 = arith.constant 0 : index
    %c0_6 = arith.constant 0 : index
    %6 = vector.load %arg1[%c1, %c0_5, %c0_6] : memref<8x28x28xbf16, #tpu.memory_space<vmem>>, vector<1x28x28xbf16>
    %7 = vector.shape_cast %6 : vector<1x28x28xbf16> to vector<28x28xbf16>
    %8 = arith.extf %7 : vector<28x28xbf16> to vector<28x28xf32>
    %c34 = arith.constant 34 : index
    %c0_7 = arith.constant 0 : index
    %9 = vector.load %arg25[%c34, %c0_7] : memref<256x32xf32, #tpu.memory_space<vmem>>, vector<28x28xf32>
    tpu.vector_store %arg25[%c34, %c0_7], %8 {strides = array<i32>} : memref<256x32xf32, #tpu.memory_space<vmem>>, vector<28x28xf32>,
    %c2_8 = arith.constant 2 : index
    %c0_9 = arith.constant 0 : index
    %c0_10 = arith.constant 0 : index
    %10 = vector.load %arg1[%c2_8, %c0_9, %c0_10] : memref<8x28x28xbf16, #tpu.memory_space<vmem>>, vector<1x28x28xbf16>
    %11 = vector.shape_cast %10 : vector<1x28x28xbf16> to vector<28x28xbf16>
    %12 = arith.extf %11 : vector<28x28xbf16> to vector<28x28xf32>
    %c66 = arith.constant 66 : index
    %c0_11 = arith.constant 0 : index
    %13 = vector.load %arg25[%c66, %c0_11] : memref<256x32xf32, #tpu.memory_space<vmem>>, vector<28x28xf32>
    tpu.vector_store %arg25[%c66, %c0_11], %12 {strides = array<i32>} : memref<256x32xf32, #tpu.memory_space<vmem>>, vector<28x28xf32>,
    %c3 = arith.constant 3 : index
    %c0_12 = arith.constant 0 : index
    %c0_13 = arith.constant 0 : index
    %14 = vector.load %arg1[%c3, %c0_12, %c0_13] : memref<8x28x28xbf16, #tpu.memory_space<vmem>>, vector<1x28x28xbf16>
    %15 = vector.shape_cast %14 : vector<1x28x28xbf16> to vector<28x28xbf16>
    %16 = arith.extf %15 : vector<28x28xbf16> to vector<28x28xf32>
    %c98 = arith.constant 98 : index
    %c0_14 = arith.constant 0 : index
    %17 = vector.load %arg25[%c98, %c0_14] : memref<256x32xf32, #tpu.memory_space<vmem>>, vector<28x28xf32>
    tpu.vector_store %arg25[%c98, %c0_14], %16 {strides = array<i32>} : memref<256x32xf32, #tpu.memory_space<vmem>>, vector<28x28xf32>,
    %c4 = arith.constant 4 : index
    %c0_15 = arith.constant 0 : index
    %c0_16 = arith.constant 0 : index
    %18 = vector.load %arg1[%c4, %c0_15, %c0_16] : memref<8x28x28xbf16, #tpu.memory_space<vmem>>, vector<1x28x28xbf16>
    %19 = vector.shape_cast %18 : vector<1x28x28xbf16> to vector<28x28xbf16>
    %20 = arith.extf %19 : vector<28x28xbf16> to vector<28x28xf32>
    %c130 = arith.constant 130 : index
    %c0_17 = arith.constant 0 : index
    %21 = vector.load %arg25[%c130, %c0_17] : memref<256x32xf32, #tpu.memory_space<vmem>>, vector<28x28xf32>
    tpu.vector_store %arg25[%c130, %c0_17], %20 {strides = array<i32>} : memref<256x32xf32, #tpu.memory_space<vmem>>, vector<28x28xf32>,
    %c5 = arith.constant 5 : index
    %c0_18 = arith.constant 0 : index
    %c0_19 = arith.constant 0 : index
    %22 = vector.load %arg1[%c5, %c0_18, %c0_19] : memref<8x28x28xbf16, #tpu.memory_space<vmem>>, vector<1x28x28xbf16>
    %23 = vector.shape_cast %22 : vector<1x28x28xbf16> to vector<28x28xbf16>
    %24 = arith.extf %23 : vector<28x28xbf16> to vector<28x28xf32>
    %c162 = arith.constant 162 : index
    %c0_20 = arith.constant 0 : index
    %25 = vector.load %arg25[%c162, %c0_20] : memref<256x32xf32, #tpu.memory_space<vmem>>, vector<28x28xf32>
    tpu.vector_store %arg25[%c162, %c0_20], %24 {strides = array<i32>} : memref<256x32xf32, #tpu.memory_space<vmem>>, vector<28x28xf32>,
    %c6 = arith.constant 6 : index
    %c0_21 = arith.constant 0 : index
    %c0_22 = arith.constant 0 : index
    %26 = vector.load %arg1[%c6, %c0_21, %c0_22] : memref<8x28x28xbf16, #tpu.memory_space<vmem>>, vector<1x28x28xbf16>
    %27 = vector.shape_cast %26 : vector<1x28x28xbf16> to vector<28x28xbf16>
    %28 = arith.extf %27 : vector<28x28xbf16> to vector<28x28xf32>
    %c194 = arith.constant 194 : index
    %c0_23 = arith.constant 0 : index
    %29 = vector.load %arg25[%c194, %c0_23] : memref<256x32xf32, #tpu.memory_space<vmem>>, vector<28x28xf32>
    tpu.vector_store %arg25[%c194, %c0_23], %28 {strides = array<i32>} : memref<256x32xf32, #tpu.memory_space<vmem>>, vector<28x28xf32>,
    %c7 = arith.constant 7 : index
    %c0_24 = arith.constant 0 : index
    %c0_25 = arith.constant 0 : index
    %30 = vector.load %arg1[%c7, %c0_24, %c0_25] : memref<8x28x28xbf16, #tpu.memory_space<vmem>>, vector<1x28x28xbf16>
    %31 = vector.shape_cast %30 : vector<1x28x28xbf16> to vector<28x28xbf16>
    %32 = arith.extf %31 : vector<28x28xbf16> to vector<28x28xf32>
    %c226 = arith.constant 226 : index
    %c0_26 = arith.constant 0 : index
    %33 = vector.load %arg25[%c226, %c0_26] : memref<256x32xf32, #tpu.memory_space<vmem>>, vector<28x28xf32>
    tpu.vector_store %arg25[%c226, %c0_26], %32 {strides = array<i32>} : memref<256x32xf32, #tpu.memory_space<vmem>>, vector<28x28xf32>,
    %c0_27 = arith.constant 0 : index
    %c0_28 = arith.constant 0 : index
    %34 = vector.load %arg25[%c0_27, %c0_28] : memref<256x32xf32, #tpu.memory_space<vmem>>, vector<252x32xf32>
    %35 = arith.truncf %34 : vector<252x32xf32> to vector<252x32xbf16>
    %c0_29 = arith.constant 0 : index
    %c0_30 = arith.constant 0 : index
    %c0_31 = arith.constant 0 : index
    %36 = vector.load %arg2[%c0_29, %c0_30, %c0_31] : memref<5x32x224xbf16, #tpu.memory_space<vmem>>, vector<1x32x224xbf16>
    %37 = vector.shape_cast %36 : vector<1x32x224xbf16> to vector<32x224xbf16>
    %cst_32 = arith.constant dense<0.000000e+00> : vector<252x224xf32>
    %38 = tpu.matmul %35, %37, %cst_32 {dimension_numbers = #tpu.dot_dimension_numbers<[1], [0], [0], [1], [0, 0, 1, 1], [], []>} : vector<252x32xbf16>, vector<32x224xbf16>, vector<252x224xf32> -> vector<252x224xf32>
    %c1_33 = arith.constant 1 : index
    %c0_34 = arith.constant 0 : index
    %39 = vector.load %arg25[%c1_33, %c0_34] : memref<256x32xf32, #tpu.memory_space<vmem>>, vector<252x32xf32>
    %40 = arith.truncf %39 : vector<252x32xf32> to vector<252x32xbf16>
    %c1_35 = arith.constant 1 : index
    %c0_36 = arith.constant 0 : index
    %c0_37 = arith.constant 0 : index
    %41 = vector.load %arg2[%c1_35, %c0_36, %c0_37] : memref<5x32x224xbf16, #tpu.memory_space<vmem>>, vector<1x32x224xbf16>
    %42 = vector.shape_cast %41 : vector<1x32x224xbf16> to vector<32x224xbf16>
    %cst_38 = arith.constant dense<0.000000e+00> : vector<252x224xf32>
    %43 = tpu.matmul %40, %42, %cst_38 {dimension_numbers = #tpu.dot_dimension_numbers<[1], [0], [0], [1], [0, 0, 1, 1], [], []>} : vector<252x32xbf16>, vector<32x224xbf16>, vector<252x224xf32> -> vector<252x224xf32>
    %44 = arith.addf %38, %43 : vector<252x224xf32>
    %c2_39 = arith.constant 2 : index
    %c0_40 = arith.constant 0 : index
    %45 = vector.load %arg25[%c2_39, %c0_40] : memref<256x32xf32, #tpu.memory_space<vmem>>, vector<252x32xf32>
    %46 = arith.truncf %45 : vector<252x32xf32> to vector<252x32xbf16>
    %c2_41 = arith.constant 2 : index
    %c0_42 = arith.constant 0 : index
    %c0_43 = arith.constant 0 : index
    %47 = vector.load %arg2[%c2_41, %c0_42, %c0_43] : memref<5x32x224xbf16, #tpu.memory_space<vmem>>, vector<1x32x224xbf16>
    %48 = vector.shape_cast %47 : vector<1x32x224xbf16> to vector<32x224xbf16>
    %cst_44 = arith.constant dense<0.000000e+00> : vector<252x224xf32>
    %49 = tpu.matmul %46, %48, %cst_44 {dimension_numbers = #tpu.dot_dimension_numbers<[1], [0], [0], [1], [0, 0, 1, 1], [], []>} : vector<252x32xbf16>, vector<32x224xbf16>, vector<252x224xf32> -> vector<252x224xf32>
    %50 = arith.addf %44, %49 : vector<252x224xf32>
    %c3_45 = arith.constant 3 : index
    %c0_46 = arith.constant 0 : index
    %51 = vector.load %arg25[%c3_45, %c0_46] : memref<256x32xf32, #tpu.memory_space<vmem>>, vector<252x32xf32>
    %52 = arith.truncf %51 : vector<252x32xf32> to vector<252x32xbf16>
    %c3_47 = arith.constant 3 : index
    %c0_48 = arith.constant 0 : index
    %c0_49 = arith.constant 0 : index
    %53 = vector.load %arg2[%c3_47, %c0_48, %c0_49] : memref<5x32x224xbf16, #tpu.memory_space<vmem>>, vector<1x32x224xbf16>
    %54 = vector.shape_cast %53 : vector<1x32x224xbf16> to vector<32x224xbf16>
    %cst_50 = arith.constant dense<0.000000e+00> : vector<252x224xf32>
    %55 = tpu.matmul %52, %54, %cst_50 {dimension_numbers = #tpu.dot_dimension_numbers<[1], [0], [0], [1], [0, 0, 1, 1], [], []>} : vector<252x32xbf16>, vector<32x224xbf16>, vector<252x224xf32> -> vector<252x224xf32>
    %56 = arith.addf %50, %55 : vector<252x224xf32>
    %c4_51 = arith.constant 4 : index
    %c0_52 = arith.constant 0 : index
    %57 = vector.load %arg25[%c4_51, %c0_52] : memref<256x32xf32, #tpu.memory_space<vmem>>, vector<252x32xf32>
    %58 = arith.truncf %57 : vector<252x32xf32> to vector<252x32xbf16>
    %c4_53 = arith.constant 4 : index
    %c0_54 = arith.constant 0 : index
    %c0_55 = arith.constant 0 : index
    %59 = vector.load %arg2[%c4_53, %c0_54, %c0_55] : memref<5x32x224xbf16, #tpu.memory_space<vmem>>, vector<1x32x224xbf16>
    %60 = vector.shape_cast %59 : vector<1x32x224xbf16> to vector<32x224xbf16>
    %cst_56 = arith.constant dense<0.000000e+00> : vector<252x224xf32>
    %61 = tpu.matmul %58, %60, %cst_56 {dimension_numbers = #tpu.dot_dimension_numbers<[1], [0], [0], [1], [0, 0, 1, 1], [], []>} : vector<252x32xbf16>, vector<32x224xbf16>, vector<252x224xf32> -> vector<252x224xf32>
    %62 = arith.addf %56, %61 : vector<252x224xf32>
    %c0_57 = arith.constant 0 : index
    %c0_58 = arith.constant 0 : index
    %63 = vector.load %arg3[%c0_57, %c0_58] : memref<1x224xf32, #tpu.memory_space<vmem>>, vector<1x224xf32>
    %64 = vector.broadcast %63 : vector<1x224xf32> to vector<252x224xf32>
    %65 = arith.addf %62, %64 : vector<252x224xf32>
    %cst_59 = arith.constant 0.000000e+00 : f32
    %66 = vector.broadcast %cst_59 : f32 to vector<252x224xf32>
    %67 = arith.maximumf %65, %66 : vector<252x224xf32>
    %68 = arith.truncf %67 : vector<252x224xf32> to vector<252x224xbf16>
    %c0_60 = arith.constant 0 : index
    %c0_61 = arith.constant 0 : index
    %69 = vector.load %arg4[%c0_60, %c0_61] : memref<224x144xbf16, #tpu.memory_space<vmem>>, vector<224x144xbf16>
    %cst_62 = arith.constant dense<0.000000e+00> : vector<252x144xf32>
    %70 = tpu.matmul %68, %69, %cst_62 {dimension_numbers = #tpu.dot_dimension_numbers<[1], [0], [0], [1], [0, 0, 1, 1], [], []>} : vector<252x224xbf16>, vector<224x144xbf16>, vector<252x144xf32> -> vector<252x144xf32>
    %c0_63 = arith.constant 0 : index
    %c0_64 = arith.constant 0 : index
    %71 = vector.load %arg5[%c0_63, %c0_64] : memref<144x252xbf16, #tpu.memory_space<vmem>>, vector<144x252xbf16>
    %72 = arith.truncf %70 : vector<252x144xf32> to vector<252x144xbf16>
    %cst_65 = arith.constant dense<0.000000e+00> : vector<144x144xf32>
    %73 = tpu.matmul %71, %72, %cst_65 {dimension_numbers = #tpu.dot_dimension_numbers<[1], [0], [0], [1], [0, 0, 1, 1], [], []>} : vector<144x252xbf16>, vector<252x144xbf16>, vector<144x144xf32> -> vector<144x144xf32>
    %c0_66 = arith.constant 0 : index
    %c0_67 = arith.constant 0 : index
    %74 = vector.load %arg6[%c0_66, %c0_67] : memref<1x144xf32, #tpu.memory_space<vmem>>, vector<1x144xf32>
    %75 = vector.broadcast %74 : vector<1x144xf32> to vector<144x144xf32>
    %76 = arith.mulf %73, %75 : vector<144x144xf32>
    %c0_68 = arith.constant 0 : index
    %c0_69 = arith.constant 0 : index
    %77 = vector.load %arg7[%c0_68, %c0_69] : memref<144x144xf32, #tpu.memory_space<vmem>>, vector<144x144xf32>
    %78 = arith.addf %76, %77 : vector<144x144xf32>
    %c0_70 = arith.constant 0 : index
    %c0_71 = arith.constant 0 : index
    %79 = vector.load %arg26[%c0_70, %c0_71] : memref<144x144xf32, #tpu.memory_space<vmem>>, vector<144x144xf32>
    tpu.vector_store %arg26[%c0_70, %c0_71], %78 {strides = array<i32>} : memref<144x144xf32, #tpu.memory_space<vmem>>, vector<144x144xf32>,
    %c0_72 = arith.constant 0 : index
    %c0_73 = arith.constant 0 : index
    %80 = vector.load %arg26[%c0_72, %c0_73] : memref<144x144xf32, #tpu.memory_space<vmem>>, vector<140x144xf32>
    %81 = arith.truncf %80 : vector<140x144xf32> to vector<140x144xbf16>
    %c0_74 = arith.constant 0 : index
    %c0_75 = arith.constant 0 : index
    %c0_76 = arith.constant 0 : index
    %82 = vector.load %arg8[%c0_74, %c0_75, %c0_76] : memref<5x144x224xbf16, #tpu.memory_space<vmem>>, vector<1x144x224xbf16>
    %83 = vector.shape_cast %82 : vector<1x144x224xbf16> to vector<144x224xbf16>
    %cst_77 = arith.constant dense<0.000000e+00> : vector<140x224xf32>
    %84 = tpu.matmul %81, %83, %cst_77 {dimension_numbers = #tpu.dot_dimension_numbers<[1], [0], [0], [1], [0, 0, 1, 1], [], []>} : vector<140x144xbf16>, vector<144x224xbf16>, vector<140x224xf32> -> vector<140x224xf32>
    %c1_78 = arith.constant 1 : index
    %c0_79 = arith.constant 0 : index
    %85 = vector.load %arg26[%c1_78, %c0_79] : memref<144x144xf32, #tpu.memory_space<vmem>>, vector<140x144xf32>
    %86 = arith.truncf %85 : vector<140x144xf32> to vector<140x144xbf16>
    %c1_80 = arith.constant 1 : index
    %c0_81 = arith.constant 0 : index
    %c0_82 = arith.constant 0 : index
    %87 = vector.load %arg8[%c1_80, %c0_81, %c0_82] : memref<5x144x224xbf16, #tpu.memory_space<vmem>>, vector<1x144x224xbf16>
    %88 = vector.shape_cast %87 : vector<1x144x224xbf16> to vector<144x224xbf16>
    %cst_83 = arith.constant dense<0.000000e+00> : vector<140x224xf32>
    %89 = tpu.matmul %86, %88, %cst_83 {dimension_numbers = #tpu.dot_dimension_numbers<[1], [0], [0], [1], [0, 0, 1, 1], [], []>} : vector<140x144xbf16>, vector<144x224xbf16>, vector<140x224xf32> -> vector<140x224xf32>
    %90 = arith.addf %84, %89 : vector<140x224xf32>
    %c2_84 = arith.constant 2 : index
    %c0_85 = arith.constant 0 : index
    %91 = vector.load %arg26[%c2_84, %c0_85] : memref<144x144xf32, #tpu.memory_space<vmem>>, vector<140x144xf32>
    %92 = arith.truncf %91 : vector<140x144xf32> to vector<140x144xbf16>
    %c2_86 = arith.constant 2 : index
    %c0_87 = arith.constant 0 : index
    %c0_88 = arith.constant 0 : index
    %93 = vector.load %arg8[%c2_86, %c0_87, %c0_88] : memref<5x144x224xbf16, #tpu.memory_space<vmem>>, vector<1x144x224xbf16>
    %94 = vector.shape_cast %93 : vector<1x144x224xbf16> to vector<144x224xbf16>
    %cst_89 = arith.constant dense<0.000000e+00> : vector<140x224xf32>
    %95 = tpu.matmul %92, %94, %cst_89 {dimension_numbers = #tpu.dot_dimension_numbers<[1], [0], [0], [1], [0, 0, 1, 1], [], []>} : vector<140x144xbf16>, vector<144x224xbf16>, vector<140x224xf32> -> vector<140x224xf32>
    %96 = arith.addf %90, %95 : vector<140x224xf32>
    %c3_90 = arith.constant 3 : index
    %c0_91 = arith.constant 0 : index
    %97 = vector.load %arg26[%c3_90, %c0_91] : memref<144x144xf32, #tpu.memory_space<vmem>>, vector<140x144xf32>
    %98 = arith.truncf %97 : vector<140x144xf32> to vector<140x144xbf16>
    %c3_92 = arith.constant 3 : index
    %c0_93 = arith.constant 0 : index
    %c0_94 = arith.constant 0 : index
    %99 = vector.load %arg8[%c3_92, %c0_93, %c0_94] : memref<5x144x224xbf16, #tpu.memory_space<vmem>>, vector<1x144x224xbf16>
    %100 = vector.shape_cast %99 : vector<1x144x224xbf16> to vector<144x224xbf16>
    %cst_95 = arith.constant dense<0.000000e+00> : vector<140x224xf32>
    %101 = tpu.matmul %98, %100, %cst_95 {dimension_numbers = #tpu.dot_dimension_numbers<[1], [0], [0], [1], [0, 0, 1, 1], [], []>} : vector<140x144xbf16>, vector<144x224xbf16>, vector<140x224xf32> -> vector<140x224xf32>
    %102 = arith.addf %96, %101 : vector<140x224xf32>
    %c4_96 = arith.constant 4 : index
    %c0_97 = arith.constant 0 : index
    %103 = vector.load %arg26[%c4_96, %c0_97] : memref<144x144xf32, #tpu.memory_space<vmem>>, vector<140x144xf32>
    %104 = arith.truncf %103 : vector<140x144xf32> to vector<140x144xbf16>
    %c4_98 = arith.constant 4 : index
    %c0_99 = arith.constant 0 : index
    %c0_100 = arith.constant 0 : index
    %105 = vector.load %arg8[%c4_98, %c0_99, %c0_100] : memref<5x144x224xbf16, #tpu.memory_space<vmem>>, vector<1x144x224xbf16>
    %106 = vector.shape_cast %105 : vector<1x144x224xbf16> to vector<144x224xbf16>
    %cst_101 = arith.constant dense<0.000000e+00> : vector<140x224xf32>
    %107 = tpu.matmul %104, %106, %cst_101 {dimension_numbers = #tpu.dot_dimension_numbers<[1], [0], [0], [1], [0, 0, 1, 1], [], []>} : vector<140x144xbf16>, vector<144x224xbf16>, vector<140x224xf32> -> vector<140x224xf32>
    %108 = arith.addf %102, %107 : vector<140x224xf32>
    %c0_102 = arith.constant 0 : index
    %c0_103 = arith.constant 0 : index
    %109 = vector.load %arg9[%c0_102, %c0_103] : memref<1x224xf32, #tpu.memory_space<vmem>>, vector<1x224xf32>
    %110 = vector.broadcast %109 : vector<1x224xf32> to vector<140x224xf32>
    %111 = arith.addf %108, %110 : vector<140x224xf32>
    %cst_104 = arith.constant 0.000000e+00 : f32
    %112 = vector.broadcast %cst_104 : f32 to vector<140x224xf32>
    %113 = arith.maximumf %111, %112 : vector<140x224xf32>
    %114 = arith.truncf %113 : vector<140x224xf32> to vector<140x224xbf16>
    %c0_105 = arith.constant 0 : index
    %c0_106 = arith.constant 0 : index
    %115 = vector.load %arg10[%c0_105, %c0_106] : memref<224x176xbf16, #tpu.memory_space<vmem>>, vector<224x176xbf16>
    %cst_107 = arith.constant dense<0.000000e+00> : vector<140x176xf32>
    %116 = tpu.matmul %114, %115, %cst_107 {dimension_numbers = #tpu.dot_dimension_numbers<[1], [0], [0], [1], [0, 0, 1, 1], [], []>} : vector<140x224xbf16>, vector<224x176xbf16>, vector<140x176xf32> -> vector<140x176xf32>
    %c0_108 = arith.constant 0 : index
    %c0_109 = arith.constant 0 : index
    %117 = vector.load %arg11[%c0_108, %c0_109] : memref<88x140xbf16, #tpu.memory_space<vmem>>, vector<88x140xbf16>
    %118 = arith.truncf %116 : vector<140x176xf32> to vector<140x176xbf16>
    %cst_110 = arith.constant dense<0.000000e+00> : vector<88x176xf32>
    %119 = tpu.matmul %117, %118, %cst_110 {dimension_numbers = #tpu.dot_dimension_numbers<[1], [0], [0], [1], [0, 0, 1, 1], [], []>} : vector<88x140xbf16>, vector<140x176xbf16>, vector<88x176xf32> -> vector<88x176xf32>
    %c0_111 = arith.constant 0 : index
    %c0_112 = arith.constant 0 : index
    %120 = vector.load %arg12[%c0_111, %c0_112] : memref<1x176xf32, #tpu.memory_space<vmem>>, vector<1x176xf32>
    %121 = vector.broadcast %120 : vector<1x176xf32> to vector<88x176xf32>
    %122 = arith.mulf %119, %121 : vector<88x176xf32>
    %c0_113 = arith.constant 0 : index
    %c0_114 = arith.constant 0 : index
    %123 = vector.load %arg13[%c0_113, %c0_114] : memref<88x176xf32, #tpu.memory_space<vmem>>, vector<88x176xf32>
    %124 = arith.addf %122, %123 : vector<88x176xf32>
    %c0_115 = arith.constant 0 : index
    %c0_116 = arith.constant 0 : index
    %125 = vector.load %arg27[%c0_115, %c0_116] : memref<88x176xf32, #tpu.memory_space<vmem>>, vector<88x176xf32>
    tpu.vector_store %arg27[%c0_115, %c0_116], %124 {strides = array<i32>} : memref<88x176xf32, #tpu.memory_space<vmem>>, vector<88x176xf32>,
    %c0_117 = arith.constant 0 : index
    %c0_118 = arith.constant 0 : index
    %126 = vector.load %arg27[%c0_117, %c0_118] : memref<88x176xf32, #tpu.memory_space<vmem>>, vector<84x176xf32>
    %127 = arith.truncf %126 : vector<84x176xf32> to vector<84x176xbf16>
    %c0_119 = arith.constant 0 : index
    %c0_120 = arith.constant 0 : index
    %c0_121 = arith.constant 0 : index
    %128 = vector.load %arg14[%c0_119, %c0_120, %c0_121] : memref<5x176x224xbf16, #tpu.memory_space<vmem>>, vector<1x176x224xbf16>
    %129 = vector.shape_cast %128 : vector<1x176x224xbf16> to vector<176x224xbf16>
    %cst_122 = arith.constant dense<0.000000e+00> : vector<84x224xf32>
    %130 = tpu.matmul %127, %129, %cst_122 {dimension_numbers = #tpu.dot_dimension_numbers<[1], [0], [0], [1], [0, 0, 1, 1], [], []>} : vector<84x176xbf16>, vector<176x224xbf16>, vector<84x224xf32> -> vector<84x224xf32>
    %c1_123 = arith.constant 1 : index
    %c0_124 = arith.constant 0 : index
    %131 = vector.load %arg27[%c1_123, %c0_124] : memref<88x176xf32, #tpu.memory_space<vmem>>, vector<84x176xf32>
    %132 = arith.truncf %131 : vector<84x176xf32> to vector<84x176xbf16>
    %c1_125 = arith.constant 1 : index
    %c0_126 = arith.constant 0 : index
    %c0_127 = arith.constant 0 : index
    %133 = vector.load %arg14[%c1_125, %c0_126, %c0_127] : memref<5x176x224xbf16, #tpu.memory_space<vmem>>, vector<1x176x224xbf16>
    %134 = vector.shape_cast %133 : vector<1x176x224xbf16> to vector<176x224xbf16>
    %cst_128 = arith.constant dense<0.000000e+00> : vector<84x224xf32>
    %135 = tpu.matmul %132, %134, %cst_128 {dimension_numbers = #tpu.dot_dimension_numbers<[1], [0], [0], [1], [0, 0, 1, 1], [], []>} : vector<84x176xbf16>, vector<176x224xbf16>, vector<84x224xf32> -> vector<84x224xf32>
    %136 = arith.addf %130, %135 : vector<84x224xf32>
    %c2_129 = arith.constant 2 : index
    %c0_130 = arith.constant 0 : index
    %137 = vector.load %arg27[%c2_129, %c0_130] : memref<88x176xf32, #tpu.memory_space<vmem>>, vector<84x176xf32>
    %138 = arith.truncf %137 : vector<84x176xf32> to vector<84x176xbf16>
    %c2_131 = arith.constant 2 : index
    %c0_132 = arith.constant 0 : index
    %c0_133 = arith.constant 0 : index
    %139 = vector.load %arg14[%c2_131, %c0_132, %c0_133] : memref<5x176x224xbf16, #tpu.memory_space<vmem>>, vector<1x176x224xbf16>
    %140 = vector.shape_cast %139 : vector<1x176x224xbf16> to vector<176x224xbf16>
    %cst_134 = arith.constant dense<0.000000e+00> : vector<84x224xf32>
    %141 = tpu.matmul %138, %140, %cst_134 {dimension_numbers = #tpu.dot_dimension_numbers<[1], [0], [0], [1], [0, 0, 1, 1], [], []>} : vector<84x176xbf16>, vector<176x224xbf16>, vector<84x224xf32> -> vector<84x224xf32>
    %142 = arith.addf %136, %141 : vector<84x224xf32>
    %c3_135 = arith.constant 3 : index
    %c0_136 = arith.constant 0 : index
    %143 = vector.load %arg27[%c3_135, %c0_136] : memref<88x176xf32, #tpu.memory_space<vmem>>, vector<84x176xf32>
    %144 = arith.truncf %143 : vector<84x176xf32> to vector<84x176xbf16>
    %c3_137 = arith.constant 3 : index
    %c0_138 = arith.constant 0 : index
    %c0_139 = arith.constant 0 : index
    %145 = vector.load %arg14[%c3_137, %c0_138, %c0_139] : memref<5x176x224xbf16, #tpu.memory_space<vmem>>, vector<1x176x224xbf16>
    %146 = vector.shape_cast %145 : vector<1x176x224xbf16> to vector<176x224xbf16>
    %cst_140 = arith.constant dense<0.000000e+00> : vector<84x224xf32>
    %147 = tpu.matmul %144, %146, %cst_140 {dimension_numbers = #tpu.dot_dimension_numbers<[1], [0], [0], [1], [0, 0, 1, 1], [], []>} : vector<84x176xbf16>, vector<176x224xbf16>, vector<84x224xf32> -> vector<84x224xf32>
    %148 = arith.addf %142, %147 : vector<84x224xf32>
    %c4_141 = arith.constant 4 : index
    %c0_142 = arith.constant 0 : index
    %149 = vector.load %arg27[%c4_141, %c0_142] : memref<88x176xf32, #tpu.memory_space<vmem>>, vector<84x176xf32>
    %150 = arith.truncf %149 : vector<84x176xf32> to vector<84x176xbf16>
    %c4_143 = arith.constant 4 : index
    %c0_144 = arith.constant 0 : index
    %c0_145 = arith.constant 0 : index
    %151 = vector.load %arg14[%c4_143, %c0_144, %c0_145] : memref<5x176x224xbf16, #tpu.memory_space<vmem>>, vector<1x176x224xbf16>
    %152 = vector.shape_cast %151 : vector<1x176x224xbf16> to vector<176x224xbf16>
    %cst_146 = arith.constant dense<0.000000e+00> : vector<84x224xf32>
    %153 = tpu.matmul %150, %152, %cst_146 {dimension_numbers = #tpu.dot_dimension_numbers<[1], [0], [0], [1], [0, 0, 1, 1], [], []>} : vector<84x176xbf16>, vector<176x224xbf16>, vector<84x224xf32> -> vector<84x224xf32>
    %154 = arith.addf %148, %153 : vector<84x224xf32>
    %c0_147 = arith.constant 0 : index
    %c0_148 = arith.constant 0 : index
    %155 = vector.load %arg15[%c0_147, %c0_148] : memref<1x224xf32, #tpu.memory_space<vmem>>, vector<1x224xf32>
    %156 = vector.broadcast %155 : vector<1x224xf32> to vector<84x224xf32>
    %157 = arith.addf %154, %156 : vector<84x224xf32>
    %cst_149 = arith.constant 0.000000e+00 : f32
    %158 = vector.broadcast %cst_149 : f32 to vector<84x224xf32>
    %159 = arith.maximumf %157, %158 : vector<84x224xf32>
    %160 = arith.truncf %159 : vector<84x224xf32> to vector<84x224xbf16>
    %c0_150 = arith.constant 0 : index
    %c0_151 = arith.constant 0 : index
    %161 = vector.load %arg16[%c0_150, %c0_151] : memref<224x96xbf16, #tpu.memory_space<vmem>>, vector<224x96xbf16>
    %cst_152 = arith.constant dense<0.000000e+00> : vector<84x96xf32>
    %162 = tpu.matmul %160, %161, %cst_152 {dimension_numbers = #tpu.dot_dimension_numbers<[1], [0], [0], [1], [0, 0, 1, 1], [], []>} : vector<84x224xbf16>, vector<224x96xbf16>, vector<84x96xf32> -> vector<84x96xf32>
    %c0_153 = arith.constant 0 : index
    %c0_154 = arith.constant 0 : index
    %163 = vector.load %arg17[%c0_153, %c0_154] : memref<24x84xbf16, #tpu.memory_space<vmem>>, vector<24x84xbf16>
    %164 = arith.truncf %162 : vector<84x96xf32> to vector<84x96xbf16>
    %cst_155 = arith.constant dense<0.000000e+00> : vector<24x96xf32>
    %165 = tpu.matmul %163, %164, %cst_155 {dimension_numbers = #tpu.dot_dimension_numbers<[1], [0], [0], [1], [0, 0, 1, 1], [], []>} : vector<24x84xbf16>, vector<84x96xbf16>, vector<24x96xf32> -> vector<24x96xf32>
    %c0_156 = arith.constant 0 : index
    %c0_157 = arith.constant 0 : index
    %166 = vector.load %arg18[%c0_156, %c0_157] : memref<1x96xf32, #tpu.memory_space<vmem>>, vector<1x96xf32>
    %167 = vector.broadcast %166 : vector<1x96xf32> to vector<24x96xf32>
    %168 = arith.mulf %165, %167 : vector<24x96xf32>
    %c0_158 = arith.constant 0 : index
    %c0_159 = arith.constant 0 : index
    %169 = vector.load %arg19[%c0_158, %c0_159] : memref<1x96xf32, #tpu.memory_space<vmem>>, vector<1x96xf32>
    %170 = vector.broadcast %169 : vector<1x96xf32> to vector<24x96xf32>
    %171 = arith.addf %168, %170 : vector<24x96xf32>
    %c0_160 = arith.constant 0 : index
    %c0_161 = arith.constant 0 : index
    %172 = vector.load %arg21[%c0_160, %c0_161] : memref<1x64xf32, #tpu.memory_space<vmem>>, vector<1x64xf32>
    %173 = vector.extract_strided_slice %171 {offsets = [0, 0], sizes = [8, 96], strides = [1, 1]} : vector<24x96xf32> to vector<8x96xf32>
    %174 = arith.truncf %173 : vector<8x96xf32> to vector<8x96xbf16>
    %c0_162 = arith.constant 0 : index
    %c0_163 = arith.constant 0 : index
    %c0_164 = arith.constant 0 : index
    %175 = vector.load %arg20[%c0_162, %c0_163, %c0_164] : memref<3x96x64xbf16, #tpu.memory_space<vmem>>, vector<1x96x64xbf16>
    %176 = vector.shape_cast %175 : vector<1x96x64xbf16> to vector<96x64xbf16>
    %cst_165 = arith.constant dense<0.000000e+00> : vector<8x64xf32>
    %177 = tpu.matmul %174, %176, %cst_165 {dimension_numbers = #tpu.dot_dimension_numbers<[1], [0], [0], [1], [0, 0, 1, 1], [], []>} : vector<8x96xbf16>, vector<96x64xbf16>, vector<8x64xf32> -> vector<8x64xf32>
    %178 = vector.broadcast %172 : vector<1x64xf32> to vector<8x64xf32>
    %179 = arith.addf %178, %177 : vector<8x64xf32>
    %180 = vector.extract_strided_slice %171 {offsets = [8, 0], sizes = [8, 96], strides = [1, 1]} : vector<24x96xf32> to vector<8x96xf32>
    %181 = arith.truncf %180 : vector<8x96xf32> to vector<8x96xbf16>
    %c1_166 = arith.constant 1 : index
    %c0_167 = arith.constant 0 : index
    %c0_168 = arith.constant 0 : index
    %182 = vector.load %arg20[%c1_166, %c0_167, %c0_168] : memref<3x96x64xbf16, #tpu.memory_space<vmem>>, vector<1x96x64xbf16>
    %183 = vector.shape_cast %182 : vector<1x96x64xbf16> to vector<96x64xbf16>
    %cst_169 = arith.constant dense<0.000000e+00> : vector<8x64xf32>
    %184 = tpu.matmul %181, %183, %cst_169 {dimension_numbers = #tpu.dot_dimension_numbers<[1], [0], [0], [1], [0, 0, 1, 1], [], []>} : vector<8x96xbf16>, vector<96x64xbf16>, vector<8x64xf32> -> vector<8x64xf32>
    %185 = arith.addf %179, %184 : vector<8x64xf32>
    %186 = vector.extract_strided_slice %171 {offsets = [16, 0], sizes = [8, 96], strides = [1, 1]} : vector<24x96xf32> to vector<8x96xf32>
    %187 = arith.truncf %186 : vector<8x96xf32> to vector<8x96xbf16>
    %c2_170 = arith.constant 2 : index
    %c0_171 = arith.constant 0 : index
    %c0_172 = arith.constant 0 : index
    %188 = vector.load %arg20[%c2_170, %c0_171, %c0_172] : memref<3x96x64xbf16, #tpu.memory_space<vmem>>, vector<1x96x64xbf16>
    %189 = vector.shape_cast %188 : vector<1x96x64xbf16> to vector<96x64xbf16>
    %cst_173 = arith.constant dense<0.000000e+00> : vector<8x64xf32>
    %190 = tpu.matmul %187, %189, %cst_173 {dimension_numbers = #tpu.dot_dimension_numbers<[1], [0], [0], [1], [0, 0, 1, 1], [], []>} : vector<8x96xbf16>, vector<96x64xbf16>, vector<8x64xf32> -> vector<8x64xf32>
    %191 = arith.addf %185, %190 : vector<8x64xf32>
    %cst_174 = arith.constant 0.000000e+00 : f32
    %192 = vector.broadcast %cst_174 : f32 to vector<8x64xf32>
    %193 = arith.maximumf %191, %192 : vector<8x64xf32>
    %194 = arith.truncf %193 : vector<8x64xf32> to vector<8x64xbf16>
    %c0_175 = arith.constant 0 : index
    %c0_176 = arith.constant 0 : index
    %195 = vector.load %arg22[%c0_175, %c0_176] : memref<64x128xbf16, #tpu.memory_space<vmem>>, vector<64x128xbf16>
    %cst_177 = arith.constant dense<0.000000e+00> : vector<8x128xf32>
    %196 = tpu.matmul %194, %195, %cst_177 {dimension_numbers = #tpu.dot_dimension_numbers<[1], [0], [0], [1], [0, 0, 1, 1], [], []>} : vector<8x64xbf16>, vector<64x128xbf16>, vector<8x128xf32> -> vector<8x128xf32>
    %c0_178 = arith.constant 0 : index
    %c0_179 = arith.constant 0 : index
    %197 = vector.load %arg23[%c0_178, %c0_179] : memref<1x128xf32, #tpu.memory_space<vmem>>, vector<1x128xf32>
    %198 = vector.broadcast %197 : vector<1x128xf32> to vector<8x128xf32>
    %199 = arith.addf %196, %198 : vector<8x128xf32>
    %c0_180 = arith.constant 0 : index
    %c0_181 = arith.constant 0 : index
    %200 = vector.load %arg24[%c0_180, %c0_181] : memref<8x128xf32, #tpu.memory_space<vmem>>, vector<8x128xf32>
    tpu.vector_store %arg24[%c0_180, %c0_181], %199 {strides = array<i32>} : memref<8x128xf32, #tpu.memory_space<vmem>>, vector<8x128xf32>,
    return
  }
  func.func @transform_0(%arg0: i32) -> (i32, i32, i32) {
    %c0_i32 = arith.constant 0 : i32
    %c0_i32_0 = arith.constant 0 : i32
    %c0_i32_1 = arith.constant 0 : i32
    return %arg0, %c0_i32, %c0_i32_0 : i32, i32, i32
  }
  func.func @transform_1(%arg0: i32) -> (i32, i32, i32) {
    %c0_i32 = arith.constant 0 : i32
    %c0_i32_0 = arith.constant 0 : i32
    %c0_i32_1 = arith.constant 0 : i32
    %c0_i32_2 = arith.constant 0 : i32
    return %c0_i32, %c0_i32_0, %c0_i32_1 : i32, i32, i32
  }
  func.func @transform_2(%arg0: i32) -> (i32, i32) {
    %c0_i32 = arith.constant 0 : i32
    %c0_i32_0 = arith.constant 0 : i32
    %c0_i32_1 = arith.constant 0 : i32
    return %c0_i32, %c0_i32_0 : i32, i32
  }
  func.func @transform_3(%arg0: i32) -> (i32, i32) {
    %c0_i32 = arith.constant 0 : i32
    %c0_i32_0 = arith.constant 0 : i32
    %c0_i32_1 = arith.constant 0 : i32
    return %c0_i32, %c0_i32_0 : i32, i32
  }
  func.func @transform_4(%arg0: i32) -> (i32, i32) {
    %c0_i32 = arith.constant 0 : i32
    %c0_i32_0 = arith.constant 0 : i32
    %c0_i32_1 = arith.constant 0 : i32
    return %c0_i32, %c0_i32_0 : i32, i32
  }
  func.func @transform_5(%arg0: i32) -> (i32, i32) {
    %c0_i32 = arith.constant 0 : i32
    %c0_i32_0 = arith.constant 0 : i32
    %c0_i32_1 = arith.constant 0 : i32
    return %c0_i32, %c0_i32_0 : i32, i32
  }
  func.func @transform_6(%arg0: i32) -> (i32, i32) {
    %c0_i32 = arith.constant 0 : i32
    %c0_i32_0 = arith.constant 0 : i32
    %c0_i32_1 = arith.constant 0 : i32
    return %c0_i32, %c0_i32_0 : i32, i32
  }
  func.func @transform_7(%arg0: i32) -> (i32, i32, i32) {
    %c0_i32 = arith.constant 0 : i32
    %c0_i32_0 = arith.constant 0 : i32
    %c0_i32_1 = arith.constant 0 : i32
    %c0_i32_2 = arith.constant 0 : i32
    return %c0_i32, %c0_i32_0, %c0_i32_1 : i32, i32, i32
  }
  func.func @transform_8(%arg0: i32) -> (i32, i32) {
    %c0_i32 = arith.constant 0 : i32
    %c0_i32_0 = arith.constant 0 : i32
    %c0_i32_1 = arith.constant 0 : i32
    return %c0_i32, %c0_i32_0 : i32, i32
  }
  func.func @transform_9(%arg0: i32) -> (i32, i32) {
    %c0_i32 = arith.constant 0 : i32
    %c0_i32_0 = arith.constant 0 : i32
    %c0_i32_1 = arith.constant 0 : i32
    return %c0_i32, %c0_i32_0 : i32, i32
  }
  func.func @transform_10(%arg0: i32) -> (i32, i32) {
    %c0_i32 = arith.constant 0 : i32
    %c0_i32_0 = arith.constant 0 : i32
    %c0_i32_1 = arith.constant 0 : i32
    return %c0_i32, %c0_i32_0 : i32, i32
  }
  func.func @transform_11(%arg0: i32) -> (i32, i32) {
    %c0_i32 = arith.constant 0 : i32
    %c0_i32_0 = arith.constant 0 : i32
    %c0_i32_1 = arith.constant 0 : i32
    return %c0_i32, %c0_i32_0 : i32, i32
  }
  func.func @transform_12(%arg0: i32) -> (i32, i32) {
    %c0_i32 = arith.constant 0 : i32
    %c0_i32_0 = arith.constant 0 : i32
    %c0_i32_1 = arith.constant 0 : i32
    return %c0_i32, %c0_i32_0 : i32, i32
  }
  func.func @transform_13(%arg0: i32) -> (i32, i32, i32) {
    %c0_i32 = arith.constant 0 : i32
    %c0_i32_0 = arith.constant 0 : i32
    %c0_i32_1 = arith.constant 0 : i32
    %c0_i32_2 = arith.constant 0 : i32
    return %c0_i32, %c0_i32_0, %c0_i32_1 : i32, i32, i32
  }
  func.func @transform_14(%arg0: i32) -> (i32, i32) {
    %c0_i32 = arith.constant 0 : i32
    %c0_i32_0 = arith.constant 0 : i32
    %c0_i32_1 = arith.constant 0 : i32
    return %c0_i32, %c0_i32_0 : i32, i32
  }
  func.func @transform_15(%arg0: i32) -> (i32, i32) {
    %c0_i32 = arith.constant 0 : i32
    %c0_i32_0 = arith.constant 0 : i32
    %c0_i32_1 = arith.constant 0 : i32
    return %c0_i32, %c0_i32_0 : i32, i32
  }
  func.func @transform_16(%arg0: i32) -> (i32, i32) {
    %c0_i32 = arith.constant 0 : i32
    %c0_i32_0 = arith.constant 0 : i32
    %c0_i32_1 = arith.constant 0 : i32
    return %c0_i32, %c0_i32_0 : i32, i32
  }
  func.func @transform_17(%arg0: i32) -> (i32, i32) {
    %c0_i32 = arith.constant 0 : i32
    %c0_i32_0 = arith.constant 0 : i32
    %c0_i32_1 = arith.constant 0 : i32
    return %c0_i32, %c0_i32_0 : i32, i32
  }
  func.func @transform_18(%arg0: i32) -> (i32, i32) {
    %c0_i32 = arith.constant 0 : i32
    %c0_i32_0 = arith.constant 0 : i32
    %c0_i32_1 = arith.constant 0 : i32
    return %c0_i32, %c0_i32_0 : i32, i32
  }
  func.func @transform_19(%arg0: i32) -> (i32, i32, i32) {
    %c0_i32 = arith.constant 0 : i32
    %c0_i32_0 = arith.constant 0 : i32
    %c0_i32_1 = arith.constant 0 : i32
    %c0_i32_2 = arith.constant 0 : i32
    return %c0_i32, %c0_i32_0, %c0_i32_1 : i32, i32, i32
  }
  func.func @transform_20(%arg0: i32) -> (i32, i32) {
    %c0_i32 = arith.constant 0 : i32
    %c0_i32_0 = arith.constant 0 : i32
    %c0_i32_1 = arith.constant 0 : i32
    return %c0_i32, %c0_i32_0 : i32, i32
  }
  func.func @transform_21(%arg0: i32) -> (i32, i32) {
    %c0_i32 = arith.constant 0 : i32
    %c0_i32_0 = arith.constant 0 : i32
    %c0_i32_1 = arith.constant 0 : i32
    return %c0_i32, %c0_i32_0 : i32, i32
  }
  func.func @transform_22(%arg0: i32) -> (i32, i32) {
    %c0_i32 = arith.constant 0 : i32
    %c0_i32_0 = arith.constant 0 : i32
    %c0_i32_1 = arith.constant 0 : i32
    return %c0_i32, %c0_i32_0 : i32, i32
  }
  func.func @transform_23(%arg0: i32) -> (i32, i32) {
    %c0_i32 = arith.constant 0 : i32
    %c0_i32_0 = arith.constant 0 : i32
    return %arg0, %c0_i32 : i32, i32
  }
}

</mosaic_0001>

<bundles_post_ra>
// kernel: tpu_custom_call.1
= control target key start
LH: loop header
LB: loop body
LE: loop exit
PB: predicated region body
PF: predicated region fallthrough
CT: control target
= control target key end

     0   :  { %s12448_s0 = inlined_call_operand.vmem [shape: bf16[8,28,28], index: 0, kind: input, shape index: {}]   ;;  %s12449_s1 = inlined_call_operand.hbm [shape: bf16[5,32,224], index: 1, kind: input, shape index: {}]   ;;  %s12450_s2 = inlined_call_operand.vmem [shape: f32[1,224], index: 2, kind: input, shape index: {}]   ;;  %s12451_s3 = inlined_call_operand.vmem [shape: bf16[224,144], index: 3, kind: input, shape index: {}]   ;;  %s12452_s4 = inlined_call_operand.hbm [shape: bf16[144,252], index: 4, kind: input, shape index: {}]   ;;  %s12453_s5 = inlined_call_operand.vmem [shape: f32[1,144], index: 5, kind: input, shape index: {}]   ;;  %s12454_s6 = inlined_call_operand.hbm [shape: f32[144,144], index: 6, kind: input, shape index: {}]   ;;  %s12455_s7 = inlined_call_operand.vmem [shape: bf16[5,144,224], index: 7, kind: input, shape index: {}]   ;;  %s12456_s8 = inlined_call_operand.vmem [shape: f32[1,224], index: 8, kind: input, shape index: {}]   ;;  %s12457_s9 = inlined_call_operand.vmem [shape: bf16[224,176], index: 9, kind: input, shape index: {}]   ;;  %s12458_s10 = inlined_call_operand.vmem [shape: bf16[88,140], index: 10, kind: input, shape index: {}]   ;;  %s12459_s11 = inlined_call_operand.vmem [shape: f32[1,176], index: 11, kind: input, shape index: {}]   ;;  %s12460_s12 = inlined_call_operand.hbm [shape: f32[88,176], index: 12, kind: input, shape index: {}]   ;;  %s12461_s13 = inlined_call_operand.vmem [shape: bf16[5,176,224], index: 13, kind: input, shape index: {}]   ;;  %s12462_s14 = inlined_call_operand.vmem [shape: f32[1,224], index: 14, kind: input, shape index: {}]   ;;  %s12463_s15 = inlined_call_operand.vmem [shape: bf16[224,96], index: 15, kind: input, shape index: {}]   ;;  %s12464_s16 = inlined_call_operand.vmem [shape: bf16[24,84], index: 16, kind: input, shape index: {}]   ;;  %s12465_s17 = inlined_call_operand.vmem [shape: f32[1,96], index: 17, kind: input, shape index: {}]   ;;  %s12466_s18 = inlined_call_operand.vmem [shape: f32[1,96], index: 18, kind: input, shape index: {}]   ;;  %s12467_s19 = inlined_call_operand.vmem [shape: bf16[3,96,64], index: 19, kind: input, shape index: {}]   ;;  %s12468_s20 = inlined_call_operand.vmem [shape: f32[1,64], index: 20, kind: input, shape index: {}]   ;;  %s12469_s21 = inlined_call_operand.vmem [shape: bf16[64,128], index: 21, kind: input, shape index: {}]   ;;  %s12470_s22 = inlined_call_operand.vmem [shape: f32[1,128], index: 22, kind: input, shape index: {}]   ;;  %s12471_s23 = inlined_call_operand.hbm [shape: f32[8,128], index: 23, kind: output, shape index: {}]  }
   0x1   :  { %12485 = sst [smem:[#allocation19_spill]] %s12448_s0 }
   0x2   :  { %12486 = sst [smem:[#allocation20_spill]] %s12449_s1 }
   0x3   :  { %12487 = sst [smem:[#allocation21_spill]] %s12450_s2 }
   0x4   :  { %12488 = sst [smem:[#allocation22_spill]] %s12451_s3 }
   0x5   :  { %12489 = sst [smem:[#allocation23_spill]] %s12452_s4 }
   0x6   :  { %12490 = sst [smem:[#allocation24_spill]] %s12453_s5 }
   0x7   :  { %12491 = sst [smem:[#allocation25_spill]] %s12454_s6 }
   0x8   :  { %12492 = sst [smem:[#allocation26_spill]] %s12455_s7 }
   0x9   :  { %12493 = sst [smem:[#allocation27_spill]] %s12470_s22 }
   0xa   :  { %12494 = sst [smem:[#allocation28_spill]] %s12471_s23 }
   0xb   :  { %28 = vsyncpa [#allocation6], 0 }
   0xc   :  { %29 = vsyncpa [#allocation9], 0 }
   0xd   :  { %30 = vsyncpa [#allocation12], 0 }
   0xe   :  { %31 = vsyncpa [#allocation7], 0  ;;  %s10028_s4 = smov [#allocation8]   ;;  %s10029_s24 = smov [#allocation5]  }
   0xf   :  { %s55_s30 = sshll.u32 %s10028_s4, 4  ;;  %s39_s25 = sshll.u32 %s10029_s24, 4  ;;  %s56_s30 = int_to_ptr.vmem [resolvable:$true] %s55_s30  ;;  %s10160_s25 = int_to_ptr.vmem [resolvable:$true] %s39_s25 }
  0x10   :  { %s12495_s26 = sld [smem:[#allocation23_spill]] }
  0x16   :  { %s9910_s2 = scalar_lea.hbm %s12495_s26, 2304 }
  0x17   :  { %p9911_p0 = scmp.ne.s32.totalorder %s12495_s26, %s9910_s2  ;;  %p9914_p1 = scmp.lt.u32.totalorder %s9910_s2, %s12495_s26 }
  0x19   :  { %p9916_p2 = pnand %p9914_p1, %p9911_p0 }
  0x1b   :  { %9919 = shalt.err (!%p9916_p2)
}
  0x1c   :  { %s9920_s29 = scalar_lea.vmem %s56_s30, 2304  ;;  %p9925_p4 = scmp.lt.s32.totalorder %s56_s30, %s56_s30 }
  0x1d   :  { %p9921_p3 = scmp.ne.s32.totalorder %s56_s30, %s9920_s29  ;;  %p9926_p5 = scmp.lt.s32.totalorder %s9920_s29, %s9920_s29 }
  0x1f   :  { %p9927_p6 = por %p9926_p5, %p9925_p4 }
  0x21   :  { %p9928_p7 = pnand %p9927_p6, %p9921_p3 }
  0x23   :  { %9931 = shalt.err (!%p9928_p7)
}
  0x24   :  { %s10030_s3 = smov 128   ;;  %s10031_s0 = smov 8  }
  0x25   :  { %61 = dma.hbm_to_vmem [thread:$0]  %s12495_s26, 2304, %s56_s30, [#allocation9], %s10030_s3, %s10030_s3, %s10031_s0  }
  0x26   :  { %s12496_s6 = sld [smem:[#allocation20_spill]] }
  0x2c   :  { %s9932_s27 = scalar_lea.hbm %s12496_s6, 2560 }
  0x2d   :  { %p9933_p8 = scmp.ne.s32.totalorder %s12496_s6, %s9932_s27  ;;  %p9936_p9 = scmp.lt.u32.totalorder %s9932_s27, %s12496_s6 }
  0x2f   :  { %p9938_p10 = pnand %p9936_p9, %p9933_p8 }
  0x31   :  { %9941 = shalt.err (!%p9938_p10)
}
  0x32   :  { %s9942_s29 = scalar_lea.vmem %s10160_s25, 2560  ;;  %p9947_p12 = scmp.lt.s32.totalorder %s10160_s25, %s10160_s25 }
  0x33   :  { %p9943_p11 = scmp.ne.s32.totalorder %s10160_s25, %s9942_s29  ;;  %p9948_p13 = scmp.lt.s32.totalorder %s9942_s29, %s9942_s29 }
  0x35   :  { %p9949_p0 = por %p9948_p13, %p9947_p12 }
  0x37   :  { %p9950_p1 = pnand %p9949_p0, %p9943_p11 }
  0x39   :  { %9953 = shalt.err (!%p9950_p1)
}
  0x3a   :  { %45 = dma.hbm_to_vmem [thread:$0]  %s12496_s6, 2560, %s10160_s25, [#allocation6], %s10030_s3, %s10030_s3, %s10031_s0  }
  0x3b   :  { %s10032_s23 = smov [#allocation10]   ;;  %s12497_s1 = sld [smem:[#allocation25_spill]] }
  0x3c   :  { %s69_s4 = sshll.u32 %s10032_s23, 4  ;;  %s70_s4 = int_to_ptr.vmem [resolvable:$true] %s69_s4 }
  0x41   :  { %s9954_s27 = scalar_lea.hbm %s12497_s1, 4608 }
  0x42   :  { %p9955_p2 = scmp.ne.s32.totalorder %s12497_s1, %s9954_s27  ;;  %p9958_p3 = scmp.lt.u32.totalorder %s9954_s27, %s12497_s1 }
  0x44   :  { %p9960_p4 = pnand %p9958_p3, %p9955_p2 }
  0x46   :  { %9963 = shalt.err (!%p9960_p4)
}
  0x47   :  { %s9964_s22 = scalar_lea.vmem %s70_s4, 4608  ;;  %p9969_p6 = scmp.lt.s32.totalorder %s70_s4, %s70_s4 }
  0x48   :  { %p9965_p5 = scmp.ne.s32.totalorder %s70_s4, %s9964_s22  ;;  %p9970_p7 = scmp.lt.s32.totalorder %s9964_s22, %s9964_s22 }
  0x4a   :  { %p9971_p8 = por %p9970_p7, %p9969_p6 }
  0x4c   :  { %p9972_p9 = pnand %p9971_p8, %p9965_p5 }
  0x4e   :  { %9975 = shalt.err (!%p9972_p9)
}
  0x4f   :  { %s10033_s25 = smov 256   ;;  %s10034_s3 = smov 16  }
  0x50   :  { %75 = dma.hbm_to_vmem [thread:$0]  %s12497_s1, 4608, %s70_s4, [#allocation9], %s10033_s25, %s10033_s25, %s10034_s3  }
  0x51   :  { %s10035_s30 = smov [#allocation11]   ;;  %s9976_s5 = scalar_lea.hbm %s12460_s12, 2816 }
  0x52   :  { %s91_s26 = sshll.u32 %s10035_s30, 4  ;;  %p9977_p10 = scmp.ne.s32.totalorder %s12460_s12, %s9976_s5  ;;  %s92_s26 = int_to_ptr.vmem [resolvable:$true] %s91_s26 }
  0x53   :  { %p9980_p11 = scmp.lt.u32.totalorder %s9976_s5, %s12460_s12 }
  0x55   :  { %p9982_p12 = pnand %p9980_p11, %p9977_p10 }
  0x57   :  { %9985 = shalt.err (!%p9982_p12)
}
  0x58   :  { %s9986_s28 = scalar_lea.vmem %s92_s26, 2816  ;;  %p9991_p0 = scmp.lt.s32.totalorder %s92_s26, %s92_s26 }
  0x59   :  { %p9987_p13 = scmp.ne.s32.totalorder %s92_s26, %s9986_s28  ;;  %p9992_p1 = scmp.lt.s32.totalorder %s9986_s28, %s9986_s28 }
  0x5b   :  { %p9993_p2 = por %p9992_p1, %p9991_p0 }
  0x5d   :  { %p9994_p3 = pnand %p9993_p2, %p9987_p13 }
  0x5f   :  { %9997 = shalt.err (!%p9994_p3)
}
  0x60   :  { %97 = dma.hbm_to_vmem [thread:$0]  %s12460_s12, 2816, %s92_s26, [#allocation12], %s10033_s25, %s10033_s25, %s10034_s3  }
  0x61   :  { %10020 = dma.done.wait [#allocation6], 2560  }
  0x62   :  { %10021 = vsyncadd [#allocation6], 4294964736 }
  0x63   :  { %10022 = dma.done.wait [#allocation9], 6912  }
  0x64   :  { %10023 = vsyncadd [#allocation9], 4294960384 }
  0x65   :  { %10024 = dma.done.wait [#allocation12], 2816  }
  0x66   :  { %10025 = vsyncadd [#allocation12], 4294964480  ;;  %vm131_vm0 = vcmask 261120   ;;  %v12481_v0 = vmov 0   ;;  %v12479_v1 = vmov 0.0   ;;  %s12498_s25 = sld [smem:[#allocation19_spill]] }
  0x67   :  { %474 = vmatprep.mubr.bf16.mxu0 %v12481_v0  ;;  %132 = vst.msk [vmem:[#allocation2] sm:$0xff] %vm131_vm0, %v12479_v1  ;;  %133 = vst.msk [vmem:[#allocation2 + $0x8] sm:$0xff] %vm131_vm0, %v12479_v1  ;;  %v9412_v2 = vld [vmem:[#allocation5 + $0x24] ss:$8 sps:$4 sm:$0xff]   ;;  %v9414_v3 = vld [vmem:[#allocation5 + $0x20] ss:$8 sps:$4 sm:$0xff]  }
  0x68   :  { %134 = vst.msk [vmem:[#allocation2 + $0x10] sm:$0xff] %vm131_vm0, %v12479_v1  ;;  %135 = vst.msk [vmem:[#allocation2 + $0x18] sm:$0xff] %vm131_vm0, %v12479_v1  ;;  %442 = vmatprep.subr.bf16.mxu0 %v9412_v2  ;;  %v9415_v4 = vld [vmem:[#allocation5 + $0x34] ss:$8 sps:$4 sm:$0xff]   ;;  %vm172_vm1 = vcmask 228352   ;;  %vm176_vm2 = vcmask 224256  }
  0x69   :  { %136 = vst.msk [vmem:[#allocation2 + $0x20] sm:$0xff] %vm131_vm0, %v12479_v1  ;;  %137 = vst.msk [vmem:[#allocation2 + $0x28] sm:$0xff] %vm131_vm0, %v12479_v1  ;;  %443 = vmatpush1.bf16.msra.mxu0 %v9414_v3  ;;  %v9417_v6 = vld [vmem:[#allocation5 + $0x30] ss:$8 sps:$4 sm:$0xff]   ;;  %v9420_v9 = vld [vmem:[#allocation5 + $0x4] ss:$8 sps:$4 sm:$0xff]  }
  0x6a   :  { %138 = vst.msk [vmem:[#allocation2 + $0x30] sm:$0xff] %vm131_vm0, %v12479_v1  ;;  %139 = vst.msk [vmem:[#allocation2 + $0x38] sm:$0xff] %vm131_vm0, %v12479_v1  ;;  %444 = vmatprep.subr.bf16.mxu0 %v9415_v4  ;;  %v9418_v55 = vld [vmem:[#allocation5] ss:$8 sps:$4 sm:$0xff]   ;;  %v9423_v61 = vld [vmem:[#allocation5 + $0x14] ss:$8 sps:$4 sm:$0xff]  }
  0x6b   :  { %140 = vst.msk [vmem:[#allocation2 + $0x40] sm:$0xff] %vm131_vm0, %v12479_v1  ;;  %141 = vst.msk [vmem:[#allocation2 + $0x48] sm:$0xff] %vm131_vm0, %v12479_v1  ;;  %v9421_v4 = vld [vmem:[#allocation5 + $0x10] ss:$8 sps:$4 sm:$0xff]   ;;  %s12499_s23 = sld [smem:[#allocation22_spill]]  ;;  %s12500_s22 = sld [smem:[#allocation21_spill]] }
  0x6c   :  { %142 = vst.msk [vmem:[#allocation2 + $0x50] sm:$0xff] %vm131_vm0, %v12479_v1  ;;  %143 = vst.msk [vmem:[#allocation2 + $0x58] sm:$0xff] %vm131_vm0, %v12479_v1  ;;  %v8734_v5 = vld [vmem:[%s12498_s25] sm:$0xff]   ;;  %v166_v10 = vld [vmem:[%s12498_s25 + $0x8] ss:$16 sps:$4 sm:$0xff]   ;;  %vm2370_vm3 = vcmask 785408  }
  0x6d   :  { %144 = vst.msk [vmem:[#allocation2 + $0x60] sm:$0xff] %vm131_vm0, %v12479_v1  ;;  %145 = vst.msk [vmem:[#allocation2 + $0x68] sm:$0xff] %vm131_vm0, %v12479_v1  ;;  %v8735_v7 = vunpack.c.l.bf16 %v8734_v5  ;;  %v8736_v8 = vunpack.c.h.bf16 %v8734_v5  ;;  %v167_v11 = vld [vmem:[%s12498_s25 + $0xc] sm:$0x3]  ;;  %v170_v12 = vunpack.c.l.bf16 %v166_v10  ;;  %v8765_v14 = vld [vmem:[%s12498_s25 + $0x10] sm:$0xff]   ;;  %v185_v16 = vunpack.c.h.bf16 %v166_v10  ;;  %445 = vmatpush1.bf16.msra.mxu0 %v9417_v6  ;;  %s12502_s4 = sld [smem:[#allocation26_spill]] }
  0x6e   :  { %146 = vst.msk [vmem:[#allocation2 + $0x70] sm:$0xff] %vm131_vm0, %v12479_v1  ;;  %147 = vst.msk [vmem:[#allocation2 + $0x78] sm:$0xff] %vm131_vm0, %v12479_v1  ;;  %v171_v13 = vunpack.c.l.bf16 %v167_v11  ;;  %v7967_v15 = vld [vmem:[%s12498_s25 + $0x1c] sm:$0x3]  ;;  %v8766_v17 = vld [vmem:[%s12498_s25 + $0x20] sm:$0xff]   ;;  %v8739_v18 = vunpack.c.l.bf16 %v8765_v14  ;;  %v8740_v19 = vunpack.c.h.bf16 %v8765_v14  ;;  %703 = vmatprep.subr.bf16.mxu0 %v9420_v9  ;;  %vm2743_vm4 = vcmask 1014784  }
  0x6f   :  { %148 = vst.msk [vmem:[#allocation2 + $0x80] sm:$0xff] %vm131_vm0, %v12479_v1  ;;  %149 = vst.msk [vmem:[#allocation2 + $0x88] sm:$0xff] %vm131_vm0, %v12479_v1  ;;  %v186_v20 = vunpack.c.l.bf16 %v7967_v15  ;;  %v8743_v21 = vunpack.c.l.bf16 %v8766_v17  ;;  %v7970_v22 = vld [vmem:[%s12498_s25 + $0x28] ss:$16 sps:$4 sm:$0xff]   ;;  %v7971_v23 = vld [vmem:[%s12498_s25 + $0x2c] sm:$0x3]  ;;  %v8744_v25 = vunpack.c.h.bf16 %v8766_v17 }
  0x70   :  { %150 = vst.msk [vmem:[#allocation2 + $0x90] sm:$0xff] %vm131_vm0, %v12479_v1  ;;  %151 = vst.msk [vmem:[#allocation2 + $0x98] sm:$0xff] %vm131_vm0, %v12479_v1  ;;  %v8767_v24 = vld [vmem:[%s12498_s25 + $0x30] sm:$0xff]   ;;  %v198_v26 = vunpack.c.l.bf16 %v7970_v22  ;;  %v199_v27 = vunpack.c.l.bf16 %v7971_v23  ;;  %v7975_v29 = vld [vmem:[%s12498_s25 + $0x3c] sm:$0x3]  ;;  %v211_v32 = vunpack.c.h.bf16 %v7970_v22  ;;  %vm2771_vm5 = vcmask 1045504  }
  0x71   :  { %152 = vst.msk [vmem:[#allocation2 + $0xa0] sm:$0xff] %vm131_vm0, %v12479_v1  ;;  %153 = vst.msk [vmem:[#allocation2 + $0xa8] sm:$0xff] %vm131_vm0, %v12479_v1  ;;  %v8747_v28 = vunpack.c.l.bf16 %v8767_v24  ;;  %v8768_v30 = vld [vmem:[%s12498_s25 + $0x40] sm:$0xff]   ;;  %v8748_v31 = vunpack.c.h.bf16 %v8767_v24  ;;  %v212_v33 = vunpack.c.l.bf16 %v7975_v29  ;;  %v7978_v36 = vld [vmem:[%s12498_s25 + $0x48] ss:$16 sps:$4 sm:$0xff]   ;;  %s12503_s0 = sld [smem:[#allocation24_spill]] }
  0x72   :  { %154 = vst.msk [vmem:[#allocation2 + $0xb0] sm:$0xff] %vm131_vm0, %v12479_v1  ;;  %155 = vst.msk [vmem:[#allocation2 + $0xb8] sm:$0xff] %vm131_vm0, %v12479_v1  ;;  %v8751_v34 = vunpack.c.l.bf16 %v8768_v30  ;;  %v8752_v35 = vunpack.c.h.bf16 %v8768_v30  ;;  %v7979_v37 = vld [vmem:[%s12498_s25 + $0x4c] sm:$0x3]  ;;  %v8769_v38 = vld [vmem:[%s12498_s25 + $0x50] sm:$0xff]   ;;  %v224_v39 = vunpack.c.l.bf16 %v7978_v36  ;;  %v237_v46 = vunpack.c.h.bf16 %v7978_v36  ;;  %s12508_s6 = sld [smem:[#allocation27_spill]] }
  0x73   :  { %156 = vst.msk [vmem:[#allocation2 + $0xc0] sm:$0xff] %vm131_vm0, %v12479_v1  ;;  %157 = vst.msk [vmem:[#allocation2 + $0xc8] sm:$0xff] %vm131_vm0, %v12479_v1  ;;  %v225_v40 = vunpack.c.l.bf16 %v7979_v37  ;;  %v8755_v41 = vunpack.c.l.bf16 %v8769_v38  ;;  %v8756_v42 = vunpack.c.h.bf16 %v8769_v38  ;;  %v7983_v43 = vld [vmem:[%s12498_s25 + $0x5c] sm:$0x3]  ;;  %v8770_v44 = vld [vmem:[%s12498_s25 + $0x60] sm:$0xff]   ;;  %vm3022_vm6 = vcmask 130048  }
  0x74   :  { %158 = vst.msk [vmem:[#allocation2 + $0xd0] sm:$0xff] %vm131_vm0, %v12479_v1  ;;  %159 = vst.msk [vmem:[#allocation2 + $0xd8] sm:$0xff] %vm131_vm0, %v12479_v1  ;;  %v7986_v45 = vld [vmem:[%s12498_s25 + $0x68] ss:$16 sps:$4 sm:$0xff]   ;;  %v238_v47 = vunpack.c.l.bf16 %v7983_v43  ;;  %v8759_v48 = vunpack.c.l.bf16 %v8770_v44  ;;  %v8760_v49 = vunpack.c.h.bf16 %v8770_v44  ;;  %v7987_v50 = vld [vmem:[%s12498_s25 + $0x6c] sm:$0x3] }
  0x75   :  { %160 = vst.msk [vmem:[#allocation2 + $0xe0] sm:$0xff] %vm131_vm0, %v12479_v1  ;;  %161 = vst.msk [vmem:[#allocation2 + $0xe8] sm:$0xff] %vm131_vm0, %v12479_v1  ;;  %v8771_v51 = vld [vmem:[%s12498_s25 + $0x70] sm:$0xff]   ;;  %v7991_v52 = vld [vmem:[%s12498_s25 + $0x7c] sm:$0x3]  ;;  %v250_v56 = vunpack.c.l.bf16 %v7986_v45  ;;  %v251_v57 = vunpack.c.l.bf16 %v7987_v50  ;;  %v263_v62 = vunpack.c.h.bf16 %v7986_v45  ;;  %vm3827_vm9 = vcmask 1046528  }
  0x76   :  { %162 = vst.msk [vmem:[#allocation2 + $0xf0] sm:$0xff] %vm131_vm0, %v12479_v1  ;;  %163 = vst.msk [vmem:[#allocation2 + $0xf8] sm:$0xff] %vm131_vm0, %v12479_v1  ;;  %v8763_v58 = vunpack.c.l.bf16 %v8771_v51  ;;  %v8764_v59 = vunpack.c.h.bf16 %v8771_v51  ;;  %v264_v63 = vunpack.c.l.bf16 %v7991_v52  ;;  %v9424_v51 = vld [vmem:[#allocation5 + $0x40] ss:$8 sps:$4 sm:$0xff]   ;;  %vm3157_vm7 = vsmask.f32 7424 }
  0x77   :  { %173 = vst.msk [vmem:[#allocation2 + $0x2] sm:$0xff] %vm172_vm1, %v8735_v7  ;;  %174 = vst.msk [vmem:[#allocation2 + $0xa] sm:$0xff] %vm172_vm1, %v8736_v8  ;;  %v9426_v8 = vld [vmem:[#allocation5 + $0x44] ss:$8 sps:$4 sm:$0xff]   ;;  %vm4174_vm8 = vsmask.f32 6400 }
  0x78   :  { %175 = vst.msk [vmem:[#allocation2 + $0x12] sm:$0xff] %vm172_vm1, %v170_v12  ;;  %189 = vst.msk [vmem:[#allocation2 + $0x32] sm:$0xff] %vm172_vm1, %v185_v16  ;;  %vm5401_vm10 = vcmask 97280   ;;  %vm5596_vm11 = vcmask 392192   ;;  %vm7494_vm12 = vcmask 687104   ;;  %vm7501_vm13 = vcmask 1041408  }
  0x79   :  { %177 = vst.msk [vmem:[#allocation2 + $0x1a] sm:$0xf] %vm176_vm2, %v171_v13  ;;  %190 = vst.msk [vmem:[#allocation2 + $0x3a] sm:$0xf] %vm176_vm2, %v186_v20  ;;  %vm10038_vm14 = vmmov 0   ;;  %vm7902_vm15 = vcmask 523264  }
  0x7a   :  { %187 = vst.msk [vmem:[#allocation2 + $0x22] sm:$0xff] %vm172_vm1, %v8739_v18  ;;  %188 = vst.msk [vmem:[#allocation2 + $0x2a] sm:$0xff] %vm172_vm1, %v8740_v19 }
  0x7b   :  { %200 = vst.msk [vmem:[#allocation2 + $0x42] sm:$0xff] %vm172_vm1, %v8743_v21  ;;  %201 = vst.msk [vmem:[#allocation2 + $0x4a] sm:$0xff] %vm172_vm1, %v8744_v25 }
  0x7c   :  { %202 = vst.msk [vmem:[#allocation2 + $0x52] sm:$0xff] %vm172_vm1, %v198_v26  ;;  %213 = vst.msk [vmem:[#allocation2 + $0x62] sm:$0xff] %vm172_vm1, %v8747_v28 }
  0x7d   :  { %203 = vst.msk [vmem:[#allocation2 + $0x5a] sm:$0xf] %vm176_vm2, %v199_v27  ;;  %216 = vst.msk [vmem:[#allocation2 + $0x7a] sm:$0xf] %vm176_vm2, %v212_v33 }
  0x7e   :  { %214 = vst.msk [vmem:[#allocation2 + $0x6a] sm:$0xff] %vm172_vm1, %v8748_v31  ;;  %215 = vst.msk [vmem:[#allocation2 + $0x72] sm:$0xff] %vm172_vm1, %v211_v32  ;;  %v321_v53 = vld [vmem:[#allocation2 + $0x1] sm:$0xff]  ;;  %v322_v54 = vld [vmem:[#allocation2 + $0x9] sm:$0xff] }
  0x7f   :  { %226 = vst.msk [vmem:[#allocation2 + $0x82] sm:$0xff] %vm172_vm1, %v8751_v34  ;;  %227 = vst.msk [vmem:[#allocation2 + $0x8a] sm:$0xff] %vm172_vm1, %v8752_v35  ;;  %v353_v60 = vpack.c.bf16 %v322_v54, %v321_v53  ;;  %v323_v2 = vld [vmem:[#allocation2 + $0x11] sm:$0xff]  ;;  %v270_v50 = vld [vmem:[#allocation2 + $0x8] sm:$0xff] }
  0x80   :  { %228 = vst.msk [vmem:[#allocation2 + $0x92] sm:$0xff] %vm172_vm1, %v224_v39  ;;  %239 = vst.msk [vmem:[#allocation2 + $0xa2] sm:$0xff] %vm172_vm1, %v8755_v41  ;;  %v324_v3 = vld [vmem:[#allocation2 + $0x19] sm:$0xff]  ;;  %v9429_v53 = vld [vmem:[#allocation5 + $0x54] ss:$8 sps:$4 sm:$0xff]  }
  0x81   :  { %229 = vst.msk [vmem:[#allocation2 + $0x9a] sm:$0xf] %vm176_vm2, %v225_v40  ;;  %242 = vst.msk [vmem:[#allocation2 + $0xba] sm:$0xf] %vm176_vm2, %v238_v47  ;;  %7996 = vmatmul.mubr.msk.bf16.vlgmr.msra.gmra.mrb[0].mxu0 %vm131_vm0, %v353_v60  ;;  %v354_v5 = vpack.c.bf16 %v324_v3, %v323_v2  ;;  %v325_v6 = vld [vmem:[#allocation2 + $0x21] sm:$0xff]  ;;  %v326_v7 = vld [vmem:[#allocation2 + $0x29] sm:$0xff] }
  0x82   :  { %240 = vst.msk [vmem:[#allocation2 + $0xaa] sm:$0xff] %vm172_vm1, %v8756_v42  ;;  %241 = vst.msk [vmem:[#allocation2 + $0xb2] sm:$0xff] %vm172_vm1, %v237_v46  ;;  %484 = vmatprep.mubr.bf16.mxu0 %v12481_v0  ;;  %704 = vmatpush1.bf16.msra.mxu0 %v9418_v55  ;;  %v355_v9 = vpack.c.bf16 %v326_v7, %v325_v6  ;;  %v327_v10 = vld [vmem:[#allocation2 + $0x31] sm:$0xff]  ;;  %v328_v11 = vld [vmem:[#allocation2 + $0x39] sm:$0xff] }
  0x83   :  { %252 = vst.msk [vmem:[#allocation2 + $0xc2] sm:$0xff] %vm172_vm1, %v8759_v48  ;;  %253 = vst.msk [vmem:[#allocation2 + $0xca] sm:$0xff] %vm172_vm1, %v8760_v49  ;;  %705 = vmatprep.subr.bf16.mxu0 %v9423_v61  ;;  %v356_v12 = vpack.c.bf16 %v328_v11, %v327_v10  ;;  %v329_v13 = vld [vmem:[#allocation2 + $0x41] sm:$0xff]  ;;  %v330_v14 = vld [vmem:[#allocation2 + $0x49] sm:$0xff] }
  0x84   :  { %254 = vst.msk [vmem:[#allocation2 + $0xd2] sm:$0xff] %vm172_vm1, %v250_v56  ;;  %265 = vst.msk [vmem:[#allocation2 + $0xe2] sm:$0xff] %vm172_vm1, %v8763_v58  ;;  %v357_v15 = vpack.c.bf16 %v330_v14, %v329_v13  ;;  %v331_v16 = vld [vmem:[#allocation2 + $0x51] sm:$0xff]  ;;  %v332_v17 = vld [vmem:[#allocation2 + $0x59] sm:$0xff] }
  0x85   :  { %255 = vst.msk [vmem:[#allocation2 + $0xda] sm:$0xf] %vm176_vm2, %v251_v57  ;;  %268 = vst.msk [vmem:[#allocation2 + $0xfa] sm:$0xf] %vm176_vm2, %v264_v63  ;;  %v358_v18 = vpack.c.bf16 %v332_v17, %v331_v16  ;;  %v333_v19 = vld [vmem:[#allocation2 + $0x61] sm:$0xff]  ;;  %v334_v20 = vld [vmem:[#allocation2 + $0x69] sm:$0xff] }
  0x86   :  { %266 = vst.msk [vmem:[#allocation2 + $0xea] sm:$0xff] %vm172_vm1, %v8764_v59  ;;  %267 = vst.msk [vmem:[#allocation2 + $0xf2] sm:$0xff] %vm172_vm1, %v263_v62  ;;  %706 = vmatpush1.bf16.msra.mxu0 %v9421_v4  ;;  %v359_v21 = vpack.c.bf16 %v334_v20, %v333_v19  ;;  %v335_v22 = vld [vmem:[#allocation2 + $0x71] sm:$0xff]  ;;  %v336_v23 = vld [vmem:[#allocation2 + $0x79] sm:$0xff] }
  0x87   :  { %1017 = vmatprep.subr.bf16.mxu0 %v9426_v8  ;;  %v360_v24 = vpack.c.bf16 %v336_v23, %v335_v22  ;;  %v337_v25 = vld [vmem:[#allocation2 + $0x81] sm:$0xff]  ;;  %v338_v26 = vld [vmem:[#allocation2 + $0x89] sm:$0xff]  ;;  %v339_v28 = vld [vmem:[#allocation2 + $0x91] sm:$0xff] }
  0x88   :  { %v361_v27 = vpack.c.bf16 %v338_v26, %v337_v25  ;;  %v340_v29 = vld [vmem:[#allocation2 + $0x99] sm:$0xff]  ;;  %v341_v31 = vld [vmem:[#allocation2 + $0xa1] sm:$0xff]  ;;  %v271_v54 = vld [vmem:[#allocation2 + $0x10] sm:$0xff] }
  0x89   :  { %7997 = vmatmul.mubr.msk.bf16.gmra.mrb[4].mxu0 %vm131_vm0, %v354_v5  ;;  %v362_v30 = vpack.c.bf16 %v340_v29, %v339_v28  ;;  %v342_v32 = vld [vmem:[#allocation2 + $0xa9] sm:$0xff]  ;;  %v343_v34 = vld [vmem:[#allocation2 + $0xb1] sm:$0xff]  ;;  %v344_v35 = vld [vmem:[#allocation2 + $0xb9] sm:$0xff] }
  0x8a   :  { %494 = vmatprep.mubr.bf16.mxu0 %v12481_v0  ;;  %v363_v33 = vpack.c.bf16 %v342_v32, %v341_v31  ;;  %v364_v36 = vpack.c.bf16 %v344_v35, %v343_v34  ;;  %v345_v37 = vld [vmem:[#allocation2 + $0xc1] sm:$0xff]  ;;  %v346_v38 = vld [vmem:[#allocation2 + $0xc9] sm:$0xff]  ;;  %v272_v55 = vld [vmem:[#allocation2 + $0x18] sm:$0xff] }
  0x8b   :  { %v365_v39 = vpack.c.bf16 %v346_v38, %v345_v37  ;;  %v347_v40 = vld [vmem:[#allocation2 + $0xd1] sm:$0xff]  ;;  %v349_v43 = vld [vmem:[#allocation2 + $0xe1] sm:$0xff]  ;;  %v302_v58 = vpack.c.bf16 %v272_v55, %v271_v54 }
  0x8c   :  { %v348_v41 = vld [vmem:[#allocation2 + $0xd9] sm:$0xff]  ;;  %v274_v60 = vld [vmem:[#allocation2 + $0x28] sm:$0xff]  ;;  %v275_v62 = vld [vmem:[#allocation2 + $0x30] sm:$0xff] }
  0x8d   :  { %v366_v42 = vpack.c.bf16 %v348_v41, %v347_v40  ;;  %v350_v44 = vld [vmem:[#allocation2 + $0xe9] sm:$0xff]  ;;  %v351_v46 = vld [vmem:[#allocation2 + $0xf1] sm:$0xff]  ;;  %v352_v47 = vld [vmem:[#allocation2 + $0xf9] sm:$0xf] }
  0x8e   :  { %v367_v45 = vpack.c.bf16 %v350_v44, %v349_v43  ;;  %v368_v48 = vpack.c.bf16 %v352_v47, %v351_v46  ;;  %v269_v49 = vld [vmem:[#allocation2] sm:$0xff]  ;;  %v9432_v57 = vld [vmem:[#allocation5 + $0x64] ss:$8 sps:$4 sm:$0xff]   ;;  %v278_v4 = vld [vmem:[#allocation2 + $0x48] sm:$0xff] }
  0x8f   :  { %v301_v52 = vpack.c.bf16 %v270_v50, %v269_v49  ;;  %v9427_v56 = vld [vmem:[#allocation5 + $0x50] ss:$8 sps:$4 sm:$0xff]   ;;  %v276_v63 = vld [vmem:[#allocation2 + $0x38] sm:$0xff]  ;;  %v279_v6 = vld [vmem:[#allocation2 + $0x50] sm:$0xff] }
  0x90   :  { %v273_v59 = vld [vmem:[#allocation2 + $0x20] sm:$0xff]  ;;  %v304_v2 = vpack.c.bf16 %v276_v63, %v275_v62  ;;  %v280_v7 = vld [vmem:[#allocation2 + $0x58] sm:$0xff]  ;;  %v282_v10 = vld [vmem:[#allocation2 + $0x68] sm:$0xff] }
  0x91   :  { %7998 = vmatmul.mubr.msk.bf16.gmra.mrb[8].mxu0 %vm131_vm0, %v355_v9  ;;  %v303_v61 = vpack.c.bf16 %v274_v60, %v273_v59  ;;  %v277_v3 = vld [vmem:[#allocation2 + $0x40] sm:$0xff]  ;;  %v306_v8 = vpack.c.bf16 %v280_v7, %v279_v6  ;;  %v284_v13 = vld [vmem:[#allocation2 + $0x78] sm:$0xff]  ;;  %v286_v16 = vld [vmem:[#allocation2 + $0x88] sm:$0xff] }
  0x92   :  { %504 = vmatprep.mubr.bf16.mxu0 %v12481_v0  ;;  %v305_v5 = vpack.c.bf16 %v278_v4, %v277_v3  ;;  %v281_v9 = vld [vmem:[#allocation2 + $0x60] sm:$0xff]  ;;  %v288_v19 = vld [vmem:[#allocation2 + $0x98] sm:$0xff]  ;;  %v290_v22 = vld [vmem:[#allocation2 + $0xa8] sm:$0xff] }
  0x93   :  { %v307_v11 = vpack.c.bf16 %v282_v10, %v281_v9  ;;  %v292_v25 = vld [vmem:[#allocation2 + $0xb8] sm:$0xff]  ;;  %v294_v28 = vld [vmem:[#allocation2 + $0xc8] sm:$0xff] }
  0x94   :  { %v296_v31 = vld [vmem:[#allocation2 + $0xd8] sm:$0xff]  ;;  %v298_v34 = vld [vmem:[#allocation2 + $0xe8] sm:$0xff] }
  0x95   :  { %v300_v37 = vld [vmem:[#allocation2 + $0xf8] sm:$0xf]  ;;  %v897_v40 = vld [vmem:[#allocation2 + $0xa] sm:$0xff]  ;;  %v9438_v47 = vld [vmem:[#allocation5 + $0x84] ss:$8 sps:$4 sm:$0xff]  }
  0x96   :  { %v9435_v43 = vld [vmem:[#allocation5 + $0x74] ss:$8 sps:$4 sm:$0xff]   ;;  %v898_v44 = vld [vmem:[#allocation2 + $0x12] sm:$0xff]  ;;  %v9433_v46 = vld [vmem:[#allocation5 + $0x70] ss:$8 sps:$4 sm:$0xff]  }
  0x97   :  { %v900_v49 = vld [vmem:[#allocation2 + $0x22] sm:$0xff]  ;;  %v901_v50 = vld [vmem:[#allocation2 + $0x2a] sm:$0xff]  ;;  %v907_v59 = vld [vmem:[#allocation2 + $0x5a] sm:$0xff] }
  0x98   :  { %v904_v55 = vld [vmem:[#allocation2 + $0x42] sm:$0xff]  ;;  %v909_v62 = vld [vmem:[#allocation2 + $0x6a] sm:$0xff]  ;;  %v911_v3 = vld [vmem:[#allocation2 + $0x7a] sm:$0xff] }
  0x99   :  { %7999 = vmatmul.mubr.msk.bf16.gmra.mrb[12].mxu0 %vm131_vm0, %v356_v12  ;;  %v283_v12 = vld [vmem:[#allocation2 + $0x70] sm:$0xff]  ;;  %v915_v9 = vld [vmem:[#allocation2 + $0x9a] sm:$0xff] }
  0x9a   :  { %514 = vmatprep.mubr.bf16.mxu0 %v12481_v0  ;;  %v308_v14 = vpack.c.bf16 %v284_v13, %v283_v12  ;;  %v913_v6 = vld [vmem:[#allocation2 + $0x8a] sm:$0xff] }
  0x9b   :  { %v917_v12 = vld [vmem:[#allocation2 + $0xaa] sm:$0xff] }
  0xa1   :  { %8000 = vmatmul.mubr.msk.bf16.gmra.mrb[16].mxu0 %vm131_vm0, %v357_v15  ;;  %v285_v15 = vld [vmem:[#allocation2 + $0x80] sm:$0xff] }
  0xa2   :  { %524 = vmatprep.mubr.bf16.mxu0 %v12481_v0  ;;  %v309_v17 = vpack.c.bf16 %v286_v16, %v285_v15  ;;  %v919_v15 = vld [vmem:[#allocation2 + $0xba] sm:$0xff] }
  0xa9   :  { %8001 = vmatmul.mubr.msk.bf16.gmra.mrb[20].mxu0 %vm131_vm0, %v358_v18  ;;  %v287_v18 = vld [vmem:[#allocation2 + $0x90] sm:$0xff] }
  0xaa   :  { %534 = vmatprep.mubr.bf16.mxu0 %v12481_v0  ;;  %v310_v20 = vpack.c.bf16 %v288_v19, %v287_v18  ;;  %v921_v18 = vld [vmem:[#allocation2 + $0xca] sm:$0xff] }
  0xb1   :  { %8002 = vmatmul.mubr.msk.bf16.gmra.mrb[24].mxu0 %vm131_vm0, %v359_v21  ;;  %v289_v21 = vld [vmem:[#allocation2 + $0xa0] sm:$0xff] }
  0xb2   :  { %544 = vmatprep.mubr.bf16.mxu0 %v12481_v0  ;;  %v311_v23 = vpack.c.bf16 %v290_v22, %v289_v21  ;;  %v923_v21 = vld [vmem:[#allocation2 + $0xda] sm:$0xff] }
  0xb9   :  { %8003 = vmatmul.mubr.msk.bf16.gmra.mrb[28].mxu0 %vm131_vm0, %v360_v24  ;;  %v291_v24 = vld [vmem:[#allocation2 + $0xb0] sm:$0xff] }
  0xba   :  { %554 = vmatprep.mubr.bf16.mxu0 %v12481_v0  ;;  %v312_v26 = vpack.c.bf16 %v292_v25, %v291_v24  ;;  %v925_v24 = vld [vmem:[#allocation2 + $0xea] sm:$0xff] }
  0xc1   :  { %8004 = vmatmul.mubr.msk.bf16.gmra.mrb[32].mxu0 %vm131_vm0, %v361_v27  ;;  %v293_v27 = vld [vmem:[#allocation2 + $0xc0] sm:$0xff] }
  0xc2   :  { %564 = vmatprep.mubr.bf16.mxu0 %v12481_v0  ;;  %v313_v29 = vpack.c.bf16 %v294_v28, %v293_v27  ;;  %v927_v27 = vld [vmem:[#allocation2 + $0xfa] sm:$0xf] }
  0xc9   :  { %8005 = vmatmul.mubr.msk.bf16.gmra.mrb[36].mxu0 %vm131_vm0, %v362_v30  ;;  %v295_v30 = vld [vmem:[#allocation2 + $0xd0] sm:$0xff] }
  0xca   :  { %574 = vmatprep.mubr.bf16.mxu0 %v12481_v0  ;;  %v314_v32 = vpack.c.bf16 %v296_v31, %v295_v30  ;;  %v1275_v30 = vld [vmem:[#allocation2 + $0xb] sm:$0xff] }
  0xd1   :  { %8006 = vmatmul.mubr.msk.bf16.gmra.mrb[40].mxu0 %vm131_vm0, %v363_v33  ;;  %v297_v33 = vld [vmem:[#allocation2 + $0xe0] sm:$0xff] }
  0xd2   :  { %584 = vmatprep.mubr.bf16.mxu0 %v12481_v0  ;;  %v315_v35 = vpack.c.bf16 %v298_v34, %v297_v33  ;;  %v9441_v33 = vld [vmem:[#allocation5 + $0x94] ss:$8 sps:$4 sm:$0xff]   ;;  %v1276_v34 = vld [vmem:[#allocation2 + $0x13] sm:$0xff] }
  0xd9   :  { %8007 = vmatmul.mubr.msk.bf16.gmra.mrb[44].mxu0 %vm131_vm0, %v364_v36  ;;  %v299_v36 = vld [vmem:[#allocation2 + $0xf0] sm:$0xff] }
  0xda   :  { %594 = vmatprep.mubr.bf16.mxu0 %v12481_v0  ;;  %v316_v38 = vpack.c.bf16 %v300_v37, %v299_v36  ;;  %v9439_v36 = vld [vmem:[#allocation5 + $0x90] ss:$8 sps:$4 sm:$0xff]  }
  0xe1   :  { %8008 = vmatmul.mubr.msk.bf16.gmra.mrb[48].mxu0 %vm131_vm0, %v365_v39  ;;  %v896_v39 = vld [vmem:[#allocation2 + $0x2] sm:$0xff] }
  0xe2   :  { %604 = vmatprep.mubr.bf16.mxu0 %v12481_v0  ;;  %v928_v41 = vpack.c.bf16 %v897_v40, %v896_v39  ;;  %v1279_v39 = vld [vmem:[#allocation2 + $0x2b] sm:$0xff] }
  0xe9   :  { %8009 = vmatmul.mubr.msk.bf16.gmra.mrb[52].mxu0 %vm131_vm0, %v366_v42  ;;  %v9430_v42 = vld [vmem:[#allocation5 + $0x60] ss:$8 sps:$4 sm:$0xff]  }
  0xea   :  { %614 = vmatprep.mubr.bf16.mxu0 %v12481_v0 }
  0xf1   :  { %8010 = vmatmul.mubr.msk.bf16.gmra.mrb[56].mxu0 %vm131_vm0, %v367_v45  ;;  %v899_v45 = vld [vmem:[#allocation2 + $0x1a] sm:$0xff] }
  0xf2   :  { %624 = vmatprep.mubr.bf16.mxu0 %v12481_v0 }
  0xf9   :  { %8011 = vmatmul.mubr.msk.bf16.gmra.mrb[60].mxu0 %vm131_vm0, %v368_v48  ;;  %v929_v48 = vpack.c.bf16 %v899_v45, %v898_v44  ;;  %v1282_v44 = vld [vmem:[#allocation2 + $0x43] sm:$0xff]  ;;  %v1283_v45 = vld [vmem:[#allocation2 + $0x4b] sm:$0xff] }
  0xfa   :  { %735 = vmatprep.mubr.bf16.mxu0 %v12481_v0 }
 0x101   :  { %8016 = vmatmul.mubr.msk.bf16.vlgmr.msra.gmra.mrb[0].mxu0 %vm131_vm0, %v301_v52  ;;  %v902_v52 = vld [vmem:[#allocation2 + $0x32] sm:$0xff] }
 0x102   :  { %745 = vmatprep.mubr.bf16.mxu0 %v12481_v0  ;;  %1018 = vmatpush1.bf16.msra.mxu0 %v9424_v51  ;;  %v930_v51 = vpack.c.bf16 %v901_v50, %v900_v49  ;;  %v1286_v50 = vld [vmem:[#allocation2 + $0x63] sm:$0xff] }
 0x103   :  { %1019 = vmatprep.subr.bf16.mxu0 %v9429_v53  ;;  %v903_v53 = vld [vmem:[#allocation2 + $0x3a] sm:$0xff] }
 0x104   :  { %v931_v54 = vpack.c.bf16 %v903_v53, %v902_v52  ;;  %v1288_v53 = vld [vmem:[#allocation2 + $0x73] sm:$0xff] }
 0x106   :  { %1020 = vmatpush1.bf16.msra.mxu0 %v9427_v56  ;;  %v905_v56 = vld [vmem:[#allocation2 + $0x4a] sm:$0xff] }
 0x107   :  { %1395 = vmatprep.subr.bf16.mxu0 %v9432_v57  ;;  %v932_v57 = vpack.c.bf16 %v905_v56, %v904_v55  ;;  %v1290_v56 = vld [vmem:[#allocation2 + $0x83] sm:$0xff] }
 0x109   :  { %8017 = vmatmul.mubr.msk.bf16.gmra.mrb[4].mxu0 %vm131_vm0, %v302_v58  ;;  %v906_v58 = vld [vmem:[#allocation2 + $0x52] sm:$0xff] }
 0x10a   :  { %755 = vmatprep.mubr.bf16.mxu0 %v12481_v0  ;;  %v933_v60 = vpack.c.bf16 %v907_v59, %v906_v58  ;;  %v1292_v59 = vld [vmem:[#allocation2 + $0x93] sm:$0xff] }
 0x111   :  { %8018 = vmatmul.mubr.msk.bf16.gmra.mrb[8].mxu0 %vm131_vm0, %v303_v61  ;;  %v908_v61 = vld [vmem:[#allocation2 + $0x62] sm:$0xff] }
 0x112   :  { %765 = vmatprep.mubr.bf16.mxu0 %v12481_v0  ;;  %v934_v63 = vpack.c.bf16 %v909_v62, %v908_v61  ;;  %v1294_v62 = vld [vmem:[#allocation2 + $0xa3] sm:$0xff] }
 0x119   :  { %8019 = vmatmul.mubr.msk.bf16.gmra.mrb[12].mxu0 %vm131_vm0, %v304_v2  ;;  %v910_v2 = vld [vmem:[#allocation2 + $0x72] sm:$0xff] }
 0x11a   :  { %775 = vmatprep.mubr.bf16.mxu0 %v12481_v0  ;;  %v935_v4 = vpack.c.bf16 %v911_v3, %v910_v2  ;;  %v1296_v3 = vld [vmem:[#allocation2 + $0xb3] sm:$0xff] }
 0x121   :  { %8020 = vmatmul.mubr.msk.bf16.gmra.mrb[16].mxu0 %vm131_vm0, %v305_v5  ;;  %v912_v5 = vld [vmem:[#allocation2 + $0x82] sm:$0xff] }
 0x122   :  { %785 = vmatprep.mubr.bf16.mxu0 %v12481_v0  ;;  %v936_v7 = vpack.c.bf16 %v913_v6, %v912_v5  ;;  %v1298_v6 = vld [vmem:[#allocation2 + $0xc3] sm:$0xff] }
 0x129   :  { %8021 = vmatmul.mubr.msk.bf16.gmra.mrb[20].mxu0 %vm131_vm0, %v306_v8  ;;  %v914_v8 = vld [vmem:[#allocation2 + $0x92] sm:$0xff] }
 0x12a   :  { %795 = vmatprep.mubr.bf16.mxu0 %v12481_v0  ;;  %v937_v10 = vpack.c.bf16 %v915_v9, %v914_v8  ;;  %v1300_v9 = vld [vmem:[#allocation2 + $0xd3] sm:$0xff] }
 0x131   :  { %8022 = vmatmul.mubr.msk.bf16.gmra.mrb[24].mxu0 %vm131_vm0, %v307_v11  ;;  %v916_v11 = vld [vmem:[#allocation2 + $0xa2] sm:$0xff] }
 0x132   :  { %805 = vmatprep.mubr.bf16.mxu0 %v12481_v0  ;;  %v938_v13 = vpack.c.bf16 %v917_v12, %v916_v11  ;;  %v1302_v12 = vld [vmem:[#allocation2 + $0xe3] sm:$0xff] }
 0x139   :  { %8023 = vmatmul.mubr.msk.bf16.gmra.mrb[28].mxu0 %vm131_vm0, %v308_v14  ;;  %v918_v14 = vld [vmem:[#allocation2 + $0xb2] sm:$0xff] }
 0x13a   :  { %815 = vmatprep.mubr.bf16.mxu0 %v12481_v0  ;;  %v939_v16 = vpack.c.bf16 %v919_v15, %v918_v14  ;;  %v1304_v15 = vld [vmem:[#allocation2 + $0xf3] sm:$0xff] }
 0x141   :  { %8024 = vmatmul.mubr.msk.bf16.gmra.mrb[32].mxu0 %vm131_vm0, %v309_v17  ;;  %v920_v17 = vld [vmem:[#allocation2 + $0xc2] sm:$0xff] }
 0x142   :  { %825 = vmatprep.mubr.bf16.mxu0 %v12481_v0  ;;  %v940_v19 = vpack.c.bf16 %v921_v18, %v920_v17  ;;  %v9444_v18 = vld [vmem:[%s12499_s23 + $0x4] ss:$8 sps:$4 sm:$0xff]  }
 0x143   :  { %8882 = vmatprep.subr.bf16.mxu1 %v9444_v18 }
 0x149   :  { %8025 = vmatmul.mubr.msk.bf16.gmra.mrb[36].mxu0 %vm131_vm0, %v310_v20  ;;  %v922_v20 = vld [vmem:[#allocation2 + $0xd2] sm:$0xff] }
 0x14a   :  { %835 = vmatprep.mubr.bf16.mxu0 %v12481_v0  ;;  %v941_v22 = vpack.c.bf16 %v923_v21, %v922_v20  ;;  %v1653_v20 = vld [vmem:[#allocation2 + $0xc] sm:$0xff]  ;;  %v9442_v21 = vld [vmem:[%s12499_s23] ss:$8 sps:$4 sm:$0xff]  }
 0x14b   :  { %8896 = vmatpush1.bf16.msra.mxu1 %v9442_v21 }
 0x151   :  { %8026 = vmatmul.mubr.msk.bf16.gmra.mrb[40].mxu0 %vm131_vm0, %v311_v23  ;;  %v924_v23 = vld [vmem:[#allocation2 + $0xe2] sm:$0xff] }
 0x152   :  { %845 = vmatprep.mubr.bf16.mxu0 %v12481_v0  ;;  %v942_v25 = vpack.c.bf16 %v925_v24, %v924_v23  ;;  %v9445_v24 = vld [vmem:[%s12499_s23 + $0x10] ss:$8 sps:$4 sm:$0xff]  }
 0x159   :  { %8027 = vmatmul.mubr.msk.bf16.gmra.mrb[44].mxu0 %vm131_vm0, %v312_v26  ;;  %v926_v26 = vld [vmem:[#allocation2 + $0xf2] sm:$0xff] }
 0x15a   :  { %855 = vmatprep.mubr.bf16.mxu0 %v12481_v0  ;;  %v943_v28 = vpack.c.bf16 %v927_v27, %v926_v26  ;;  %v1654_v26 = vld [vmem:[#allocation2 + $0x14] sm:$0xff]  ;;  %v1655_v27 = vld [vmem:[#allocation2 + $0x1c] sm:$0xff] }
 0x161   :  { %8028 = vmatmul.mubr.msk.bf16.gmra.mrb[48].mxu0 %vm131_vm0, %v313_v29  ;;  %v1274_v29 = vld [vmem:[#allocation2 + $0x3] sm:$0xff] }
 0x162   :  { %865 = vmatprep.mubr.bf16.mxu0 %v12481_v0  ;;  %v1306_v31 = vpack.c.bf16 %v1275_v30, %v1274_v29  ;;  %v9453_v29 = vld [vmem:[%s12499_s23 + $0x34] ss:$8 sps:$4 sm:$0xff]   ;;  %v1685_v30 = vpack.c.bf16 %v1655_v27, %v1654_v26  ;;  %v1680_v26 = vld [vmem:[#allocation2 + $0xe4] sm:$0xff]  ;;  %v1681_v27 = vld [vmem:[#allocation2 + $0xec] sm:$0xff] }
 0x169   :  { %8029 = vmatmul.mubr.msk.bf16.gmra.mrb[52].mxu0 %vm131_vm0, %v314_v32  ;;  %v9436_v32 = vld [vmem:[#allocation5 + $0x80] ss:$8 sps:$4 sm:$0xff]  }
 0x16a   :  { %875 = vmatprep.mubr.bf16.mxu0 %v12481_v0 }
 0x171   :  { %8030 = vmatmul.mubr.msk.bf16.gmra.mrb[56].mxu0 %vm131_vm0, %v315_v35  ;;  %v1277_v35 = vld [vmem:[#allocation2 + $0x1b] sm:$0xff] }
 0x172   :  { %885 = vmatprep.mubr.bf16.mxu0 %v12481_v0  ;;  %v1307_v37 = vpack.c.bf16 %v1277_v35, %v1276_v34  ;;  %v1657_v34 = vld [vmem:[#allocation2 + $0x2c] sm:$0xff]  ;;  %v9454_v35 = vld [vmem:[%s12499_s23 + $0x40] ss:$8 sps:$4 sm:$0xff]  }
 0x179   :  { %8031 = vmatmul.mubr.msk.bf16.gmra.mrb[60].mxu0 %vm131_vm0, %v316_v38  ;;  %v1278_v38 = vld [vmem:[#allocation2 + $0x23] sm:$0xff] }
 0x17a   :  { %1049 = vmatprep.mubr.bf16.mxu0 %v12481_v0  ;;  %v1308_v40 = vpack.c.bf16 %v1279_v39, %v1278_v38  ;;  %v9457_v38 = vld [vmem:[%s12499_s23 + $0x50] ss:$8 sps:$4 sm:$0xff]   ;;  %v9462_v39 = vld [vmem:[%s12499_s23 + $0x64] ss:$8 sps:$4 sm:$0xff]  }
 0x181   :  { %8036 = vmatmul.mubr.msk.bf16.vlgmr.msra.gmra.mrb[0].mxu0 %vm131_vm0, %v928_v41  ;;  %v1280_v41 = vld [vmem:[#allocation2 + $0x33] sm:$0xff] }
 0x182   :  { %1059 = vmatprep.mubr.bf16.mxu0 %v12481_v0  ;;  %1396 = vmatpush1.bf16.msra.mxu0 %v9430_v42  ;;  %v1281_v42 = vld [vmem:[#allocation2 + $0x3b] sm:$0xff] }
 0x183   :  { %1397 = vmatprep.subr.bf16.mxu0 %v9435_v43  ;;  %v1309_v43 = vpack.c.bf16 %v1281_v42, %v1280_v41  ;;  %v1659_v41 = vld [vmem:[#allocation2 + $0x3c] sm:$0xff] }
 0x184   :  { %v9460_v42 = vld [vmem:[%s12499_s23 + $0x60] ss:$8 sps:$4 sm:$0xff]  }
 0x186   :  { %1398 = vmatpush1.bf16.msra.mxu0 %v9433_v46  ;;  %v1310_v46 = vpack.c.bf16 %v1283_v45, %v1282_v44  ;;  %v9463_v45 = vld [vmem:[%s12499_s23 + $0x70] ss:$8 sps:$4 sm:$0xff]  }
 0x187   :  { %1773 = vmatprep.subr.bf16.mxu0 %v9438_v47  ;;  %v1284_v47 = vld [vmem:[#allocation2 + $0x53] sm:$0xff] }
 0x189   :  { %8037 = vmatmul.mubr.msk.bf16.gmra.mrb[4].mxu0 %vm131_vm0, %v929_v48  ;;  %v1285_v48 = vld [vmem:[#allocation2 + $0x5b] sm:$0xff] }
 0x18a   :  { %1069 = vmatprep.mubr.bf16.mxu0 %v12481_v0  ;;  %v1311_v49 = vpack.c.bf16 %v1285_v48, %v1284_v47  ;;  %v1660_v47 = vld [vmem:[#allocation2 + $0x44] sm:$0xff]  ;;  %v1661_v48 = vld [vmem:[#allocation2 + $0x4c] sm:$0xff] }
 0x191   :  { %8038 = vmatmul.mubr.msk.bf16.gmra.mrb[8].mxu0 %vm131_vm0, %v930_v51  ;;  %v1287_v51 = vld [vmem:[#allocation2 + $0x6b] sm:$0xff] }
 0x192   :  { %1079 = vmatprep.mubr.bf16.mxu0 %v12481_v0  ;;  %v1312_v52 = vpack.c.bf16 %v1287_v51, %v1286_v50  ;;  %v9471_v50 = vld [vmem:[%s12499_s23 + $0x94] ss:$8 sps:$4 sm:$0xff]   ;;  %v1688_v51 = vpack.c.bf16 %v1661_v48, %v1660_v47 }
 0x199   :  { %8039 = vmatmul.mubr.msk.bf16.gmra.mrb[12].mxu0 %vm131_vm0, %v931_v54  ;;  %v1289_v54 = vld [vmem:[#allocation2 + $0x7b] sm:$0xff] }
 0x19a   :  { %1089 = vmatprep.mubr.bf16.mxu0 %v12481_v0  ;;  %v1313_v55 = vpack.c.bf16 %v1289_v54, %v1288_v53  ;;  %v9474_v53 = vld [vmem:[%s12499_s23 + $0xa4] ss:$8 sps:$4 sm:$0xff]   ;;  %v1662_v54 = vld [vmem:[#allocation2 + $0x54] sm:$0xff] }
 0x1a1   :  { %8040 = vmatmul.mubr.msk.bf16.gmra.mrb[16].mxu0 %vm131_vm0, %v932_v57  ;;  %v1291_v57 = vld [vmem:[#allocation2 + $0x8b] sm:$0xff] }
 0x1a2   :  { %1099 = vmatprep.mubr.bf16.mxu0 %v12481_v0  ;;  %v1314_v58 = vpack.c.bf16 %v1291_v57, %v1290_v56  ;;  %v9472_v56 = vld [vmem:[%s12499_s23 + $0xa0] ss:$8 sps:$4 sm:$0xff]   ;;  %v9477_v57 = vld [vmem:[%s12499_s23 + $0xb4] ss:$8 sps:$4 sm:$0xff]  }
 0x1a9   :  { %8041 = vmatmul.mubr.msk.bf16.gmra.mrb[20].mxu0 %vm131_vm0, %v933_v60  ;;  %v1293_v60 = vld [vmem:[#allocation2 + $0x9b] sm:$0xff] }
 0x1aa   :  { %1109 = vmatprep.mubr.bf16.mxu0 %v12481_v0  ;;  %v1315_v61 = vpack.c.bf16 %v1293_v60, %v1292_v59  ;;  %v9475_v59 = vld [vmem:[%s12499_s23 + $0xb0] ss:$8 sps:$4 sm:$0xff]   ;;  %v1664_v60 = vld [vmem:[#allocation2 + $0x64] sm:$0xff] }
 0x1b1   :  { %8042 = vmatmul.mubr.msk.bf16.gmra.mrb[24].mxu0 %vm131_vm0, %v934_v63  ;;  %v1295_v63 = vld [vmem:[#allocation2 + $0xab] sm:$0xff] }
 0x1b2   :  { %1119 = vmatprep.mubr.bf16.mxu0 %v12481_v0  ;;  %v1316_v2 = vpack.c.bf16 %v1295_v63, %v1294_v62  ;;  %v1666_v63 = vld [vmem:[#allocation2 + $0x74] sm:$0xff] }
 0x1b9   :  { %8043 = vmatmul.mubr.msk.bf16.gmra.mrb[28].mxu0 %vm131_vm0, %v935_v4  ;;  %v1297_v4 = vld [vmem:[#allocation2 + $0xbb] sm:$0xff] }
 0x1ba   :  { %1129 = vmatprep.mubr.bf16.mxu0 %v12481_v0  ;;  %v1317_v5 = vpack.c.bf16 %v1297_v4, %v1296_v3  ;;  %v1668_v4 = vld [vmem:[#allocation2 + $0x84] sm:$0xff] }
 0x1c1   :  { %8044 = vmatmul.mubr.msk.bf16.gmra.mrb[32].mxu0 %vm131_vm0, %v936_v7  ;;  %v1299_v7 = vld [vmem:[#allocation2 + $0xcb] sm:$0xff] }
 0x1c2   :  { %1139 = vmatprep.mubr.bf16.mxu0 %v12481_v0  ;;  %v1318_v8 = vpack.c.bf16 %v1299_v7, %v1298_v6  ;;  %v1670_v7 = vld [vmem:[#allocation2 + $0x94] sm:$0xff] }
 0x1c9   :  { %8045 = vmatmul.mubr.msk.bf16.gmra.mrb[36].mxu0 %vm131_vm0, %v937_v10  ;;  %v1301_v10 = vld [vmem:[#allocation2 + $0xdb] sm:$0xff] }
 0x1ca   :  { %1149 = vmatprep.mubr.bf16.mxu0 %v12481_v0  ;;  %v1319_v11 = vpack.c.bf16 %v1301_v10, %v1300_v9  ;;  %v1672_v10 = vld [vmem:[#allocation2 + $0xa4] sm:$0xff] }
 0x1d1   :  { %8046 = vmatmul.mubr.msk.bf16.gmra.mrb[40].mxu0 %vm131_vm0, %v938_v13  ;;  %v1303_v13 = vld [vmem:[#allocation2 + $0xeb] sm:$0xff] }
 0x1d2   :  { %1159 = vmatprep.mubr.bf16.mxu0 %v12481_v0  ;;  %v1320_v14 = vpack.c.bf16 %v1303_v13, %v1302_v12  ;;  %v1674_v13 = vld [vmem:[#allocation2 + $0xb4] sm:$0xff] }
 0x1d9   :  { %8047 = vmatmul.mubr.msk.bf16.gmra.mrb[44].mxu0 %vm131_vm0, %v939_v16  ;;  %v1305_v16 = vld [vmem:[#allocation2 + $0xfb] sm:$0xf] }
 0x1da   :  { %1169 = vmatprep.mubr.bf16.mxu0 %v12481_v0  ;;  %v1321_v17 = vpack.c.bf16 %v1305_v16, %v1304_v15  ;;  %v9480_v16 = vld [vmem:[%s12499_s23 + $0xc4] ss:$8 sps:$4 sm:$0xff]  }
 0x1e1   :  { %8048 = vmatmul.mubr.msk.bf16.gmra.mrb[48].mxu0 %vm131_vm0, %v940_v19  ;;  %v1652_v19 = vld [vmem:[#allocation2 + $0x4] sm:$0xff] }
 0x1e2   :  { %1179 = vmatprep.mubr.bf16.mxu0 %v12481_v0  ;;  %v1684_v23 = vpack.c.bf16 %v1653_v20, %v1652_v19  ;;  %v1676_v19 = vld [vmem:[#allocation2 + $0xc4] sm:$0xff]  ;;  %v1677_v20 = vld [vmem:[#allocation2 + $0xcc] sm:$0xff] }
 0x1e9   :  { %8049 = vmatmul.mubr.msk.bf16.gmra.mrb[52].mxu0 %vm131_vm0, %v941_v22  ;;  %v9447_v22 = vld [vmem:[%s12499_s23 + $0x14] ss:$8 sps:$4 sm:$0xff]  }
 0x1ea   :  { %1189 = vmatprep.mubr.bf16.mxu0 %v12481_v0  ;;  %8883 = vmatprep.subr.bf16.mxu1 %v9447_v22 }
 0x1eb   :  { %8897 = vmatpush1.bf16.msra.mxu1 %v9445_v24 }
 0x1f1   :  { %8050 = vmatmul.mubr.msk.bf16.gmra.mrb[56].mxu0 %vm131_vm0, %v942_v25  ;;  %v9450_v25 = vld [vmem:[%s12499_s23 + $0x24] ss:$8 sps:$4 sm:$0xff]  }
 0x1f2   :  { %1199 = vmatprep.mubr.bf16.mxu0 %v12481_v0  ;;  %8884 = vmatprep.subr.bf16.mxu1 %v9450_v25 }
 0x1f9   :  { %8051 = vmatmul.mubr.msk.bf16.gmra.mrb[60].mxu0 %vm131_vm0, %v943_v28  ;;  %v9448_v28 = vld [vmem:[%s12499_s23 + $0x20] ss:$8 sps:$4 sm:$0xff]  }
 0x1fa   :  { %1427 = vmatprep.mubr.bf16.mxu0 %v12481_v0  ;;  %8898 = vmatpush1.bf16.msra.mxu1 %v9448_v28 }
 0x1fb   :  { %8885 = vmatprep.subr.bf16.mxu1 %v9453_v29 }
 0x201   :  { %8056 = vmatmul.mubr.msk.bf16.vlgmr.msra.gmra.mrb[0].mxu0 %vm131_vm0, %v1306_v31  ;;  %v9451_v31 = vld [vmem:[%s12499_s23 + $0x30] ss:$8 sps:$4 sm:$0xff]  }
 0x202   :  { %1437 = vmatprep.mubr.bf16.mxu0 %v12481_v0  ;;  %1774 = vmatpush1.bf16.msra.mxu0 %v9436_v32  ;;  %v9456_v32 = vld [vmem:[%s12499_s23 + $0x44] ss:$8 sps:$4 sm:$0xff]  }
 0x203   :  { %1775 = vmatprep.subr.bf16.mxu0 %v9441_v33  ;;  %8899 = vmatpush1.bf16.msra.mxu1 %v9451_v31  ;;  %v1656_v33 = vld [vmem:[#allocation2 + $0x24] sm:$0xff] }
 0x204   :  { %8886 = vmatprep.subr.bf16.mxu1 %v9456_v32 }
 0x206   :  { %1776 = vmatpush1.bf16.msra.mxu0 %v9439_v36  ;;  %v9459_v36 = vld [vmem:[%s12499_s23 + $0x54] ss:$8 sps:$4 sm:$0xff]  }
 0x207   :  { %2419 = vmatprep.subr.bf16.mxu0 %v9444_v18  ;;  %8900 = vmatpush1.bf16.msra.mxu1 %v9454_v35  ;;  %v9483_v18 = vld [vmem:[%s12499_s23 + $0xd4] ss:$8 sps:$4 sm:$0xff]  }
 0x208   :  { %8887 = vmatprep.subr.bf16.mxu1 %v9459_v36 }
 0x209   :  { %8057 = vmatmul.mubr.msk.bf16.gmra.mrb[4].mxu0 %vm131_vm0, %v1307_v37  ;;  %v1686_v37 = vpack.c.bf16 %v1657_v34, %v1656_v33 }
 0x20a   :  { %1447 = vmatprep.mubr.bf16.mxu0 %v12481_v0 }
 0x20b   :  { %8901 = vmatpush1.bf16.msra.mxu1 %v9457_v38 }
 0x20c   :  { %8888 = vmatprep.subr.bf16.mxu1 %v9462_v39 }
 0x20f   :  { %8902 = vmatpush1.bf16.msra.mxu1 %v9460_v42 }
 0x211   :  { %8058 = vmatmul.mubr.msk.bf16.gmra.mrb[8].mxu0 %vm131_vm0, %v1308_v40  ;;  %v1658_v40 = vld [vmem:[#allocation2 + $0x34] sm:$0xff] }
 0x212   :  { %1457 = vmatprep.mubr.bf16.mxu0 %v12481_v0  ;;  %v1687_v44 = vpack.c.bf16 %v1659_v41, %v1658_v40 }
 0x219   :  { %8059 = vmatmul.mubr.msk.bf16.gmra.mrb[12].mxu0 %vm131_vm0, %v1309_v43  ;;  %v9465_v43 = vld [vmem:[%s12499_s23 + $0x74] ss:$8 sps:$4 sm:$0xff]  }
 0x21a   :  { %1467 = vmatprep.mubr.bf16.mxu0 %v12481_v0  ;;  %8889 = vmatprep.subr.bf16.mxu1 %v9465_v43 }
 0x21b   :  { %8903 = vmatpush1.bf16.msra.mxu1 %v9463_v45 }
 0x221   :  { %8060 = vmatmul.mubr.msk.bf16.gmra.mrb[16].mxu0 %vm131_vm0, %v1310_v46  ;;  %v9468_v46 = vld [vmem:[%s12499_s23 + $0x84] ss:$8 sps:$4 sm:$0xff]  }
 0x222   :  { %1477 = vmatprep.mubr.bf16.mxu0 %v12481_v0  ;;  %8890 = vmatprep.subr.bf16.mxu1 %v9468_v46 }
 0x229   :  { %8061 = vmatmul.mubr.msk.bf16.gmra.mrb[20].mxu0 %vm131_vm0, %v1311_v49  ;;  %v9466_v49 = vld [vmem:[%s12499_s23 + $0x80] ss:$8 sps:$4 sm:$0xff]  }
 0x22a   :  { %1487 = vmatprep.mubr.bf16.mxu0 %v12481_v0  ;;  %8904 = vmatpush1.bf16.msra.mxu1 %v9466_v49 }
 0x22b   :  { %8891 = vmatprep.subr.bf16.mxu1 %v9471_v50 }
 0x231   :  { %8062 = vmatmul.mubr.msk.bf16.gmra.mrb[24].mxu0 %vm131_vm0, %v1312_v52  ;;  %v9469_v52 = vld [vmem:[%s12499_s23 + $0x90] ss:$8 sps:$4 sm:$0xff]  }
 0x232   :  { %1497 = vmatprep.mubr.bf16.mxu0 %v12481_v0  ;;  %8905 = vmatpush1.bf16.msra.mxu1 %v9469_v52 }
 0x233   :  { %8892 = vmatprep.subr.bf16.mxu1 %v9474_v53 }
 0x236   :  { %8906 = vmatpush1.bf16.msra.mxu1 %v9472_v56 }
 0x237   :  { %8893 = vmatprep.subr.bf16.mxu1 %v9477_v57 }
 0x239   :  { %8063 = vmatmul.mubr.msk.bf16.gmra.mrb[28].mxu0 %vm131_vm0, %v1313_v55  ;;  %v1663_v55 = vld [vmem:[#allocation2 + $0x5c] sm:$0xff] }
 0x23a   :  { %1507 = vmatprep.mubr.bf16.mxu0 %v12481_v0  ;;  %8907 = vmatpush1.bf16.msra.mxu1 %v9475_v59 }
 0x23b   :  { %8894 = vmatprep.subr.bf16.mxu1 %v9480_v16 }
 0x241   :  { %8064 = vmatmul.mubr.msk.bf16.gmra.mrb[32].mxu0 %vm131_vm0, %v1314_v58  ;;  %v1689_v58 = vpack.c.bf16 %v1663_v55, %v1662_v54 }
 0x242   :  { %1517 = vmatprep.mubr.bf16.mxu0 %v12481_v0 }
 0x249   :  { %8065 = vmatmul.mubr.msk.bf16.gmra.mrb[36].mxu0 %vm131_vm0, %v1315_v61  ;;  %v1665_v61 = vld [vmem:[#allocation2 + $0x6c] sm:$0xff] }
 0x24a   :  { %1527 = vmatprep.mubr.bf16.mxu0 %v12481_v0  ;;  %v1690_v62 = vpack.c.bf16 %v1665_v61, %v1664_v60 }
 0x251   :  { %8066 = vmatmul.mubr.msk.bf16.gmra.mrb[40].mxu0 %vm131_vm0, %v1316_v2  ;;  %v1667_v2 = vld [vmem:[#allocation2 + $0x7c] sm:$0xff] }
 0x252   :  { %1537 = vmatprep.mubr.bf16.mxu0 %v12481_v0  ;;  %v1691_v3 = vpack.c.bf16 %v1667_v2, %v1666_v63 }
 0x259   :  { %8067 = vmatmul.mubr.msk.bf16.gmra.mrb[44].mxu0 %vm131_vm0, %v1317_v5  ;;  %v1669_v5 = vld [vmem:[#allocation2 + $0x8c] sm:$0xff] }
 0x25a   :  { %1547 = vmatprep.mubr.bf16.mxu0 %v12481_v0  ;;  %v1692_v6 = vpack.c.bf16 %v1669_v5, %v1668_v4 }
 0x261   :  { %8068 = vmatmul.mubr.msk.bf16.gmra.mrb[48].mxu0 %vm131_vm0, %v1318_v8  ;;  %v1671_v8 = vld [vmem:[#allocation2 + $0x9c] sm:$0xff] }
 0x262   :  { %1557 = vmatprep.mubr.bf16.mxu0 %v12481_v0  ;;  %v1693_v9 = vpack.c.bf16 %v1671_v8, %v1670_v7 }
 0x269   :  { %8069 = vmatmul.mubr.msk.bf16.gmra.mrb[52].mxu0 %vm131_vm0, %v1319_v11  ;;  %v1673_v11 = vld [vmem:[#allocation2 + $0xac] sm:$0xff] }
 0x26a   :  { %1567 = vmatprep.mubr.bf16.mxu0 %v12481_v0  ;;  %v1694_v12 = vpack.c.bf16 %v1673_v11, %v1672_v10 }
 0x271   :  { %8070 = vmatmul.mubr.msk.bf16.gmra.mrb[56].mxu0 %vm131_vm0, %v1320_v14  ;;  %v1675_v14 = vld [vmem:[#allocation2 + $0xbc] sm:$0xff] }
 0x272   :  { %1577 = vmatprep.mubr.bf16.mxu0 %v12481_v0  ;;  %v1695_v15 = vpack.c.bf16 %v1675_v14, %v1674_v13 }
 0x279   :  { %8071 = vmatmul.mubr.msk.bf16.gmra.mrb[60].mxu0 %vm131_vm0, %v1321_v17  ;;  %v9478_v17 = vld [vmem:[%s12499_s23 + $0xc0] ss:$8 sps:$4 sm:$0xff]  }
 0x27a   :  { %1805 = vmatprep.mubr.bf16.mxu0 %v12481_v0  ;;  %8908 = vmatpush1.bf16.msra.mxu1 %v9478_v17 }
 0x27b   :  { %8895 = vmatprep.subr.bf16.mxu1 %v9483_v18 }
 0x281   :  { %8076 = vmatmul.mubr.msk.bf16.vlgmr.msra.gmra.mrb[0].mxu0 %vm131_vm0, %v1684_v23  ;;  %v1678_v23 = vld [vmem:[#allocation2 + $0xd4] sm:$0xff] }
 0x282   :  { %1815 = vmatprep.mubr.bf16.mxu0 %v12481_v0  ;;  %2420 = vmatpush1.bf16.msra.mxu0 %v9442_v21  ;;  %v9481_v21 = vld [vmem:[%s12499_s23 + $0xd0] ss:$8 sps:$4 sm:$0xff]  }
 0x283   :  { %2421 = vmatprep.subr.bf16.mxu0 %v9447_v22  ;;  %8909 = vmatpush1.bf16.msra.mxu1 %v9481_v21  ;;  %v1696_v22 = vpack.c.bf16 %v1677_v20, %v1676_v19 }
 0x286   :  { %2422 = vmatpush1.bf16.msra.mxu0 %v9445_v24  ;;  %v1679_v24 = vld [vmem:[#allocation2 + $0xdc] sm:$0xff] }
 0x287   :  { %2423 = vmatprep.subr.bf16.mxu0 %v9450_v25  ;;  %v1697_v25 = vpack.c.bf16 %v1679_v24, %v1678_v23 }
 0x289   :  { %8077 = vmatmul.mubr.msk.bf16.gmra.mrb[4].mxu0 %vm131_vm0, %v1685_v30  ;;  %v1683_v30 = vld [vmem:[#allocation2 + $0xfc] sm:$0xf] }
 0x28a   :  { %1825 = vmatprep.mubr.bf16.mxu0 %v12481_v0  ;;  %2424 = vmatpush1.bf16.msra.mxu0 %v9448_v28  ;;  %v1698_v28 = vpack.c.bf16 %v1681_v27, %v1680_v26 }
 0x28b   :  { %2425 = vmatprep.subr.bf16.mxu0 %v9453_v29  ;;  %v1682_v29 = vld [vmem:[#allocation2 + $0xf4] sm:$0xff] }
 0x28e   :  { %2426 = vmatpush1.bf16.msra.mxu0 %v9451_v31  ;;  %v1699_v31 = vpack.c.bf16 %v1683_v30, %v1682_v29 }
 0x28f   :  { %2427 = vmatprep.subr.bf16.mxu0 %v9456_v32  ;;  %v2032_v32 = vlaneseq }
 0x291   :  { %8078 = vmatmul.mubr.msk.bf16.gmra.mrb[8].mxu0 %vm131_vm0, %v1686_v37  ;;  %v2033_v33 = vshrl.u32 %v2032_v32, 7 }
 0x292   :  { %1835 = vmatprep.mubr.bf16.mxu0 %v12481_v0  ;;  %2428 = vmatpush1.bf16.msra.mxu0 %v9454_v35  ;;  %v2030_v35 = vld [vmem:[%s12500_s22] sm:$0x3] }
 0x293   :  { %2429 = vmatprep.subr.bf16.mxu0 %v9459_v36  ;;  %v10615_v34 = vsub.s32 0, %v2033_v33  ;;  %v10620_v36 = vsub.s32 1, %v2033_v33 }
 0x295   :  { %12501 = vst [vmem:[#allocation18_spill] sm:$0xff] %v10620_v36  ;;  %v10623_v37 = vrot.slane %v2030_v35, %v10615_v34 }
 0x296   :  { %2430 = vmatpush1.bf16.msra.mxu0 %v9457_v38  ;;  %v10626_v38 = vrot.slane %v2030_v35, %v10620_v36 }
 0x297   :  { %2431 = vmatprep.subr.bf16.mxu0 %v9462_v39 }
 0x299   :  { %8079 = vmatmul.mubr.msk.bf16.gmra.mrb[12].mxu0 %vm131_vm0, %v1687_v44 }
 0x29a   :  { %1845 = vmatprep.mubr.bf16.mxu0 %v12481_v0  ;;  %2432 = vmatpush1.bf16.msra.mxu0 %v9460_v42 }
 0x29b   :  { %2433 = vmatprep.subr.bf16.mxu0 %v9465_v43 }
 0x29e   :  { %2434 = vmatpush1.bf16.msra.mxu0 %v9463_v45 }
 0x29f   :  { %2435 = vmatprep.subr.bf16.mxu0 %v9468_v46 }
 0x2a1   :  { %8080 = vmatmul.mubr.msk.bf16.gmra.mrb[16].mxu0 %vm131_vm0, %v1688_v51 }
 0x2a2   :  { %1855 = vmatprep.mubr.bf16.mxu0 %v12481_v0  ;;  %2436 = vmatpush1.bf16.msra.mxu0 %v9466_v49 }
 0x2a3   :  { %2437 = vmatprep.subr.bf16.mxu0 %v9471_v50 }
 0x2a6   :  { %2438 = vmatpush1.bf16.msra.mxu0 %v9469_v52 }
 0x2a7   :  { %2439 = vmatprep.subr.bf16.mxu0 %v9474_v53 }
 0x2a9   :  { %8081 = vmatmul.mubr.msk.bf16.gmra.mrb[20].mxu0 %vm131_vm0, %v1689_v58 }
 0x2aa   :  { %1865 = vmatprep.mubr.bf16.mxu0 %v12481_v0  ;;  %2440 = vmatpush1.bf16.msra.mxu0 %v9472_v56 }
 0x2ab   :  { %2441 = vmatprep.subr.bf16.mxu0 %v9477_v57 }
 0x2ae   :  { %2442 = vmatpush1.bf16.msra.mxu0 %v9475_v59 }
 0x2af   :  { %2443 = vmatprep.subr.bf16.mxu0 %v9480_v16 }
 0x2b1   :  { %8082 = vmatmul.mubr.msk.bf16.gmra.mrb[24].mxu0 %vm131_vm0, %v1690_v62 }
 0x2b2   :  { %1875 = vmatprep.mubr.bf16.mxu0 %v12481_v0  ;;  %2444 = vmatpush1.bf16.msra.mxu0 %v9478_v17 }
 0x2b3   :  { %2445 = vmatprep.subr.bf16.mxu0 %v9483_v18 }
 0x2b6   :  { %2446 = vmatpush1.bf16.msra.mxu0 %v9481_v21 }
 0x2b9   :  { %8083 = vmatmul.mubr.msk.bf16.gmra.mrb[28].mxu0 %vm131_vm0, %v1691_v3 }
 0x2ba   :  { %1885 = vmatprep.mubr.bf16.mxu0 %v12481_v0 }
 0x2c1   :  { %8084 = vmatmul.mubr.msk.bf16.gmra.mrb[32].mxu0 %vm131_vm0, %v1692_v6 }
 0x2c2   :  { %1895 = vmatprep.mubr.bf16.mxu0 %v12481_v0 }
 0x2c9   :  { %8085 = vmatmul.mubr.msk.bf16.gmra.mrb[36].mxu0 %vm131_vm0, %v1693_v9 }
 0x2ca   :  { %1905 = vmatprep.mubr.bf16.mxu0 %v12481_v0 }
 0x2d1   :  { %8086 = vmatmul.mubr.msk.bf16.gmra.mrb[40].mxu0 %vm131_vm0, %v1694_v12 }
 0x2d2   :  { %1915 = vmatprep.mubr.bf16.mxu0 %v12481_v0 }
 0x2d9   :  { %8087 = vmatmul.mubr.msk.bf16.gmra.mrb[44].mxu0 %vm131_vm0, %v1695_v15 }
 0x2da   :  { %1925 = vmatprep.mubr.bf16.mxu0 %v12481_v0 }
 0x2e1   :  { %8088 = vmatmul.mubr.msk.bf16.gmra.mrb[48].mxu0 %vm131_vm0, %v1696_v22 }
 0x2e2   :  { %1935 = vmatprep.mubr.bf16.mxu0 %v12481_v0 }
 0x2e9   :  { %8089 = vmatmul.mubr.msk.bf16.gmra.mrb[52].mxu0 %vm131_vm0, %v1697_v25 }
 0x2ea   :  { %1945 = vmatprep.mubr.bf16.mxu0 %v12481_v0 }
 0x2f1   :  { %8090 = vmatmul.mubr.msk.bf16.gmra.mrb[56].mxu0 %vm131_vm0, %v1698_v28 }
 0x2f2   :  { %1955 = vmatprep.mubr.bf16.mxu0 %v12481_v0 }
 0x2f9   :  { %8091 = vmatmul.mubr.msk.bf16.gmra.mrb[60].mxu0 %vm131_vm0, %v1699_v31 }
 0x354   :  { %v1807_v39 = vpop.f32.mrb[0].mxu0 }
 0x355   :  { %v2042_v40 = vadd.f32 %v10623_v37, %v1807_v39  ;;  %v1809_v41 = vpop.f32.mrb[1].mxu0 }
 0x356   :  { %v2043_v42 = vadd.f32 %v10626_v38, %v1809_v41  ;;  %v1811_v43 = vpop.f32.mrb[2].mxu0 }
 0x357   :  { %v2044_v44 = vadd.f32 %v10623_v37, %v1811_v43  ;;  %v1813_v45 = vpop.f32.mrb[3].mxu0  ;;  %v2106_v47 = vmax.f32 %v2042_v40, 0.0 }
 0x358   :  { %v2045_v46 = vadd.f32 %v10626_v38, %v1813_v45  ;;  %v2107_v49 = vmax.f32 %v2043_v42, 0.0 }
 0x359   :  { %v2108_v48 = vmax.f32 %v2044_v44, 0.0 }
 0x35a   :  { %v2109_v50 = vmax.f32 %v2045_v46, 0.0 }
 0x35b   :  { %v2170_v51 = vpack.c.bf16 %v2108_v48, %v2106_v47 }
 0x35c   :  { %v2171_v52 = vpack.c.bf16 %v2109_v50, %v2107_v49  ;;  %v1817_v53 = vpop.f32.mrb[4].mxu0 }
 0x35d   :  { %v2046_v54 = vadd.f32 %v10623_v37, %v1817_v53  ;;  %v1819_v55 = vpop.f32.mrb[5].mxu0 }
 0x35e   :  { %v2047_v56 = vadd.f32 %v10626_v38, %v1819_v55  ;;  %v1821_v57 = vpop.f32.mrb[6].mxu0  ;;  %8120 = vmatprep.mubr.msk.bf16.mxu0 %vm2370_vm3, %v2171_v52 }
 0x35f   :  { %v2048_v58 = vadd.f32 %v10623_v37, %v1821_v57  ;;  %v1823_v59 = vpop.f32.mrb[7].mxu0  ;;  %2452 = vmatmul.mubr.bf16.vlgmr.msra.gmra.mrb[64].mxu0 %v2170_v51  ;;  %v2110_v61 = vmax.f32 %v2046_v54, 0.0 }
 0x360   :  { %v2049_v60 = vadd.f32 %v10626_v38, %v1823_v59  ;;  %v2111_v63 = vmax.f32 %v2047_v56, 0.0 }
 0x361   :  { %v2112_v62 = vmax.f32 %v2048_v58, 0.0 }
 0x362   :  { %v2113_v2 = vmax.f32 %v2049_v60, 0.0 }
 0x363   :  { %v2172_v3 = vpack.c.bf16 %v2112_v62, %v2110_v61 }
 0x364   :  { %v2173_v4 = vpack.c.bf16 %v2113_v2, %v2111_v63  ;;  %v1827_v5 = vpop.f32.mrb[8].mxu0 }
 0x365   :  { %v2050_v6 = vadd.f32 %v10623_v37, %v1827_v5  ;;  %v1829_v7 = vpop.f32.mrb[9].mxu0 }
 0x366   :  { %v2051_v8 = vadd.f32 %v10626_v38, %v1829_v7  ;;  %v1831_v9 = vpop.f32.mrb[10].mxu0  ;;  %8121 = vmatprep.mubr.msk.bf16.mxu0 %vm2370_vm3, %v2173_v4 }
 0x367   :  { %v2052_v10 = vadd.f32 %v10623_v37, %v1831_v9  ;;  %v1833_v11 = vpop.f32.mrb[11].mxu0  ;;  %2462 = vmatmul.mubr.bf16.gmra.mrb[68].mxu0 %v2172_v3  ;;  %v2114_v13 = vmax.f32 %v2050_v6, 0.0 }
 0x368   :  { %v2053_v12 = vadd.f32 %v10626_v38, %v1833_v11  ;;  %v2115_v15 = vmax.f32 %v2051_v8, 0.0 }
 0x369   :  { %v2116_v14 = vmax.f32 %v2052_v10, 0.0 }
 0x36a   :  { %v2117_v16 = vmax.f32 %v2053_v12, 0.0 }
 0x36b   :  { %v2174_v17 = vpack.c.bf16 %v2116_v14, %v2114_v13 }
 0x36c   :  { %v2175_v18 = vpack.c.bf16 %v2117_v16, %v2115_v15  ;;  %v1837_v19 = vpop.f32.mrb[12].mxu0 }
 0x36d   :  { %v2054_v20 = vadd.f32 %v10623_v37, %v1837_v19  ;;  %v1839_v21 = vpop.f32.mrb[13].mxu0 }
 0x36e   :  { %v2055_v22 = vadd.f32 %v10626_v38, %v1839_v21  ;;  %v1841_v23 = vpop.f32.mrb[14].mxu0  ;;  %8122 = vmatprep.mubr.msk.bf16.mxu0 %vm2370_vm3, %v2175_v18 }
 0x36f   :  { %v2056_v24 = vadd.f32 %v10623_v37, %v1841_v23  ;;  %v1843_v25 = vpop.f32.mrb[15].mxu0  ;;  %2472 = vmatmul.mubr.bf16.gmra.mrb[72].mxu0 %v2174_v17  ;;  %v2118_v27 = vmax.f32 %v2054_v20, 0.0 }
 0x370   :  { %v2057_v26 = vadd.f32 %v10626_v38, %v1843_v25  ;;  %v2119_v29 = vmax.f32 %v2055_v22, 0.0 }
 0x371   :  { %v2120_v28 = vmax.f32 %v2056_v24, 0.0 }
 0x372   :  { %v2121_v30 = vmax.f32 %v2057_v26, 0.0 }
 0x373   :  { %v2176_v31 = vpack.c.bf16 %v2120_v28, %v2118_v27 }
 0x374   :  { %v2177_v32 = vpack.c.bf16 %v2121_v30, %v2119_v29  ;;  %v1847_v33 = vpop.f32.mrb[16].mxu0 }
 0x375   :  { %v2058_v35 = vadd.f32 %v10623_v37, %v1847_v33  ;;  %v1849_v39 = vpop.f32.mrb[17].mxu0 }
 0x376   :  { %v2059_v40 = vadd.f32 %v10626_v38, %v1849_v39  ;;  %v1851_v41 = vpop.f32.mrb[18].mxu0  ;;  %8123 = vmatprep.mubr.msk.bf16.mxu0 %vm2370_vm3, %v2177_v32 }
 0x377   :  { %v2060_v42 = vadd.f32 %v10623_v37, %v1851_v41  ;;  %v1853_v43 = vpop.f32.mrb[19].mxu0  ;;  %2482 = vmatmul.mubr.bf16.gmra.mrb[76].mxu0 %v2176_v31  ;;  %v2122_v45 = vmax.f32 %v2058_v35, 0.0 }
 0x378   :  { %v2061_v44 = vadd.f32 %v10626_v38, %v1853_v43  ;;  %v2123_v47 = vmax.f32 %v2059_v40, 0.0 }
 0x379   :  { %v2124_v46 = vmax.f32 %v2060_v42, 0.0 }
 0x37a   :  { %v2125_v48 = vmax.f32 %v2061_v44, 0.0 }
 0x37b   :  { %v2178_v49 = vpack.c.bf16 %v2124_v46, %v2122_v45 }
 0x37c   :  { %v2179_v50 = vpack.c.bf16 %v2125_v48, %v2123_v47  ;;  %v1857_v51 = vpop.f32.mrb[20].mxu0 }
 0x37d   :  { %v2062_v52 = vadd.f32 %v10623_v37, %v1857_v51  ;;  %v1859_v53 = vpop.f32.mrb[21].mxu0 }
 0x37e   :  { %v2063_v54 = vadd.f32 %v10626_v38, %v1859_v53  ;;  %v1861_v55 = vpop.f32.mrb[22].mxu0  ;;  %8124 = vmatprep.mubr.msk.bf16.mxu0 %vm2370_vm3, %v2179_v50 }
 0x37f   :  { %v2064_v56 = vadd.f32 %v10623_v37, %v1861_v55  ;;  %v1863_v57 = vpop.f32.mrb[23].mxu0  ;;  %2492 = vmatmul.mubr.bf16.gmra.mrb[80].mxu0 %v2178_v49  ;;  %v2126_v59 = vmax.f32 %v2062_v52, 0.0 }
 0x380   :  { %v2065_v58 = vadd.f32 %v10626_v38, %v1863_v57  ;;  %v2127_v61 = vmax.f32 %v2063_v54, 0.0 }
 0x381   :  { %v2128_v60 = vmax.f32 %v2064_v56, 0.0 }
 0x382   :  { %v2129_v62 = vmax.f32 %v2065_v58, 0.0 }
 0x383   :  { %v2180_v63 = vpack.c.bf16 %v2128_v60, %v2126_v59 }
 0x384   :  { %v1867_v2 = vpop.f32.mrb[24].mxu0  ;;  %v2181_v3 = vpack.c.bf16 %v2129_v62, %v2127_v61 }
 0x385   :  { %v2066_v4 = vadd.f32 %v10623_v37, %v1867_v2  ;;  %v1869_v5 = vpop.f32.mrb[25].mxu0 }
 0x386   :  { %v2067_v6 = vadd.f32 %v10626_v38, %v1869_v5  ;;  %v1871_v7 = vpop.f32.mrb[26].mxu0  ;;  %8125 = vmatprep.mubr.msk.bf16.mxu1 %vm2370_vm3, %v2181_v3 }
 0x387   :  { %v2068_v8 = vadd.f32 %v10623_v37, %v1871_v7  ;;  %v1873_v9 = vpop.f32.mrb[27].mxu0  ;;  %2502 = vmatmul.mubr.bf16.vlgmr.msra.gmra.mrb[0].mxu1 %v2180_v63  ;;  %v2130_v11 = vmax.f32 %v2066_v4, 0.0 }
 0x388   :  { %v2069_v10 = vadd.f32 %v10626_v38, %v1873_v9  ;;  %v2131_v13 = vmax.f32 %v2067_v6, 0.0 }
 0x389   :  { %v2132_v12 = vmax.f32 %v2068_v8, 0.0 }
 0x38a   :  { %v2133_v14 = vmax.f32 %v2069_v10, 0.0 }
 0x38b   :  { %v2182_v15 = vpack.c.bf16 %v2132_v12, %v2130_v11 }
 0x38c   :  { %v2183_v16 = vpack.c.bf16 %v2133_v14, %v2131_v13  ;;  %v1877_v17 = vpop.f32.mrb[28].mxu0 }
 0x38d   :  { %v2070_v18 = vadd.f32 %v10623_v37, %v1877_v17  ;;  %v1879_v19 = vpop.f32.mrb[29].mxu0 }
 0x38e   :  { %v2071_v20 = vadd.f32 %v10626_v38, %v1879_v19  ;;  %v1881_v21 = vpop.f32.mrb[30].mxu0  ;;  %8126 = vmatprep.mubr.msk.bf16.mxu1 %vm2370_vm3, %v2183_v16 }
 0x38f   :  { %v2072_v22 = vadd.f32 %v10623_v37, %v1881_v21  ;;  %v1883_v23 = vpop.f32.mrb[31].mxu0  ;;  %2512 = vmatmul.mubr.bf16.gmra.mrb[4].mxu1 %v2182_v15  ;;  %v2134_v25 = vmax.f32 %v2070_v18, 0.0 }
 0x390   :  { %v2073_v24 = vadd.f32 %v10626_v38, %v1883_v23  ;;  %v2135_v27 = vmax.f32 %v2071_v20, 0.0 }
 0x391   :  { %v2136_v26 = vmax.f32 %v2072_v22, 0.0 }
 0x392   :  { %v2137_v28 = vmax.f32 %v2073_v24, 0.0 }
 0x393   :  { %v2184_v29 = vpack.c.bf16 %v2136_v26, %v2134_v25 }
 0x394   :  { %v2185_v30 = vpack.c.bf16 %v2137_v28, %v2135_v27  ;;  %v1887_v31 = vpop.f32.mrb[32].mxu0 }
 0x395   :  { %v2074_v32 = vadd.f32 %v10623_v37, %v1887_v31  ;;  %v1889_v33 = vpop.f32.mrb[33].mxu0 }
 0x396   :  { %v2075_v35 = vadd.f32 %v10626_v38, %v1889_v33  ;;  %v1891_v39 = vpop.f32.mrb[34].mxu0  ;;  %8127 = vmatprep.mubr.msk.bf16.mxu1 %vm2370_vm3, %v2185_v30 }
 0x397   :  { %v2076_v40 = vadd.f32 %v10623_v37, %v1891_v39  ;;  %v1893_v41 = vpop.f32.mrb[35].mxu0  ;;  %2522 = vmatmul.mubr.bf16.gmra.mrb[8].mxu1 %v2184_v29  ;;  %v2138_v43 = vmax.f32 %v2074_v32, 0.0 }
 0x398   :  { %v2077_v42 = vadd.f32 %v10626_v38, %v1893_v41  ;;  %v2139_v45 = vmax.f32 %v2075_v35, 0.0 }
 0x399   :  { %v2140_v44 = vmax.f32 %v2076_v40, 0.0 }
 0x39a   :  { %v2141_v46 = vmax.f32 %v2077_v42, 0.0 }
 0x39b   :  { %v2186_v47 = vpack.c.bf16 %v2140_v44, %v2138_v43 }
 0x39c   :  { %v2187_v48 = vpack.c.bf16 %v2141_v46, %v2139_v45  ;;  %v1897_v49 = vpop.f32.mrb[36].mxu0 }
 0x39d   :  { %v2078_v50 = vadd.f32 %v10623_v37, %v1897_v49  ;;  %v1899_v51 = vpop.f32.mrb[37].mxu0 }
 0x39e   :  { %v2079_v52 = vadd.f32 %v10626_v38, %v1899_v51  ;;  %v1901_v53 = vpop.f32.mrb[38].mxu0  ;;  %8128 = vmatprep.mubr.msk.bf16.mxu1 %vm2370_vm3, %v2187_v48 }
 0x39f   :  { %v2080_v54 = vadd.f32 %v10623_v37, %v1901_v53  ;;  %v1903_v55 = vpop.f32.mrb[39].mxu0  ;;  %2532 = vmatmul.mubr.bf16.gmra.mrb[12].mxu1 %v2186_v47  ;;  %v2142_v57 = vmax.f32 %v2078_v50, 0.0 }
 0x3a0   :  { %v2081_v56 = vadd.f32 %v10626_v38, %v1903_v55  ;;  %v2143_v59 = vmax.f32 %v2079_v52, 0.0 }
 0x3a1   :  { %v2144_v58 = vmax.f32 %v2080_v54, 0.0 }
 0x3a2   :  { %v2145_v60 = vmax.f32 %v2081_v56, 0.0 }
 0x3a3   :  { %v2188_v61 = vpack.c.bf16 %v2144_v58, %v2142_v57 }
 0x3a4   :  { %v2189_v62 = vpack.c.bf16 %v2145_v60, %v2143_v59  ;;  %v1907_v63 = vpop.f32.mrb[40].mxu0 }
 0x3a5   :  { %v2082_v2 = vadd.f32 %v10623_v37, %v1907_v63  ;;  %v1909_v3 = vpop.f32.mrb[41].mxu0 }
 0x3a6   :  { %v2083_v4 = vadd.f32 %v10626_v38, %v1909_v3  ;;  %v1911_v5 = vpop.f32.mrb[42].mxu0  ;;  %8129 = vmatprep.mubr.msk.bf16.mxu1 %vm2370_vm3, %v2189_v62 }
 0x3a7   :  { %v2084_v6 = vadd.f32 %v10623_v37, %v1911_v5  ;;  %v1913_v7 = vpop.f32.mrb[43].mxu0  ;;  %2542 = vmatmul.mubr.bf16.gmra.mrb[16].mxu1 %v2188_v61  ;;  %v2146_v9 = vmax.f32 %v2082_v2, 0.0 }
 0x3a8   :  { %v2085_v8 = vadd.f32 %v10626_v38, %v1913_v7  ;;  %v2147_v11 = vmax.f32 %v2083_v4, 0.0 }
 0x3a9   :  { %v2148_v10 = vmax.f32 %v2084_v6, 0.0 }
 0x3aa   :  { %v2149_v12 = vmax.f32 %v2085_v8, 0.0 }
 0x3ab   :  { %v2190_v13 = vpack.c.bf16 %v2148_v10, %v2146_v9 }
 0x3ac   :  { %v2191_v14 = vpack.c.bf16 %v2149_v12, %v2147_v11  ;;  %v1917_v15 = vpop.f32.mrb[44].mxu0 }
 0x3ad   :  { %v2086_v16 = vadd.f32 %v10623_v37, %v1917_v15  ;;  %v1919_v17 = vpop.f32.mrb[45].mxu0 }
 0x3ae   :  { %v2087_v18 = vadd.f32 %v10626_v38, %v1919_v17  ;;  %v1921_v19 = vpop.f32.mrb[46].mxu0  ;;  %8130 = vmatprep.mubr.msk.bf16.mxu1 %vm2370_vm3, %v2191_v14 }
 0x3af   :  { %v2088_v20 = vadd.f32 %v10623_v37, %v1921_v19  ;;  %v1923_v21 = vpop.f32.mrb[47].mxu0  ;;  %2552 = vmatmul.mubr.bf16.gmra.mrb[20].mxu1 %v2190_v13  ;;  %v2150_v23 = vmax.f32 %v2086_v16, 0.0 }
 0x3b0   :  { %v2089_v22 = vadd.f32 %v10626_v38, %v1923_v21  ;;  %v2151_v25 = vmax.f32 %v2087_v18, 0.0 }
 0x3b1   :  { %v2152_v24 = vmax.f32 %v2088_v20, 0.0 }
 0x3b2   :  { %v2153_v26 = vmax.f32 %v2089_v22, 0.0 }
 0x3b3   :  { %v2192_v27 = vpack.c.bf16 %v2152_v24, %v2150_v23 }
 0x3b4   :  { %v2193_v28 = vpack.c.bf16 %v2153_v26, %v2151_v25  ;;  %v1927_v29 = vpop.f32.mrb[48].mxu0 }
 0x3b5   :  { %v2090_v30 = vadd.f32 %v10623_v37, %v1927_v29  ;;  %v1929_v31 = vpop.f32.mrb[49].mxu0 }
 0x3b6   :  { %v2091_v32 = vadd.f32 %v10626_v38, %v1929_v31  ;;  %v1931_v33 = vpop.f32.mrb[50].mxu0  ;;  %8131 = vmatprep.mubr.msk.bf16.mxu1 %vm2370_vm3, %v2193_v28 }
 0x3b7   :  { %v2092_v35 = vadd.f32 %v10623_v37, %v1931_v33  ;;  %v1933_v39 = vpop.f32.mrb[51].mxu0  ;;  %2562 = vmatmul.mubr.bf16.gmra.mrb[24].mxu1 %v2192_v27  ;;  %v2154_v41 = vmax.f32 %v2090_v30, 0.0  ;;  %v9486_v27 = vld [vmem:[#allocation8 + $0x4] ss:$8 sps:$4 sm:$0xff]  }
 0x3b8   :  { %v2093_v40 = vadd.f32 %v10626_v38, %v1933_v39  ;;  %v2155_v43 = vmax.f32 %v2091_v32, 0.0 }
 0x3b9   :  { %v2156_v42 = vmax.f32 %v2092_v35, 0.0 }
 0x3ba   :  { %v2157_v44 = vmax.f32 %v2093_v40, 0.0 }
 0x3bb   :  { %v2194_v45 = vpack.c.bf16 %v2156_v42, %v2154_v41 }
 0x3bc   :  { %v2195_v46 = vpack.c.bf16 %v2157_v44, %v2155_v43  ;;  %v1937_v47 = vpop.f32.mrb[52].mxu0 }
 0x3bd   :  { %v2094_v48 = vadd.f32 %v10623_v37, %v1937_v47  ;;  %v1939_v49 = vpop.f32.mrb[53].mxu0 }
 0x3be   :  { %v2095_v50 = vadd.f32 %v10626_v38, %v1939_v49  ;;  %v1941_v51 = vpop.f32.mrb[54].mxu0  ;;  %8132 = vmatprep.mubr.msk.bf16.mxu1 %vm2370_vm3, %v2195_v46 }
 0x3bf   :  { %v2096_v52 = vadd.f32 %v10623_v37, %v1941_v51  ;;  %v1943_v53 = vpop.f32.mrb[55].mxu0  ;;  %2572 = vmatmul.mubr.bf16.gmra.mrb[28].mxu1 %v2194_v45  ;;  %v2158_v55 = vmax.f32 %v2094_v48, 0.0 }
 0x3c0   :  { %v2097_v54 = vadd.f32 %v10626_v38, %v1943_v53  ;;  %v2159_v57 = vmax.f32 %v2095_v50, 0.0 }
 0x3c1   :  { %v2160_v56 = vmax.f32 %v2096_v52, 0.0 }
 0x3c2   :  { %v2161_v58 = vmax.f32 %v2097_v54, 0.0 }
 0x3c3   :  { %v2196_v59 = vpack.c.bf16 %v2160_v56, %v2158_v55 }
 0x3c4   :  { %v2197_v60 = vpack.c.bf16 %v2161_v58, %v2159_v57  ;;  %v1947_v61 = vpop.f32.mrb[56].mxu0 }
 0x3c5   :  { %v2098_v62 = vadd.f32 %v10623_v37, %v1947_v61  ;;  %v1949_v63 = vpop.f32.mrb[57].mxu0 }
 0x3c6   :  { %v2099_v2 = vadd.f32 %v10626_v38, %v1949_v63  ;;  %v1951_v3 = vpop.f32.mrb[58].mxu0  ;;  %8133 = vmatprep.mubr.msk.bf16.mxu1 %vm2370_vm3, %v2197_v60 }
 0x3c7   :  { %v2100_v4 = vadd.f32 %v10623_v37, %v1951_v3  ;;  %v1953_v5 = vpop.f32.mrb[59].mxu0  ;;  %2582 = vmatmul.mubr.bf16.gmra.mrb[32].mxu1 %v2196_v59  ;;  %v2162_v7 = vmax.f32 %v2098_v62, 0.0 }
 0x3c8   :  { %v2101_v6 = vadd.f32 %v10626_v38, %v1953_v5  ;;  %v2163_v9 = vmax.f32 %v2099_v2, 0.0 }
 0x3c9   :  { %v2164_v8 = vmax.f32 %v2100_v4, 0.0 }
 0x3ca   :  { %v2165_v10 = vmax.f32 %v2101_v6, 0.0 }
 0x3cb   :  { %v2198_v11 = vpack.c.bf16 %v2164_v8, %v2162_v7 }
 0x3cc   :  { %v2199_v12 = vpack.c.bf16 %v2165_v10, %v2163_v9  ;;  %v1957_v13 = vpop.f32.mrb[60].mxu0 }
 0x3cd   :  { %v2102_v14 = vadd.f32 %v10623_v37, %v1957_v13  ;;  %v1959_v15 = vpop.f32.mrb[61].mxu0 }
 0x3ce   :  { %v2103_v16 = vadd.f32 %v10626_v38, %v1959_v15  ;;  %v1961_v17 = vpop.f32.mrb[62].mxu0  ;;  %8134 = vmatprep.mubr.msk.bf16.mxu1 %vm2370_vm3, %v2199_v12 }
 0x3cf   :  { %v2104_v18 = vadd.f32 %v10623_v37, %v1961_v17  ;;  %v1963_v19 = vpop.f32.mrb[63].mxu0  ;;  %2592 = vmatmul.mubr.bf16.gmra.mrb[36].mxu1 %v2198_v11  ;;  %v2166_v21 = vmax.f32 %v2102_v14, 0.0 }
 0x3d0   :  { %v2105_v20 = vadd.f32 %v10626_v38, %v1963_v19  ;;  %v2167_v23 = vmax.f32 %v2103_v16, 0.0 }
 0x3d1   :  { %v2168_v22 = vmax.f32 %v2104_v18, 0.0 }
 0x3d2   :  { %v2169_v24 = vmax.f32 %v2105_v20, 0.0 }
 0x3d3   :  { %v2200_v25 = vpack.c.bf16 %v2168_v22, %v2166_v21 }
 0x3d4   :  { %v2201_v26 = vpack.c.bf16 %v2169_v24, %v2167_v23 }
 0x3d6   :  { %8135 = vmatprep.mubr.msk.bf16.mxu1 %vm2370_vm3, %v2201_v26 }
 0x3d7   :  { %2602 = vmatmul.mubr.bf16.gmra.mrb[40].mxu1 %v2200_v25 }
 0x3d8   :  { %8155 = vmatprep.mubr.msk.bf16.mxu1 %vm2743_vm4, %v9486_v27 }
 0x432   :  { %v2453_v28 = vpop.f32.mrb[64].mxu0 }
 0x433   :  { %v2455_v29 = vpop.f32.mrb[65].mxu0 }
 0x434   :  { %v2457_v37 = vpop.f32.mrb[66].mxu0 }
 0x435   :  { %v2630_v30 = vpack.c.bf16 %v2457_v37, %v2453_v28  ;;  %v2459_v31 = vpop.f32.mrb[67].mxu0 }
 0x436   :  { %v2631_v32 = vpack.c.bf16 %v2459_v31, %v2455_v29 }
 0x438   :  { %2778 = vmatprep.subr.bf16.mxu1 %v2631_v32 }
 0x439   :  { %2779 = vmatpush1.bf16.msra.mxu1 %v2630_v30 }
 0x43a   :  { %v2463_v38 = vpop.f32.mrb[68].mxu0 }
 0x43b   :  { %v2465_v33 = vpop.f32.mrb[69].mxu0 }
 0x43c   :  { %v2467_v35 = vpop.f32.mrb[70].mxu0 }
 0x43d   :  { %v2632_v39 = vpack.c.bf16 %v2467_v35, %v2463_v38  ;;  %v2469_v40 = vpop.f32.mrb[71].mxu0 }
 0x43e   :  { %v2633_v41 = vpack.c.bf16 %v2469_v40, %v2465_v33 }
 0x440   :  { %2780 = vmatprep.subr.bf16.mxu1 %v2633_v41 }
 0x441   :  { %2781 = vmatpush1.bf16.msra.mxu1 %v2632_v39 }
 0x442   :  { %v2473_v42 = vpop.f32.mrb[72].mxu0 }
 0x443   :  { %v2475_v43 = vpop.f32.mrb[73].mxu0 }
 0x444   :  { %v2477_v44 = vpop.f32.mrb[74].mxu0 }
 0x445   :  { %v2634_v45 = vpack.c.bf16 %v2477_v44, %v2473_v42  ;;  %v2479_v46 = vpop.f32.mrb[75].mxu0 }
 0x446   :  { %v2635_v47 = vpack.c.bf16 %v2479_v46, %v2475_v43 }
 0x448   :  { %2782 = vmatprep.subr.bf16.mxu1 %v2635_v47 }
 0x449   :  { %2783 = vmatpush1.bf16.msra.mxu1 %v2634_v45 }
 0x44a   :  { %v2483_v48 = vpop.f32.mrb[76].mxu0 }
 0x44b   :  { %v2485_v49 = vpop.f32.mrb[77].mxu0 }
 0x44c   :  { %v2487_v50 = vpop.f32.mrb[78].mxu0 }
 0x44d   :  { %v2636_v51 = vpack.c.bf16 %v2487_v50, %v2483_v48  ;;  %v2489_v52 = vpop.f32.mrb[79].mxu0 }
 0x44e   :  { %v2637_v53 = vpack.c.bf16 %v2489_v52, %v2485_v49 }
 0x450   :  { %2784 = vmatprep.subr.bf16.mxu1 %v2637_v53 }
 0x451   :  { %2785 = vmatpush1.bf16.msra.mxu1 %v2636_v51 }
 0x452   :  { %v2493_v54 = vpop.f32.mrb[80].mxu0 }
 0x453   :  { %v2495_v55 = vpop.f32.mrb[81].mxu0 }
 0x454   :  { %v2497_v56 = vpop.f32.mrb[82].mxu0 }
 0x455   :  { %v2638_v57 = vpack.c.bf16 %v2497_v56, %v2493_v54  ;;  %v2499_v58 = vpop.f32.mrb[83].mxu0 }
 0x456   :  { %v2639_v59 = vpack.c.bf16 %v2499_v58, %v2495_v55 }
 0x458   :  { %2786 = vmatprep.subr.bf16.mxu1 %v2639_v59 }
 0x459   :  { %2787 = vmatpush1.bf16.msra.mxu1 %v2638_v57 }
 0x45a   :  { %v2503_v60 = vpop.f32.mrb[0].mxu1 }
 0x45b   :  { %v2505_v61 = vpop.f32.mrb[1].mxu1 }
 0x45c   :  { %v2507_v62 = vpop.f32.mrb[2].mxu1 }
 0x45d   :  { %v2640_v63 = vpack.c.bf16 %v2507_v62, %v2503_v60  ;;  %v2509_v2 = vpop.f32.mrb[3].mxu1 }
 0x45e   :  { %v2641_v3 = vpack.c.bf16 %v2509_v2, %v2505_v61 }
 0x460   :  { %2788 = vmatprep.subr.bf16.mxu1 %v2641_v3 }
 0x461   :  { %2789 = vmatpush1.bf16.msra.mxu1 %v2640_v63 }
 0x462   :  { %v2513_v4 = vpop.f32.mrb[4].mxu1 }
 0x463   :  { %v2515_v5 = vpop.f32.mrb[5].mxu1 }
 0x464   :  { %v2517_v6 = vpop.f32.mrb[6].mxu1 }
 0x465   :  { %v2642_v7 = vpack.c.bf16 %v2517_v6, %v2513_v4  ;;  %v2519_v8 = vpop.f32.mrb[7].mxu1  ;;  %v9513_v4 = vld [vmem:[%s12502_s4 + $0x94] ss:$8 sps:$4 sm:$0xff]   ;;  %v9484_v6 = vld [vmem:[#allocation8] ss:$8 sps:$4 sm:$0xff]  }
 0x466   :  { %v2643_v9 = vpack.c.bf16 %v2519_v8, %v2515_v5  ;;  %v9511_v8 = vld [vmem:[%s12502_s4 + $0x90] ss:$8 sps:$4 sm:$0xff]  }
 0x468   :  { %2790 = vmatprep.subr.bf16.mxu1 %v2643_v9  ;;  %v9516_v9 = vld [vmem:[%s12502_s4 + $0xa4] ss:$8 sps:$4 sm:$0xff]  }
 0x469   :  { %2791 = vmatpush1.bf16.msra.mxu1 %v2642_v7  ;;  %v9487_v7 = vld [vmem:[#allocation8 + $0x14] ss:$8 sps:$4 sm:$0xff]  }
 0x46a   :  { %v2523_v10 = vpop.f32.mrb[8].mxu1 }
 0x46b   :  { %v2525_v11 = vpop.f32.mrb[9].mxu1 }
 0x46c   :  { %v2527_v12 = vpop.f32.mrb[10].mxu1 }
 0x46d   :  { %v2644_v13 = vpack.c.bf16 %v2527_v12, %v2523_v10  ;;  %v2529_v14 = vpop.f32.mrb[11].mxu1  ;;  %v9514_v10 = vld [vmem:[%s12502_s4 + $0xa0] ss:$8 sps:$4 sm:$0xff]  }
 0x46e   :  { %v2645_v15 = vpack.c.bf16 %v2529_v14, %v2525_v11  ;;  %v9519_v11 = vld [vmem:[%s12502_s4 + $0xb4] ss:$8 sps:$4 sm:$0xff]   ;;  %v9489_v12 = vld [vmem:[#allocation8 + $0x10] ss:$8 sps:$4 sm:$0xff]   ;;  %v9517_v14 = vld [vmem:[%s12502_s4 + $0xb0] ss:$8 sps:$4 sm:$0xff]  }
 0x470   :  { %2792 = vmatprep.subr.bf16.mxu1 %v2645_v15  ;;  %v9522_v15 = vld [vmem:[%s12502_s4 + $0xc4] ss:$8 sps:$4 sm:$0xff]  }
 0x471   :  { %2793 = vmatpush1.bf16.msra.mxu1 %v2644_v13  ;;  %v9490_v13 = vld [vmem:[#allocation8 + $0x24] ss:$8 sps:$4 sm:$0xff]  }
 0x472   :  { %v2533_v16 = vpop.f32.mrb[12].mxu1 }
 0x473   :  { %v2535_v17 = vpop.f32.mrb[13].mxu1 }
 0x474   :  { %v2537_v18 = vpop.f32.mrb[14].mxu1 }
 0x475   :  { %v2646_v19 = vpack.c.bf16 %v2537_v18, %v2533_v16  ;;  %v2539_v20 = vpop.f32.mrb[15].mxu1  ;;  %v9520_v16 = vld [vmem:[%s12502_s4 + $0xc0] ss:$8 sps:$4 sm:$0xff]   ;;  %v9492_v18 = vld [vmem:[#allocation8 + $0x20] ss:$8 sps:$4 sm:$0xff]  }
 0x476   :  { %v2647_v21 = vpack.c.bf16 %v2539_v20, %v2535_v17  ;;  %v9525_v17 = vld [vmem:[%s12502_s4 + $0xd4] ss:$8 sps:$4 sm:$0xff]   ;;  %v9523_v20 = vld [vmem:[%s12502_s4 + $0xd0] ss:$8 sps:$4 sm:$0xff]  }
 0x478   :  { %2794 = vmatprep.subr.bf16.mxu1 %v2647_v21  ;;  %v9495_v21 = vld [vmem:[#allocation8 + $0x30] ss:$8 sps:$4 sm:$0xff]  }
 0x479   :  { %2795 = vmatpush1.bf16.msra.mxu1 %v2646_v19  ;;  %v9493_v19 = vld [vmem:[#allocation8 + $0x34] ss:$8 sps:$4 sm:$0xff]  }
 0x47a   :  { %v2543_v22 = vpop.f32.mrb[16].mxu1 }
 0x47b   :  { %v2545_v23 = vpop.f32.mrb[17].mxu1 }
 0x47c   :  { %v2547_v24 = vpop.f32.mrb[18].mxu1 }
 0x47d   :  { %v2648_v25 = vpack.c.bf16 %v2547_v24, %v2543_v22  ;;  %v2549_v26 = vpop.f32.mrb[19].mxu1  ;;  %v9496_v22 = vld [vmem:[#allocation8 + $0x44] ss:$8 sps:$4 sm:$0xff]   ;;  %v9499_v24 = vld [vmem:[#allocation8 + $0x54] ss:$8 sps:$4 sm:$0xff]  }
 0x47e   :  { %v2649_v27 = vpack.c.bf16 %v2549_v26, %v2545_v23  ;;  %v9498_v23 = vld [vmem:[#allocation8 + $0x40] ss:$8 sps:$4 sm:$0xff]   ;;  %v9502_v26 = vld [vmem:[#allocation8 + $0x64] ss:$8 sps:$4 sm:$0xff]  }
 0x480   :  { %2796 = vmatprep.subr.bf16.mxu1 %v2649_v27  ;;  %v9504_v27 = vld [vmem:[#allocation8 + $0x60] ss:$8 sps:$4 sm:$0xff]  }
 0x481   :  { %2797 = vmatpush1.bf16.msra.mxu1 %v2648_v25  ;;  %v9501_v25 = vld [vmem:[#allocation8 + $0x50] ss:$8 sps:$4 sm:$0xff]  }
 0x482   :  { %v2553_v28 = vpop.f32.mrb[20].mxu1 }
 0x483   :  { %v2555_v29 = vpop.f32.mrb[21].mxu1 }
 0x484   :  { %v2557_v37 = vpop.f32.mrb[22].mxu1 }
 0x485   :  { %v2650_v30 = vpack.c.bf16 %v2557_v37, %v2553_v28  ;;  %v2559_v31 = vpop.f32.mrb[23].mxu1  ;;  %v9505_v28 = vld [vmem:[#allocation8 + $0x74] ss:$8 sps:$4 sm:$0xff]   ;;  %v9508_v37 = vld [vmem:[#allocation8 + $0x84] ss:$8 sps:$4 sm:$0xff]  }
 0x486   :  { %v2651_v32 = vpack.c.bf16 %v2559_v31, %v2555_v29  ;;  %v9507_v29 = vld [vmem:[#allocation8 + $0x70] ss:$8 sps:$4 sm:$0xff]  }
 0x487   :  { %v9526_v31 = vld [vmem:[%s12502_s4 + $0xe0] ss:$8 sps:$4 sm:$0xff]  }
 0x488   :  { %2798 = vmatprep.subr.bf16.mxu1 %v2651_v32  ;;  %v9528_v32 = vld [vmem:[%s12502_s4 + $0xe4] ss:$8 sps:$4 sm:$0xff]  }
 0x489   :  { %2799 = vmatpush1.bf16.msra.mxu1 %v2650_v30  ;;  %v9510_v30 = vld [vmem:[#allocation8 + $0x80] ss:$8 sps:$4 sm:$0xff]  }
 0x48a   :  { %v2563_v38 = vpop.f32.mrb[24].mxu1 }
 0x48b   :  { %v2565_v33 = vpop.f32.mrb[25].mxu1 }
 0x48c   :  { %v2567_v35 = vpop.f32.mrb[26].mxu1 }
 0x48d   :  { %v2652_v39 = vpack.c.bf16 %v2567_v35, %v2563_v38  ;;  %v2569_v40 = vpop.f32.mrb[27].mxu1  ;;  %v9529_v38 = vld [vmem:[%s12502_s4 + $0xf0] ss:$8 sps:$4 sm:$0xff]   ;;  %v9534_v35 = vld [vmem:[%s12502_s4 + $0x104] ss:$8 sps:$4 sm:$0xff]  }
 0x48e   :  { %v2653_v41 = vpack.c.bf16 %v2569_v40, %v2565_v33  ;;  %v9531_v33 = vld [vmem:[%s12502_s4 + $0xf4] ss:$8 sps:$4 sm:$0xff]  }
 0x48f   :  { %v9537_v40 = vld [vmem:[%s12502_s4 + $0x114] ss:$8 sps:$4 sm:$0xff]  }
 0x490   :  { %2800 = vmatprep.subr.bf16.mxu1 %v2653_v41  ;;  %v9535_v41 = vld [vmem:[%s12502_s4 + $0x110] ss:$8 sps:$4 sm:$0xff]  }
 0x491   :  { %2801 = vmatpush1.bf16.msra.mxu1 %v2652_v39  ;;  %v9532_v39 = vld [vmem:[%s12502_s4 + $0x100] ss:$8 sps:$4 sm:$0xff]  }
 0x492   :  { %v2573_v42 = vpop.f32.mrb[28].mxu1 }
 0x493   :  { %v2575_v43 = vpop.f32.mrb[29].mxu1 }
 0x494   :  { %v2577_v44 = vpop.f32.mrb[30].mxu1 }
 0x495   :  { %v2654_v45 = vpack.c.bf16 %v2577_v44, %v2573_v42  ;;  %v2579_v46 = vpop.f32.mrb[31].mxu1  ;;  %v9540_v42 = vld [vmem:[%s12502_s4 + $0x4] ss:$8 sps:$4 sm:$0xff]  }
 0x496   :  { %v2655_v47 = vpack.c.bf16 %v2579_v46, %v2575_v43  ;;  %v2901_v43 = vld [vmem:[%s12503_s0] sm:$0x3] }
 0x497   :  { %v10780_v44 = vrot.slane %v2901_v43, %v10615_v34 }
 0x498   :  { %2802 = vmatprep.subr.bf16.mxu1 %v2655_v47  ;;  %v2949_v47 = vld [vmem:[#allocation10] sm:$0xff] }
 0x499   :  { %2803 = vmatpush1.bf16.msra.mxu1 %v2654_v45  ;;  %v10783_v45 = vrot.slane %v2901_v43, %v10620_v36 }
 0x49a   :  { %v2583_v48 = vpop.f32.mrb[32].mxu1 }
 0x49b   :  { %v2585_v49 = vpop.f32.mrb[33].mxu1 }
 0x49c   :  { %v2587_v50 = vpop.f32.mrb[34].mxu1 }
 0x49d   :  { %v2656_v51 = vpack.c.bf16 %v2587_v50, %v2583_v48  ;;  %v2589_v52 = vpop.f32.mrb[35].mxu1  ;;  %v2950_v50 = vld [vmem:[#allocation10 + $0x8] sm:$0xff] }
 0x49e   :  { %v2657_v53 = vpack.c.bf16 %v2589_v52, %v2585_v49 }
 0x4a0   :  { %2804 = vmatprep.subr.bf16.mxu1 %v2657_v53  ;;  %v2951_v53 = vld [vmem:[#allocation10 + $0x10] sm:$0xff] }
 0x4a1   :  { %2805 = vmatpush1.bf16.msra.mxu1 %v2656_v51 }
 0x4a2   :  { %v2593_v54 = vpop.f32.mrb[36].mxu1 }
 0x4a3   :  { %v2595_v55 = vpop.f32.mrb[37].mxu1 }
 0x4a4   :  { %v2597_v56 = vpop.f32.mrb[38].mxu1 }
 0x4a5   :  { %v2658_v57 = vpack.c.bf16 %v2597_v56, %v2593_v54  ;;  %v2599_v58 = vpop.f32.mrb[39].mxu1 }
 0x4a6   :  { %v2659_v59 = vpack.c.bf16 %v2599_v58, %v2595_v55 }
 0x4a8   :  { %2806 = vmatprep.subr.bf16.mxu1 %v2659_v59 }
 0x4a9   :  { %2807 = vmatpush1.bf16.msra.mxu1 %v2658_v57  ;;  %v2952_v57 = vld [vmem:[#allocation10 + $0x18] sm:$0xff] }
 0x4aa   :  { %v2603_v60 = vpop.f32.mrb[40].mxu1 }
 0x4ab   :  { %v2605_v61 = vpop.f32.mrb[41].mxu1 }
 0x4ac   :  { %v2607_v62 = vpop.f32.mrb[42].mxu1 }
 0x4ad   :  { %v2660_v63 = vpack.c.bf16 %v2607_v62, %v2603_v60  ;;  %v2609_v2 = vpop.f32.mrb[43].mxu1 }
 0x4ae   :  { %v2661_v3 = vpack.c.bf16 %v2609_v2, %v2605_v61 }
 0x4af   :  { %v2773_v5 = vsel %vm2771_vm5, %v2660_v63, 0  ;;  %v2953_v63 = vld [vmem:[#allocation10 + $0x20] sm:$0xff] }
 0x4b0   :  { %8154 = vmatprep.subr.msk.bf16.mxu1 %vm2771_vm5, %v2661_v3 }
 0x4b1   :  { %2809 = vmatpush1.bf16.msra.mxu1 %v2773_v5 }
 0x4b2   :  { %3426 = vmatprep.subr.bf16.mxu1 %v9513_v4  ;;  %v2954_v4 = vld [vmem:[#allocation10 + $0x28] sm:$0xff] }
 0x4b4   :  { %2811 = vmatmul.mubr.bf16.vlgmr.msra.gmra.mrb[44].mxu1 %v9484_v6 }
 0x4b5   :  { %8156 = vmatprep.mubr.msk.bf16.mxu1 %vm2743_vm4, %v9487_v7  ;;  %3427 = vmatpush1.bf16.msra.mxu1 %v9511_v8  ;;  %v2955_v7 = vld [vmem:[#allocation10 + $0x30] sm:$0xff] }
 0x4b6   :  { %3428 = vmatprep.subr.bf16.mxu1 %v9516_v9 }
 0x4b9   :  { %3429 = vmatpush1.bf16.msra.mxu1 %v9514_v10 }
 0x4ba   :  { %3430 = vmatprep.subr.bf16.mxu1 %v9519_v11  ;;  %v2956_v11 = vld [vmem:[#allocation10 + $0x38] sm:$0xff] }
 0x4bc   :  { %2821 = vmatmul.mubr.bf16.gmra.mrb[48].mxu1 %v9489_v12 }
 0x4bd   :  { %8157 = vmatprep.mubr.msk.bf16.mxu1 %vm2743_vm4, %v9490_v13  ;;  %3431 = vmatpush1.bf16.msra.mxu1 %v9517_v14 }
 0x4be   :  { %3432 = vmatprep.subr.bf16.mxu1 %v9522_v15 }
 0x4c1   :  { %3433 = vmatpush1.bf16.msra.mxu1 %v9520_v16 }
 0x4c2   :  { %3434 = vmatprep.subr.bf16.mxu1 %v9525_v17 }
 0x4c4   :  { %2831 = vmatmul.mubr.bf16.gmra.mrb[52].mxu1 %v9492_v18 }
 0x4c5   :  { %8158 = vmatprep.mubr.msk.bf16.mxu1 %vm2743_vm4, %v9493_v19  ;;  %3435 = vmatpush1.bf16.msra.mxu1 %v9523_v20 }
 0x4c6   :  { %3436 = vmatprep.subr.bf16.mxu1 %v9528_v32 }
 0x4c9   :  { %3437 = vmatpush1.bf16.msra.mxu1 %v9526_v31 }
 0x4ca   :  { %3438 = vmatprep.subr.bf16.mxu1 %v9531_v33 }
 0x4cc   :  { %2841 = vmatmul.mubr.bf16.gmra.mrb[56].mxu1 %v9495_v21 }
 0x4cd   :  { %8159 = vmatprep.mubr.msk.bf16.mxu1 %vm2743_vm4, %v9496_v22  ;;  %3439 = vmatpush1.bf16.msra.mxu1 %v9529_v38  ;;  %v2957_v22 = vld [vmem:[#allocation10 + $0x40] sm:$0xff]  ;;  %v2960_v38 = vld [vmem:[#allocation10 + $0x58] sm:$0xff] }
 0x4ce   :  { %3440 = vmatprep.subr.bf16.mxu1 %v9534_v35 }
 0x4d1   :  { %3441 = vmatpush1.bf16.msra.mxu1 %v9532_v39 }
 0x4d2   :  { %3442 = vmatprep.subr.bf16.mxu1 %v9537_v40 }
 0x4d4   :  { %2851 = vmatmul.mubr.bf16.gmra.mrb[60].mxu1 %v9498_v23 }
 0x4d5   :  { %8160 = vmatprep.mubr.msk.bf16.mxu1 %vm2743_vm4, %v9499_v24  ;;  %3443 = vmatpush1.bf16.msra.mxu1 %v9535_v41 }
 0x4d6   :  { %3659 = vmatprep.subr.bf16.mxu1 %v9540_v42 }
 0x4dc   :  { %2861 = vmatmul.mubr.bf16.gmra.mrb[64].mxu1 %v9501_v25 }
 0x4dd   :  { %8161 = vmatprep.mubr.msk.bf16.mxu1 %vm2743_vm4, %v9502_v26  ;;  %v2958_v26 = vld [vmem:[#allocation10 + $0x48] sm:$0xff] }
 0x4e4   :  { %2871 = vmatmul.mubr.bf16.gmra.mrb[68].mxu1 %v9504_v27 }
 0x4e5   :  { %8162 = vmatprep.mubr.msk.bf16.mxu1 %vm2743_vm4, %v9505_v28 }
 0x4ec   :  { %2881 = vmatmul.mubr.bf16.gmra.mrb[72].mxu1 %v9507_v29 }
 0x4ed   :  { %8163 = vmatprep.mubr.msk.bf16.mxu1 %vm2743_vm4, %v9508_v37  ;;  %v2959_v37 = vld [vmem:[#allocation10 + $0x50] sm:$0xff] }
 0x4f4   :  { %2891 = vmatmul.mubr.bf16.gmra.mrb[76].mxu1 %v9510_v30 }
 0x587   :  { %v2812_v46 = vpop.f32.mrb[44].mxu1 }
 0x588   :  { %v2913_v48 = vmul.f32 %v10780_v44, %v2812_v46  ;;  %v2814_v49 = vpop.f32.mrb[45].mxu1 }
 0x589   :  { %v2914_v51 = vmul.f32 %v10783_v45, %v2814_v49  ;;  %v2816_v52 = vpop.f32.mrb[46].mxu1 }
 0x58a   :  { %v10787_v54 = vadd.f32 %v2949_v47, %v2913_v48  ;;  %v2915_v55 = vmul.f32 %v10780_v44, %v2816_v52  ;;  %v2818_v56 = vpop.f32.mrb[47].mxu1 }
 0x58b   :  { %v2986_v58 = vadd.f32 %v2950_v50, %v2914_v51  ;;  %v2916_v59 = vmul.f32 %v10783_v45, %v2818_v56  ;;  %v2961_v56 = vld [vmem:[#allocation10 + $0x60] sm:$0xff] }
 0x58c   :  { %3021 = vst [vmem:[#allocation3] sm:$0xff] %v10787_v54  ;;  %v10792_v60 = vadd.f32 %v2951_v53, %v2915_v55 }
 0x58d   :  { %3023 = vst.msk [vmem:[#allocation3 + $0x8] sm:$0xff] %vm3022_vm6, %v2986_v58  ;;  %v2988_v61 = vadd.f32 %v2952_v57, %v2916_v59 }
 0x58e   :  { %3024 = vst [vmem:[#allocation3 + $0x10] sm:$0xff] %v10792_v60 }
 0x58f   :  { %3025 = vst.msk [vmem:[#allocation3 + $0x18] sm:$0xff] %vm3022_vm6, %v2988_v61  ;;  %v2822_v62 = vpop.f32.mrb[48].mxu1  ;;  %v2962_v61 = vld [vmem:[#allocation10 + $0x68] sm:$0xff] }
 0x590   :  { %v2917_v2 = vmul.f32 %v10780_v44, %v2822_v62  ;;  %v2824_v3 = vpop.f32.mrb[49].mxu1 }
 0x591   :  { %v2918_v5 = vmul.f32 %v10783_v45, %v2824_v3  ;;  %v2826_v6 = vpop.f32.mrb[50].mxu1 }
 0x592   :  { %v2989_v8 = vadd.f32 %v2953_v63, %v2917_v2  ;;  %v2919_v9 = vmul.f32 %v10780_v44, %v2826_v6  ;;  %v2828_v10 = vpop.f32.mrb[51].mxu1 }
 0x593   :  { %v2990_v12 = vadd.f32 %v2954_v4, %v2918_v5  ;;  %v2920_v13 = vmul.f32 %v10783_v45, %v2828_v10  ;;  %v3130_v14 = vld [vmem:[#allocation3] sm:$0xfe]  ;;  %v2963_v4 = vld [vmem:[#allocation10 + $0x70] sm:$0xff] }
 0x594   :  { %v2991_v15 = vadd.f32 %v2955_v7, %v2919_v9  ;;  %v3134_v16 = vpack.c.bf16 %v10792_v60, %v3130_v14  ;;  %v3131_v19 = vld [vmem:[#allocation3 + $0x8] sm:$0xfe] }
 0x595   :  { %3027 = vst.msk [vmem:[#allocation3 + $0x28] sm:$0xff] %vm3022_vm6, %v2990_v12  ;;  %v2992_v17 = vadd.f32 %v2956_v11, %v2920_v13  ;;  %v4148_v47 = vld [vmem:[#allocation3 + $0x8] sm:$0xf8]  ;;  %v2964_v11 = vld [vmem:[#allocation10 + $0x78] sm:$0xff] }
 0x596   :  { %v10803_v18 = vld [vmem:[#allocation3 + $0x18] sm:$0xff]  ;;  %v10805_v20 = vpack.c.bf16 %v2991_v15, %v2989_v8  ;;  %v3161_v27 = vshll.u32 %v3134_v16, 16  ;;  %v3159_v51 = vshrl.u32 %v3134_v16, 16 }
 0x597   :  { %3029 = vst.msk [vmem:[#allocation3 + $0x38] sm:$0xff] %vm3022_vm6, %v2992_v17  ;;  %v2832_v21 = vpop.f32.mrb[52].mxu1  ;;  %v3135_v23 = vpack.c.bf16 %v10803_v18, %v3131_v19  ;;  %v4152_v53 = vpack.c.bf16 %v10803_v18, %v4148_v47 }
 0x598   :  { %v2921_v24 = vmul.f32 %v10780_v44, %v2832_v21  ;;  %v2834_v25 = vpop.f32.mrb[53].mxu1  ;;  %v3163_v41 = vrot.slane %v3161_v27, 1  ;;  %v3166_v43 = vshll.u32 %v10805_v20, 16  ;;  %v3182_v46 = vshrl.u32 %v10805_v20, 16  ;;  %v9538_v21 = vld [vmem:[%s12502_s4] ss:$8 sps:$4 sm:$0xff]  }
 0x599   :  { %v2922_v28 = vmul.f32 %v10783_v45, %v2834_v25  ;;  %v2836_v29 = vpop.f32.mrb[54].mxu1  ;;  %v3173_v33 = vshll.u32 %v3135_v23, 16  ;;  %v3171_v62 = vshrl.u32 %v3135_v23, 16  ;;  %v4188_v13 = vshrl.u32 %v4152_v53, 16  ;;  %v9543_v27 = vld [vmem:[%s12502_s4 + $0x14] ss:$8 sps:$4 sm:$0xff]  }
 0x59a   :  { %v2993_v30 = vadd.f32 %v2957_v22, %v2921_v24  ;;  %v2923_v31 = vmul.f32 %v10780_v44, %v2836_v29  ;;  %v2838_v32 = vpop.f32.mrb[55].mxu1  ;;  %v3164_v63 = vor.u32 %v3163_v41, %v3159_v51  ;;  %v3168_v6 = vrot.slane %v3166_v43, 1 }
 0x59b   :  { %v2994_v35 = vadd.f32 %v2958_v26, %v2922_v28  ;;  %v2924_v39 = vmul.f32 %v10783_v45, %v2838_v32  ;;  %v3175_v50 = vrot.slane %v3173_v33, 1  ;;  %v4183_v7 = vrot.slane %v3182_v46, 1  ;;  %v2966_v33 = vld [vmem:[#allocation10 + $0x88] sm:$0xff] }
 0x59c   :  { %v2995_v40 = vadd.f32 %v2959_v37, %v2923_v31  ;;  %v3063_v48 = vld [vmem:[#allocation3 + $0x28] sm:$0xff]  ;;  %v4184_v17 = vrot.slane %v3166_v43, 2  ;;  %v4191_v23 = vshll.u32 %v4152_v53, 16  ;;  %v3169_v28 = vsel %vm3157_vm7, %v3164_v63, %v3168_v6  ;;  %v9541_v43 = vld [vmem:[%s12502_s4 + $0x10] ss:$8 sps:$4 sm:$0xff]  }
 0x59d   :  { %3031 = vst.msk [vmem:[#allocation3 + $0x48] sm:$0xff] %vm3022_vm6, %v2994_v35  ;;  %v2996_v42 = vadd.f32 %v2960_v38, %v2924_v39  ;;  %v3176_v12 = vor.u32 %v3175_v50, %v3171_v62  ;;  %v2965_v38 = vld [vmem:[#allocation10 + $0x80] sm:$0xff]  ;;  %v4190_v39 = vrot.slane %v4188_v13, 1  ;;  %v2967_v53 = vld [vmem:[#allocation10 + $0x90] sm:$0xff] }
 0x59e   :  { %v3065_v49 = vld [vmem:[#allocation3 + $0x38] sm:$0xff]  ;;  %v10816_v52 = vpack.c.bf16 %v2995_v40, %v2993_v30  ;;  %v10847_v40 = vor.u32 %v4184_v17, %v4183_v7  ;;  %v4193_v47 = vrot.slane %v4191_v23, 2 }
 0x59f   :  { %3033 = vst.msk [vmem:[#allocation3 + $0x58] sm:$0xff] %vm3022_vm6, %v2996_v42  ;;  %v2842_v55 = vpop.f32.mrb[56].mxu1  ;;  %v10820_v57 = vpack.c.bf16 %v3065_v49, %v3063_v48 }
 0x5a0   :  { %v2925_v58 = vmul.f32 %v10780_v44, %v2842_v55  ;;  %v2844_v59 = vpop.f32.mrb[57].mxu1  ;;  %v3186_v26 = vshll.u32 %v10816_v52, 16  ;;  %v3198_v31 = vshrl.u32 %v10816_v52, 16 }
 0x5a1   :  { %v2926_v2 = vmul.f32 %v10783_v45, %v2844_v59  ;;  %v2846_v3 = vpop.f32.mrb[58].mxu1  ;;  %v3178_v5 = vshll.u32 %v10820_v57, 16  ;;  %v3190_v22 = vshrl.u32 %v10820_v57, 16  ;;  %v9546_v59 = vld [vmem:[%s12502_s4 + $0x24] ss:$8 sps:$4 sm:$0xff]  }
 0x5a2   :  { %v2997_v8 = vadd.f32 %v2961_v56, %v2925_v58  ;;  %v2927_v9 = vmul.f32 %v10780_v44, %v2846_v3  ;;  %v2848_v10 = vpop.f32.mrb[59].mxu1  ;;  %v3184_v56 = vor.u32 %v3182_v46, %v3168_v6  ;;  %v3188_v58 = vrot.slane %v3186_v26, 1 }
 0x5a3   :  { %v2998_v14 = vadd.f32 %v2962_v61, %v2926_v2  ;;  %v2928_v15 = vmul.f32 %v10783_v45, %v2848_v10  ;;  %v3180_v16 = vrot.slane %v3178_v5, 1  ;;  %v4195_v48 = vrot.slane %v3190_v22, 1  ;;  %v2968_v2 = vld [vmem:[#allocation10 + $0x98] sm:$0xff]  ;;  %v9544_v10 = vld [vmem:[%s12502_s4 + $0x20] ss:$8 sps:$4 sm:$0xff]  }
 0x5a4   :  { %v2999_v19 = vadd.f32 %v2963_v4, %v2927_v9  ;;  %v3067_v29 = vld [vmem:[#allocation3 + $0x48] sm:$0xff]  ;;  %v4196_v49 = vrot.slane %v3178_v5, 2  ;;  %v4199_v4 = vrot.slane %v3198_v31, 1  ;;  %v4200_v46 = vrot.slane %v3186_v26, 2 }
 0x5a5   :  { %3035 = vst.msk [vmem:[#allocation3 + $0x68] sm:$0xff] %vm3022_vm6, %v2998_v14  ;;  %v3000_v24 = vadd.f32 %v2964_v11, %v2928_v15  ;;  %v3181_v25 = vsel %vm3157_vm7, %v3176_v12, %v3180_v16  ;;  %v3192_v3 = vor.u32 %v3190_v22, %v3180_v16  ;;  %v4194_v11 = vor.u32 %v4193_v47, %v4190_v39  ;;  %v9549_v15 = vld [vmem:[%s12502_s4 + $0x34] ss:$8 sps:$4 sm:$0xff]   ;;  %v9552_v47 = vld [vmem:[%s12502_s4 + $0x44] ss:$8 sps:$4 sm:$0xff]  }
 0x5a6   :  { %8200 = vmatprep.mubr.msk.bf16.mxu1 %vm3022_vm6, %v3181_v25  ;;  %v3069_v37 = vld [vmem:[#allocation3 + $0x58] sm:$0xff]  ;;  %v10841_v30 = vpack.c.bf16 %v2999_v19, %v2997_v8  ;;  %v10868_v12 = vor.u32 %v4196_v49, %v4195_v48  ;;  %v3189_v16 = vsel %vm3157_vm7, %v3184_v56, %v3188_v58  ;;  %v2969_v25 = vld [vmem:[#allocation10 + $0xa0] sm:$0xff] }
 0x5a7   :  { %3037 = vst.msk [vmem:[#allocation3 + $0x78] sm:$0xff] %vm3022_vm6, %v3000_v24  ;;  %v2852_v32 = vpop.f32.mrb[60].mxu1  ;;  %3459 = vmatmul.mubr.bf16.vlgmr.msra.gmra.mrb[80].mxu1 %v3169_v28  ;;  %v10845_v35 = vpack.c.bf16 %v3069_v37, %v3067_v29  ;;  %v2970_v37 = vld [vmem:[#allocation10 + $0xa8] sm:$0xff] }
 0x5a8   :  { %v2929_v41 = vmul.f32 %v10780_v44, %v2852_v32  ;;  %v2854_v42 = vpop.f32.mrb[61].mxu1  ;;  %3660 = vmatpush1.bf16.msra.mxu1 %v9538_v21  ;;  %v3202_v21 = vshll.u32 %v10841_v30, 16  ;;  %v10882_v23 = vsel %vm4174_vm8, %v4194_v11, %v10868_v12  ;;  %v9547_v32 = vld [vmem:[%s12502_s4 + $0x30] ss:$8 sps:$4 sm:$0xff]  }
 0x5a9   :  { %v2930_v50 = vmul.f32 %v10783_v45, %v2854_v42  ;;  %v2856_v51 = vpop.f32.mrb[62].mxu1  ;;  %v3194_v55 = vshll.u32 %v10845_v35, 16  ;;  %3661 = vmatprep.subr.bf16.mxu1 %v9543_v27  ;;  %v3206_v9 = vshrl.u32 %v10845_v35, 16  ;;  %v10887_v27 = vor.u32 %v4200_v46, %v4199_v4  ;;  %v2971_v42 = vld [vmem:[#allocation10 + $0xb0] sm:$0xff]  ;;  %v9550_v4 = vld [vmem:[%s12502_s4 + $0x40] ss:$8 sps:$4 sm:$0xff]  }
 0x5aa   :  { %v3001_v61 = vadd.f32 %v2965_v38, %v2929_v41  ;;  %v2931_v62 = vmul.f32 %v10780_v44, %v2856_v51  ;;  %v2858_v63 = vpop.f32.mrb[63].mxu1  ;;  %v2972_v51 = vld [vmem:[#allocation10 + $0xb8] sm:$0xff] }
 0x5ab   :  { %v3002_v5 = vadd.f32 %v2966_v33, %v2930_v50  ;;  %v2932_v7 = vmul.f32 %v10783_v45, %v2858_v63  ;;  %v3196_v8 = vrot.slane %v3194_v55, 1  ;;  %v4203_v38 = vrot.slane %v3206_v9, 1 }
 0x5ac   :  { %v3003_v6 = vadd.f32 %v2967_v53, %v2931_v62  ;;  %3662 = vmatpush1.bf16.msra.mxu1 %v9541_v43  ;;  %v3071_v17 = vld [vmem:[#allocation3 + $0x68] sm:$0xff]  ;;  %v4204_v33 = vrot.slane %v3194_v55, 2  ;;  %v3200_v53 = vor.u32 %v3198_v31, %v3188_v58  ;;  %v3204_v55 = vrot.slane %v3202_v21, 1 }
 0x5ad   :  { %3039 = vst.msk [vmem:[#allocation3 + $0x88] sm:$0xff] %vm3022_vm6, %v3002_v5  ;;  %v3004_v13 = vadd.f32 %v2968_v2, %v2932_v7  ;;  %v3197_v14 = vsel %vm3157_vm7, %v3192_v3, %v3196_v8  ;;  %3663 = vmatprep.subr.bf16.mxu1 %v9546_v59  ;;  %v3214_v3 = vshrl.u32 %v10841_v30, 16  ;;  %v10920_v46 = vsel %vm4174_vm8, %v10847_v40, %v10887_v27 }
 0x5ae   :  { %8201 = vmatprep.mubr.msk.bf16.mxu1 %vm3022_vm6, %v3197_v14  ;;  %v3073_v19 = vld [vmem:[#allocation3 + $0x78] sm:$0xff]  ;;  %v10878_v22 = vpack.c.bf16 %v3003_v6, %v3001_v61  ;;  %v3208_v61 = vor.u32 %v3206_v9, %v3196_v8  ;;  %v10909_v5 = vor.u32 %v4204_v33, %v4203_v38  ;;  %v3205_v6 = vsel %vm3157_vm7, %v3200_v53, %v3204_v55 }
 0x5af   :  { %3041 = vst.msk [vmem:[#allocation3 + $0x98] sm:$0xff] %vm3022_vm6, %v3004_v13  ;;  %v2862_v24 = vpop.f32.mrb[64].mxu1  ;;  %3469 = vmatmul.mubr.bf16.gmra.mrb[84].mxu1 %v3189_v16  ;;  %v10885_v26 = vpack.c.bf16 %v3073_v19, %v3071_v17  ;;  %v9555_v8 = vld [vmem:[%s12502_s4 + $0x54] ss:$8 sps:$4 sm:$0xff]   ;;  %v2973_v16 = vld [vmem:[#allocation10 + $0xc0] sm:$0xff]  ;;  %v2974_v17 = vld [vmem:[#allocation10 + $0xc8] sm:$0xff] }
 0x5b0   :  { %v2933_v28 = vmul.f32 %v10780_v44, %v2862_v24  ;;  %v2864_v29 = vpop.f32.mrb[65].mxu1  ;;  %3664 = vmatpush1.bf16.msra.mxu1 %v9544_v10  ;;  %v3218_v7 = vshll.u32 %v10878_v22, 16  ;;  %v3230_v13 = vshrl.u32 %v10878_v22, 16  ;;  %v10930_v14 = vsel %vm4174_vm8, %v10868_v12, %v10909_v5  ;;  %v2975_v19 = vld [vmem:[#allocation10 + $0xd0] sm:$0xff] }
 0x5b1   :  { %v2934_v39 = vmul.f32 %v10783_v45, %v2864_v29  ;;  %v2866_v41 = vpop.f32.mrb[66].mxu1  ;;  %v3210_v43 = vshll.u32 %v10885_v26, 16  ;;  %3665 = vmatprep.subr.bf16.mxu1 %v9549_v15  ;;  %v3222_v2 = vshrl.u32 %v10885_v26, 16  ;;  %v9553_v29 = vld [vmem:[%s12502_s4 + $0x50] ss:$8 sps:$4 sm:$0xff]  }
 0x5b2   :  { %v3005_v48 = vadd.f32 %v2969_v25, %v2933_v28  ;;  %v2935_v49 = vmul.f32 %v10780_v44, %v2866_v41  ;;  %v2868_v50 = vpop.f32.mrb[67].mxu1  ;;  %v10941_v41 = vrot.slane %v3218_v7, 1  ;;  %v4215_v53 = vrot.slane %v3230_v13, 1 }
 0x5b3   :  { %v3006_v56 = vadd.f32 %v2970_v37, %v2934_v39  ;;  %v2936_v59 = vmul.f32 %v10783_v45, %v2868_v50  ;;  %v3212_v62 = vrot.slane %v3210_v43, 1  ;;  %v4211_v37 = vrot.slane %v3222_v2, 1  ;;  %v2976_v50 = vld [vmem:[#allocation10 + $0xd8] sm:$0xff] }
 0x5b4   :  { %v3007_v63 = vadd.f32 %v2971_v42, %v2935_v49  ;;  %3666 = vmatpush1.bf16.msra.mxu1 %v9547_v32  ;;  %v3075_v9 = vld [vmem:[#allocation3 + $0x88] sm:$0xff]  ;;  %v4212_v12 = vrot.slane %v3210_v43, 2  ;;  %v4207_v32 = vrot.slane %v3214_v3, 1 }
 0x5b5   :  { %3043 = vst.msk [vmem:[#allocation3 + $0xa8] sm:$0xff] %vm3022_vm6, %v3006_v56  ;;  %v3008_v31 = vadd.f32 %v2972_v51, %v2936_v59  ;;  %v3213_v58 = vsel %vm3157_vm7, %v3208_v61, %v3212_v62  ;;  %3667 = vmatprep.subr.bf16.mxu1 %v9552_v47  ;;  %v9558_v42 = vld [vmem:[%s12502_s4 + $0x64] ss:$8 sps:$4 sm:$0xff]   ;;  %v4208_v47 = vrot.slane %v3202_v21, 2  ;;  %v3224_v51 = vor.u32 %v3222_v2, %v3212_v62  ;;  %v9556_v21 = vld [vmem:[%s12502_s4 + $0x60] ss:$8 sps:$4 sm:$0xff]  }
 0x5b6   :  { %8202 = vmatprep.mubr.msk.bf16.mxu1 %vm3022_vm6, %v3213_v58  ;;  %v3077_v10 = vld [vmem:[#allocation3 + $0x98] sm:$0xff]  ;;  %v10924_v11 = vpack.c.bf16 %v3007_v63, %v3005_v48  ;;  %v4216_v63 = vrot.slane %v3218_v7, 2 }
 0x5b7   :  { %3045 = vst.msk [vmem:[#allocation3 + $0xb8] sm:$0xff] %vm3022_vm6, %v3008_v31  ;;  %v2872_v15 = vpop.f32.mrb[68].mxu1  ;;  %3479 = vmatmul.mubr.bf16.gmra.mrb[88].mxu1 %v3205_v6  ;;  %v10933_v24 = vpack.c.bf16 %v3077_v10, %v3075_v9  ;;  %v3216_v31 = vor.u32 %v3214_v3, %v3204_v55  ;;  %v9561_v7 = vld [vmem:[%s12502_s4 + $0x74] ss:$8 sps:$4 sm:$0xff]   ;;  %v4209_v55 = vor.u32 %v4208_v47, %v4207_v32  ;;  %v2978_v32 = vld [vmem:[#allocation10 + $0xe8] sm:$0xff] }
 0x5b8   :  { %v2937_v25 = vmul.f32 %v10780_v44, %v2872_v15  ;;  %v2874_v28 = vpop.f32.mrb[69].mxu1  ;;  %3668 = vmatpush1.bf16.msra.mxu1 %v9550_v4  ;;  %v3234_v10 = vshll.u32 %v10924_v11, 16 }
 0x5b9   :  { %v2938_v38 = vmul.f32 %v10783_v45, %v2874_v28  ;;  %v2876_v33 = vpop.f32.mrb[70].mxu1  ;;  %v3226_v39 = vshll.u32 %v10933_v24, 16  ;;  %3669 = vmatprep.subr.bf16.mxu1 %v9555_v8  ;;  %v3238_v58 = vshrl.u32 %v10933_v24, 16  ;;  %v10956_v8 = vor.u32 %v4212_v12, %v4211_v37 }
 0x5ba   :  { %v3009_v48 = vadd.f32 %v2973_v16, %v2937_v25  ;;  %v2939_v49 = vmul.f32 %v10780_v44, %v2876_v33  ;;  %v2878_v43 = vpop.f32.mrb[71].mxu1  ;;  %v3221_v3 = vsel %vm3157_vm7, %v3216_v31, %v10941_v41  ;;  %v10979_v28 = vsel %vm4174_vm8, %v10887_v27, %v4209_v55 }
 0x5bb   :  { %v3010_v56 = vadd.f32 %v2974_v17, %v2938_v38  ;;  %v2940_v59 = vmul.f32 %v10783_v45, %v2878_v43  ;;  %v3228_v61 = vrot.slane %v3226_v39, 1  ;;  %v10972_v16 = vsel %vm4174_vm8, %v10909_v5, %v10956_v8  ;;  %v9559_v5 = vld [vmem:[%s12502_s4 + $0x70] ss:$8 sps:$4 sm:$0xff]   ;;  %v9564_v43 = vld [vmem:[%s12502_s4 + $0x84] ss:$8 sps:$4 sm:$0xff]  }
 0x5bc   :  { %v3011_v4 = vadd.f32 %v2975_v19, %v2939_v49  ;;  %3670 = vmatpush1.bf16.msra.mxu1 %v9553_v29  ;;  %v3079_v6 = vld [vmem:[#allocation3 + $0xa8] sm:$0xff]  ;;  %v2977_v19 = vld [vmem:[#allocation10 + $0xe0] sm:$0xff]  ;;  %v10981_v29 = vor.u32 %v4216_v63, %v4215_v53  ;;  %v4219_v38 = vrot.slane %v3238_v58, 1  ;;  %v4220_v33 = vrot.slane %v3226_v39, 2 }
 0x5bd   :  { %3047 = vst.msk [vmem:[#allocation3 + $0xc8] sm:$0xff] %vm3022_vm6, %v3010_v56  ;;  %v3012_v62 = vadd.f32 %v2976_v50, %v2940_v59  ;;  %v3229_v2 = vsel %vm3157_vm7, %v3224_v51, %v3228_v61  ;;  %3671 = vmatprep.subr.bf16.mxu1 %v9558_v42  ;;  %v3246_v49 = vshrl.u32 %v10924_v11, 16  ;;  %v2980_v56 = vld [vmem:[#allocation10 + $0xf8] sm:$0xff]  ;;  %v3240_v59 = vor.u32 %v3238_v58, %v3228_v61  ;;  %v9562_v61 = vld [vmem:[%s12502_s4 + $0x80] ss:$8 sps:$4 sm:$0xff]  }
 0x5be   :  { %8203 = vmatprep.mubr.msk.bf16.mxu1 %vm3022_vm6, %v3229_v2  ;;  %v3081_v9 = vld [vmem:[#allocation3 + $0xb8] sm:$0xff]  ;;  %v10967_v15 = vpack.c.bf16 %v3011_v4, %v3009_v48  ;;  %v2979_v48 = vld [vmem:[#allocation10 + $0xf0] sm:$0xff]  ;;  %v3236_v39 = vrot.slane %v3234_v10, 1  ;;  %v3232_v2 = vor.u32 %v3230_v13, %v10941_v41  ;;  %v4221_v58 = vor.u32 %v4220_v33, %v4219_v38  ;;  %v9567_v13 = vld [vmem:[%s12502_s4 + $0x124] ss:$8 sps:$4 sm:$0xff]  }
 0x5bf   :  { %3049 = vst.msk [vmem:[#allocation3 + $0xd8] sm:$0xff] %vm3022_vm6, %v3012_v62  ;;  %v2882_v17 = vpop.f32.mrb[72].mxu1  ;;  %3489 = vmatmul.mubr.bf16.gmra.mrb[92].mxu1 %v3221_v3  ;;  %v10975_v25 = vpack.c.bf16 %v3081_v9, %v3079_v6  ;;  %v11013_v41 = vsel %vm4174_vm8, %v4209_v55, %v10981_v29  ;;  %v2981_v33 = vld [vmem:[#allocation10 + $0x100] sm:$0xff] }
 0x5c0   :  { %v2941_v37 = vmul.f32 %v10780_v44, %v2882_v17  ;;  %v2884_v12 = vpop.f32.mrb[73].mxu1  ;;  %3672 = vmatpush1.bf16.msra.mxu1 %v9556_v21  ;;  %v3250_v21 = vshll.u32 %v10967_v15, 16  ;;  %v3262_v9 = vshrl.u32 %v10967_v15, 16  ;;  %v3237_v17 = vsel %vm3157_vm7, %v3232_v2, %v3236_v39 }
 0x5c1   :  { %v2942_v42 = vmul.f32 %v10783_v45, %v2884_v12  ;;  %v2886_v47 = vpop.f32.mrb[74].mxu1  ;;  %v3242_v27 = vshll.u32 %v10975_v25, 16  ;;  %3673 = vmatprep.subr.bf16.mxu1 %v9561_v7  ;;  %v3254_v7 = vshrl.u32 %v10975_v25, 16  ;;  %v3248_v12 = vor.u32 %v3246_v49, %v3236_v39 }
 0x5c2   :  { %v3013_v50 = vadd.f32 %v2977_v19, %v2941_v37  ;;  %v2943_v51 = vmul.f32 %v10780_v44, %v2886_v47  ;;  %v2888_v53 = vpop.f32.mrb[75].mxu1  ;;  %v3252_v47 = vrot.slane %v3250_v21, 1 }
 0x5c3   :  { %v3014_v63 = vadd.f32 %v2978_v32, %v2942_v42  ;;  %v2944_v4 = vmul.f32 %v10783_v45, %v2888_v53  ;;  %v3244_v31 = vrot.slane %v3242_v27, 1  ;;  %v2982_v53 = vld [vmem:[#allocation10 + $0x108] sm:$0xff] }
 0x5c4   :  { %v3015_v62 = vadd.f32 %v2979_v48, %v2943_v51  ;;  %3674 = vmatpush1.bf16.msra.mxu1 %v9559_v5  ;;  %v3083_v19 = vld [vmem:[#allocation3 + $0xc8] sm:$0xff]  ;;  %v11021_v5 = vsel %vm4174_vm8, %v10956_v8, %v4221_v58  ;;  %v4223_v48 = vrot.slane %v3246_v49, 1  ;;  %v4224_v8 = vrot.slane %v3234_v10, 2 }
 0x5c5   :  { %3051 = vst.msk [vmem:[#allocation3 + $0xe8] sm:$0xff] %vm3022_vm6, %v3014_v63  ;;  %v3016_v3 = vadd.f32 %v2980_v56, %v2944_v4  ;;  %v3245_v6 = vsel %vm3157_vm7, %v3240_v59, %v3244_v31  ;;  %3675 = vmatprep.subr.bf16.mxu1 %v9564_v43  ;;  %v3256_v42 = vor.u32 %v3254_v7, %v3244_v31  ;;  %v4228_v56 = vrot.slane %v3242_v27, 2  ;;  %v2983_v63 = vld [vmem:[#allocation10 + $0x110] sm:$0xff]  ;;  %v2984_v27 = vld [vmem:[#allocation10 + $0x118] sm:$0xff] }
 0x5c6   :  { %8204 = vmatprep.mubr.msk.bf16.mxu1 %vm3022_vm6, %v3245_v6  ;;  %v3085_v37 = vld [vmem:[#allocation3 + $0xd8] sm:$0xff]  ;;  %v11017_v32 = vpack.c.bf16 %v3015_v62, %v3013_v50  ;;  %v4227_v50 = vrot.slane %v3254_v7, 1  ;;  %v4231_v49 = vrot.slane %v3262_v9, 1  ;;  %v4232_v31 = vrot.slane %v3250_v21, 2 }
 0x5c7   :  { %3053 = vst.msk [vmem:[#allocation3 + $0xf8] sm:$0xff] %vm3022_vm6, %v3016_v3  ;;  %v2892_v38 = vpop.f32.mrb[76].mxu1  ;;  %3499 = vmatmul.mubr.bf16.gmra.mrb[96].mxu1 %v3237_v17  ;;  %v11024_v55 = vpack.c.bf16 %v3085_v37, %v3083_v19 }
 0x5c8   :  { %v2945_v43 = vmul.f32 %v10780_v44, %v2892_v38  ;;  %v2894_v51 = vpop.f32.mrb[77].mxu1  ;;  %3676 = vmatpush1.bf16.msra.mxu1 %v9562_v61  ;;  %v3266_v10 = vshll.u32 %v11017_v32, 16  ;;  %v4229_v37 = vor.u32 %v4228_v56, %v4227_v50  ;;  %v3253_v38 = vsel %vm3157_vm7, %v3248_v12, %v3252_v47 }
 0x5c9   :  { %v2946_v59 = vmul.f32 %v10783_v45, %v2894_v51  ;;  %v2896_v39 = vpop.f32.mrb[78].mxu1  ;;  %v3258_v4 = vshll.u32 %v11024_v55, 16  ;;  %3988 = vmatprep.subr.bf16.mxu1 %v9567_v13  ;;  %v3270_v61 = vshrl.u32 %v11024_v55, 16  ;;  %v3278_v13 = vshrl.u32 %v11017_v32, 16 }
 0x5ca   :  { %v11033_v62 = vadd.f32 %v2981_v33, %v2945_v43  ;;  %v2947_v2 = vmul.f32 %v10780_v44, %v2896_v39  ;;  %v2898_v7 = vpop.f32.mrb[79].mxu1  ;;  %v4225_v33 = vor.u32 %v4224_v8, %v4223_v48  ;;  %v11048_v51 = vsel %vm4174_vm8, %v4221_v58, %v4229_v37 }
 0x5cb   :  { %v3018_v3 = vadd.f32 %v2982_v53, %v2946_v59  ;;  %v2948_v6 = vmul.f32 %v10783_v45, %v2898_v7  ;;  %v3260_v17 = vrot.slane %v3258_v4, 1  ;;  %v4235_v53 = vrot.slane %v3270_v61, 1 }
 0x5cc   :  { %v11040_v19 = vadd.f32 %v2983_v63, %v2947_v2  ;;  %v3087_v43 = vld [vmem:[#allocation3 + $0xe8] sm:$0xff]  ;;  %v4236_v59 = vrot.slane %v3258_v4, 2  ;;  %v4233_v50 = vor.u32 %v4232_v31, %v4231_v49  ;;  %v11055_v12 = vsel %vm4174_vm8, %v10981_v29, %v4225_v33 }
 0x5cd   :  { %3055 = vst.msk [vmem:[#allocation3 + $0x108] sm:$0xff] %vm3022_vm6, %v3018_v3  ;;  %v3020_v21 = vadd.f32 %v2984_v27, %v2948_v6  ;;  %v3261_v44 = vsel %vm3157_vm7, %v3256_v42, %v3260_v17  ;;  %v4239_v42 = vrot.slane %v3278_v13, 1  ;;  %v4240_v48 = vrot.slane %v3266_v10, 2 }
 0x5ce   :  { %3056 = vst [vmem:[#allocation3 + $0x110] sm:$0xff] %v11040_v19  ;;  %8205 = vmatprep.mubr.msk.bf16.mxu1 %vm3022_vm6, %v3261_v44  ;;  %v3089_v45 = vld [vmem:[#allocation3 + $0xf8] sm:$0xff]  ;;  %v4237_v8 = vor.u32 %v4236_v59, %v4235_v53  ;;  %v11058_v39 = vsel %vm4174_vm8, %v4225_v33, %v4233_v50  ;;  %v3268_v49 = vrot.slane %v3266_v10, 1  ;;  %v3272_v2 = vor.u32 %v3270_v61, %v3260_v17 }
 0x5cf   :  { %3057 = vst.msk [vmem:[#allocation3 + $0x118] sm:$0xff] %vm3022_vm6, %v3020_v21  ;;  %3509 = vmatmul.mubr.bf16.gmra.mrb[100].mxu1 %v3253_v38  ;;  %v11051_v56 = vpack.c.bf16 %v3089_v45, %v3087_v43  ;;  %v4241_v4 = vor.u32 %v4240_v48, %v4239_v42  ;;  %v3264_v3 = vor.u32 %v3262_v9, %v3252_v47 }
 0x5d0   :  { %v11063_v31 = vsel %vm4174_vm8, %v4229_v37, %v4237_v8 }
 0x5d1   :  { %v3274_v58 = vshll.u32 %v11051_v56, 16  ;;  %v3286_v63 = vshrl.u32 %v11051_v56, 16  ;;  %v11068_v6 = vsel %vm4174_vm8, %v4233_v50, %v4241_v4  ;;  %v3269_v61 = vsel %vm3157_vm7, %v3264_v3, %v3268_v49 }
 0x5d3   :  { %v3276_v7 = vrot.slane %v3274_v58, 1  ;;  %v4243_v27 = vrot.slane %v3286_v63, 1  ;;  %v4244_v29 = vrot.slane %v3274_v58, 2 }
 0x5d4   :  { %v11075_v17 = vld [vmem:[#allocation3 + $0x108] sm:$0xff] }
 0x5d5   :  { %v3277_v21 = vsel %vm3157_vm7, %v3272_v2, %v3276_v7  ;;  %v3132_v44 = vld [vmem:[#allocation3 + $0x110] sm:$0x1f]  ;;  %v4245_v38 = vor.u32 %v4244_v29, %v4243_v27  ;;  %v3288_v29 = vor.u32 %v3286_v63, %v3276_v7 }
 0x5d6   :  { %8206 = vmatprep.mubr.msk.bf16.mxu1 %vm3022_vm6, %v3277_v21  ;;  %v3133_v37 = vld [vmem:[#allocation3 + $0x118] sm:$0x1f]  ;;  %v3136_v33 = vpack.c.bf16 %v3132_v44, %v11033_v62  ;;  %v4149_v45 = vld [vmem:[#allocation3 + $0x110] sm:$0x7f] }
 0x5d7   :  { %3519 = vmatmul.mubr.bf16.gmra.mrb[104].mxu1 %v3269_v61  ;;  %v3137_v9 = vpack.c.bf16 %v3133_v37, %v11075_v17  ;;  %v11080_v47 = vsel %vm4174_vm8, %v4237_v8, %v4245_v38  ;;  %v4150_v43 = vld [vmem:[#allocation3 + $0x118] sm:$0x7f]  ;;  %v4153_v50 = vpack.c.bf16 %v4149_v45, %v11033_v62  ;;  %v3280_v61 = vor.u32 %v3278_v13, %v3268_v49 }
 0x5d8   :  { %v3282_v53 = vshll.u32 %v3136_v33, 16  ;;  %v4154_v59 = vpack.c.bf16 %v4150_v43, %v11075_v17  ;;  %v3294_v49 = vshrl.u32 %v3136_v33, 16  ;;  %v9576_v33 = vld [vmem:[%s12502_s4 + $0x154] ss:$8 sps:$4 sm:$0xff]  }
 0x5d9   :  { %v3290_v42 = vshll.u32 %v3137_v9, 16  ;;  %v4248_v27 = vshrl.u32 %v4153_v50, 16  ;;  %v3297_v21 = vshrl.u32 %v3137_v9, 16  ;;  %v4251_v44 = vshll.u32 %v4153_v50, 16  ;;  %v9579_v50 = vld [vmem:[%s12502_s4 + $0x164] ss:$8 sps:$4 sm:$0xff]  }
 0x5da   :  { %v3284_v48 = vrot.slane %v3282_v53, 1  ;;  %v4257_v58 = vshrl.u32 %v4154_v59, 16  ;;  %v4260_v2 = vshll.u32 %v4154_v59, 16  ;;  %v9574_v59 = vld [vmem:[%s12502_s4 + $0x150] ss:$8 sps:$4 sm:$0xff]  }
 0x5db   :  { %v3292_v3 = vrot.slane %v3290_v42, 1  ;;  %v4250_v10 = vrot.slane %v4248_v27, 1  ;;  %v4253_v36 = vrot.slane %v4251_v44, 2  ;;  %v9577_v42 = vld [vmem:[%s12502_s4 + $0x160] ss:$8 sps:$4 sm:$0xff]  }
 0x5dc   :  { %v4259_v37 = vrot.slane %v4257_v58, 1  ;;  %v4262_v8 = vrot.slane %v4260_v2, 2  ;;  %v3285_v43 = vsel %vm3157_vm7, %v3280_v61, %v3284_v48  ;;  %v3296_v7 = vor.u32 %v3294_v49, %v3284_v48  ;;  %v9582_v48 = vld [vmem:[%s12502_s4 + $0x174] ss:$8 sps:$4 sm:$0xff]   ;;  %v9580_v58 = vld [vmem:[%s12502_s4 + $0x170] ss:$8 sps:$4 sm:$0xff]  }
 0x5dd   :  { %v3293_v1 = vsel %vm3157_vm7, %v3288_v29, %v3292_v3  ;;  %v3299_v0 = vor.u32 %v3297_v21, %v3292_v3  ;;  %v11089_v53 = vor.u32 %v4253_v36, %v4250_v10  ;;  %v3094_v36 = vpack.c.bf16 %v10792_v60, %v10787_v54  ;;  %v9573_v10 = vld [vmem:[%s12502_s4 + $0x144] ss:$8 sps:$4 sm:$0xff]   ;;  %v9571_v54 = vld [vmem:[%s12502_s4 + $0x140] ss:$8 sps:$4 sm:$0xff]   ;;  %v9588_v29 = vld [vmem:[%s12502_s4 + $0x194] ss:$8 sps:$4 sm:$0xff]  }
 0x5de   :  { %8207 = vmatprep.mubr.msk.bf16.mxu1 %vm3022_vm6, %v3293_v1  ;;  %v11087_v45 = vor.u32 %v4262_v8, %v4259_v37  ;;  %v3059_v1 = vld [vmem:[#allocation3 + $0x8] sm:$0xff]  ;;  %v9586_v3 = vld [vmem:[%s12502_s4 + $0x190] ss:$8 sps:$4 sm:$0xff]   ;;  %v9594_v61 = vld [vmem:[%s12502_s4 + $0x1b4] ss:$8 sps:$4 sm:$0xff]  }
 0x5df   :  { %3529 = vmatmul.mubr.bf16.gmra.mrb[108].mxu1 %v3285_v43  ;;  %v11098_v63 = vsel %vm4174_vm8, %v4241_v4, %v11089_v53  ;;  %v3095_v9 = vpack.c.bf16 %v10803_v18, %v3059_v1  ;;  %v9570_v4 = vld [vmem:[%s12502_s4 + $0x134] ss:$8 sps:$4 sm:$0xff]   ;;  %v9585_v2 = vld [vmem:[%s12502_s4 + $0x184] ss:$8 sps:$4 sm:$0xff]   ;;  %v9583_v27 = vld [vmem:[%s12502_s4 + $0x180] ss:$8 sps:$4 sm:$0xff]  }
 0x5e0   :  { %8208 = vmatprep.mubr.msk.bf16.mxu1 %vm3022_vm6, %v3299_v0  ;;  %v11094_v13 = vsel %vm4174_vm8, %v4245_v38, %v11087_v45  ;;  %v9565_v0 = vld [vmem:[%s12502_s4 + $0x120] ss:$8 sps:$4 sm:$0xff]   ;;  %v9568_v38 = vld [vmem:[%s12502_s4 + $0x130] ss:$8 sps:$4 sm:$0xff]   ;;  %v9591_v21 = vld [vmem:[%s12502_s4 + $0x1a4] ss:$8 sps:$4 sm:$0xff]  }
 0x5e1   :  { %v9589_v44 = vld [vmem:[%s12502_s4 + $0x1a0] ss:$8 sps:$4 sm:$0xff]   ;;  %v3093_v37 = vld [vmem:[#allocation3 + $0x118] sm:$0xf]  ;;  %v3832_v1 = vrot.slane %v10820_v57, 1 }
 0x5e2   :  { %v3111_v8 = vpack.c.bf16 %v3093_v37, %v11075_v17  ;;  %v3783_v43 = vld [vmem:[#allocation3 + $0x8] sm:$0xfc]  ;;  %v3838_v37 = vrot.slane %v10841_v30, 1 }
 0x5e3   :  { %v3787_v49 = vpack.c.bf16 %v10803_v18, %v3783_v43  ;;  %v9604_v43 = vld [vmem:[%s12502_s4 + $0x1f0] ss:$8 sps:$4 sm:$0xff]  }
 0x5e7   :  { %3539 = vmatmul.mubr.bf16.gmra.mrb[112].mxu1 %v3296_v7  ;;  %v3092_v7 = vld [vmem:[#allocation3 + $0x110] sm:$0xf] }
 0x5e8   :  { %8227 = vmatprep.mubr.msk.bf16.mxu1 %vm3022_vm6, %v3095_v9  ;;  %v3110_v9 = vpack.c.bf16 %v3092_v7, %v11033_v62 }
 0x5ef   :  { %3692 = vmatmul.mubr.bf16.vlgmr.msra.gmra.mrb[80].mxu1 %v3094_v36  ;;  %v3782_v36 = vld [vmem:[#allocation3] sm:$0xfc] }
 0x5f0   :  { %8228 = vmatprep.mubr.msk.bf16.mxu1 %vm3022_vm6, %v10820_v57  ;;  %3989 = vmatpush1.bf16.msra.mxu1 %v9565_v0  ;;  %v3831_v0 = vrot.slane %v3787_v49, 1  ;;  %v9609_v49 = vld [vmem:[%s12502_s4 + $0x204] ss:$8 sps:$4 sm:$0xff]  }
 0x5f1   :  { %3990 = vmatprep.subr.bf16.mxu1 %v9570_v4 }
 0x5f2   :  { %v3833_v4 = vsel %vm3827_vm9, %v3831_v0, %v3832_v1  ;;  %v9612_v0 = vld [vmem:[%s12502_s4 + $0x214] ss:$8 sps:$4 sm:$0xff]  }
 0x5f4   :  { %3991 = vmatpush1.bf16.msra.mxu1 %v9568_v38  ;;  %v3786_v38 = vpack.c.bf16 %v10792_v60, %v3782_v36  ;;  %v9595_v60 = vld [vmem:[%s12502_s4 + $0x1c0] ss:$8 sps:$4 sm:$0xff]   ;;  %v3842_v36 = vrot.slane %v10878_v22, 1 }
 0x5f5   :  { %3992 = vmatprep.subr.bf16.mxu1 %v9573_v10  ;;  %v3829_v10 = vrot.slane %v10805_v20, 1 }
 0x5f6   :  { %v3828_v18 = vrot.slane %v3786_v38, 1  ;;  %v9610_v38 = vld [vmem:[%s12502_s4 + $0x210] ss:$8 sps:$4 sm:$0xff]  }
 0x5f7   :  { %3702 = vmatmul.mubr.bf16.gmra.mrb[84].mxu1 %v10805_v20 }
 0x5f8   :  { %8229 = vmatprep.mubr.msk.bf16.mxu1 %vm3022_vm6, %v10845_v35  ;;  %3993 = vmatpush1.bf16.msra.mxu1 %v9571_v54  ;;  %v3836_v54 = vrot.slane %v10845_v35, 1 }
 0x5f9   :  { %3994 = vmatprep.subr.bf16.mxu1 %v9576_v33  ;;  %v9592_v33 = vld [vmem:[%s12502_s4 + $0x1b0] ss:$8 sps:$4 sm:$0xff]  }
 0x5fc   :  { %3995 = vmatpush1.bf16.msra.mxu1 %v9574_v59  ;;  %v9597_v59 = vld [vmem:[%s12502_s4 + $0x1c4] ss:$8 sps:$4 sm:$0xff]  }
 0x5fd   :  { %3996 = vmatprep.subr.bf16.mxu1 %v9579_v50  ;;  %v3830_v50 = vsel %vm3827_vm9, %v3828_v18, %v3829_v10 }
 0x5ff   :  { %3712 = vmatmul.mubr.bf16.gmra.mrb[88].mxu1 %v10816_v52 }
 0x600   :  { %8230 = vmatprep.mubr.msk.bf16.mxu1 %vm3022_vm6, %v10885_v26  ;;  %3997 = vmatpush1.bf16.msra.mxu1 %v9577_v42  ;;  %v3837_v42 = vsel %vm3827_vm9, %v3832_v1, %v3836_v54 }
 0x601   :  { %3998 = vmatprep.subr.bf16.mxu1 %v9582_v48  ;;  %v9600_v48 = vld [vmem:[%s12502_s4 + $0x1d4] ss:$8 sps:$4 sm:$0xff]  }
 0x604   :  { %3999 = vmatpush1.bf16.msra.mxu1 %v9580_v58  ;;  %v3834_v58 = vrot.slane %v10816_v52, 1 }
 0x605   :  { %4000 = vmatprep.subr.bf16.mxu1 %v9585_v2  ;;  %v3840_v2 = vrot.slane %v10885_v26, 1 }
 0x606   :  { %v3839_v7 = vsel %vm3827_vm9, %v3834_v58, %v3838_v37 }
 0x607   :  { %3722 = vmatmul.mubr.bf16.gmra.mrb[92].mxu1 %v10841_v30 }
 0x608   :  { %8231 = vmatprep.mubr.msk.bf16.mxu1 %vm3022_vm6, %v10933_v24  ;;  %4001 = vmatpush1.bf16.msra.mxu1 %v9583_v27  ;;  %v9598_v27 = vld [vmem:[%s12502_s4 + $0x1d0] ss:$8 sps:$4 sm:$0xff]  }
 0x609   :  { %4002 = vmatprep.subr.bf16.mxu1 %v9588_v29  ;;  %v9603_v29 = vld [vmem:[%s12502_s4 + $0x1e4] ss:$8 sps:$4 sm:$0xff]  }
 0x60c   :  { %4003 = vmatpush1.bf16.msra.mxu1 %v9586_v3  ;;  %v3835_v3 = vsel %vm3827_vm9, %v3829_v10, %v3834_v58  ;;  %v9615_v10 = vld [vmem:[%s12502_s4 + $0x224] ss:$8 sps:$4 sm:$0xff]  }
 0x60d   :  { %4004 = vmatprep.subr.bf16.mxu1 %v9591_v21  ;;  %v3841_v21 = vsel %vm3827_vm9, %v3836_v54, %v3840_v2  ;;  %v3843_v54 = vsel %vm3827_vm9, %v3838_v37, %v3842_v36  ;;  %v3854_v37 = vrot.slane %v11017_v32, 1 }
 0x60f   :  { %3732 = vmatmul.mubr.bf16.gmra.mrb[96].mxu1 %v10878_v22 }
 0x610   :  { %8232 = vmatprep.mubr.msk.bf16.mxu1 %vm3022_vm6, %v10975_v25  ;;  %4005 = vmatpush1.bf16.msra.mxu1 %v9589_v44  ;;  %v9601_v44 = vld [vmem:[%s12502_s4 + $0x1e0] ss:$8 sps:$4 sm:$0xff]  }
 0x611   :  { %4391 = vmatprep.subr.bf16.mxu1 %v9594_v61  ;;  %v9606_v61 = vld [vmem:[%s12502_s4 + $0x1f4] ss:$8 sps:$4 sm:$0xff]  }
 0x617   :  { %3742 = vmatmul.mubr.bf16.gmra.mrb[100].mxu1 %v10924_v11 }
 0x618   :  { %8233 = vmatprep.mubr.msk.bf16.mxu1 %vm3022_vm6, %v11024_v55 }
 0x61f   :  { %3752 = vmatmul.mubr.bf16.gmra.mrb[104].mxu1 %v10967_v15 }
 0x620   :  { %8234 = vmatprep.mubr.msk.bf16.mxu1 %vm3022_vm6, %v11051_v56 }
 0x627   :  { %3762 = vmatmul.mubr.bf16.gmra.mrb[108].mxu1 %v11017_v32 }
 0x628   :  { %8235 = vmatprep.mubr.msk.bf16.mxu1 %vm3022_vm6, %v3111_v8  ;;  %v3844_v8 = vrot.slane %v10933_v24, 1 }
 0x62a   :  { %v3845_v1 = vsel %vm3827_vm9, %v3840_v2, %v3844_v8 }
 0x62f   :  { %3772 = vmatmul.mubr.bf16.gmra.mrb[112].mxu1 %v3110_v9  ;;  %v9607_v9 = vld [vmem:[%s12502_s4 + $0x200] ss:$8 sps:$4 sm:$0xff]  }
 0x630   :  { %8272 = vmatprep.mubr.msk.bf16.mxu1 %vm3022_vm6, %v3833_v4  ;;  %v3848_v4 = vrot.slane %v10975_v25, 1 }
 0x632   :  { %v3849_v18 = vsel %vm3827_vm9, %v3844_v8, %v3848_v4 }
 0x637   :  { %4021 = vmatmul.mubr.bf16.vlgmr.msra.gmra.mrb[80].mxu1 %v3830_v50  ;;  %v3846_v50 = vrot.slane %v10924_v11, 1 }
 0x638   :  { %8273 = vmatprep.mubr.msk.bf16.mxu1 %vm3022_vm6, %v3837_v42  ;;  %4392 = vmatpush1.bf16.msra.mxu1 %v9592_v33  ;;  %v9613_v33 = vld [vmem:[%s12502_s4 + $0x220] ss:$8 sps:$4 sm:$0xff]   ;;  %v3852_v42 = vrot.slane %v11024_v55, 1 }
 0x639   :  { %4393 = vmatprep.subr.bf16.mxu1 %v9597_v59  ;;  %v9618_v59 = vld [vmem:[%s12502_s4 + $0x234] ss:$8 sps:$4 sm:$0xff]   ;;  %v3847_v58 = vsel %vm3827_vm9, %v3842_v36, %v3846_v50 }
 0x63a   :  { %v3853_v2 = vsel %vm3827_vm9, %v3848_v4, %v3852_v42  ;;  %v11279_v4 = vld [vmem:[#allocation3 + $0x10] sm:$0xff] }
 0x63c   :  { %4394 = vmatpush1.bf16.msra.mxu1 %v9595_v60  ;;  %v9616_v60 = vld [vmem:[%s12502_s4 + $0x230] ss:$8 sps:$4 sm:$0xff]  }
 0x63d   :  { %4395 = vmatprep.subr.bf16.mxu1 %v9600_v48  ;;  %v9621_v48 = vld [vmem:[%s12502_s4 + $0x244] ss:$8 sps:$4 sm:$0xff]  }
 0x63f   :  { %4031 = vmatmul.mubr.bf16.gmra.mrb[84].mxu1 %v3835_v3  ;;  %v3785_v3 = vld [vmem:[#allocation3 + $0x118] sm:$0x3f] }
 0x640   :  { %8274 = vmatprep.mubr.msk.bf16.mxu1 %vm3022_vm6, %v3841_v21  ;;  %4396 = vmatpush1.bf16.msra.mxu1 %v9598_v27  ;;  %v3850_v27 = vrot.slane %v10967_v15, 1 }
 0x641   :  { %4397 = vmatprep.subr.bf16.mxu1 %v9603_v29  ;;  %v3856_v29 = vrot.slane %v11051_v56, 1 }
 0x642   :  { %v3851_v21 = vsel %vm3827_vm9, %v3846_v50, %v3850_v27  ;;  %v9619_v50 = vld [vmem:[%s12502_s4 + $0x240] ss:$8 sps:$4 sm:$0xff]  }
 0x644   :  { %4398 = vmatpush1.bf16.msra.mxu1 %v9601_v44  ;;  %v3857_v44 = vsel %vm3827_vm9, %v3852_v42, %v3856_v29  ;;  %v9624_v42 = vld [vmem:[%s12502_s4 + $0x254] ss:$8 sps:$4 sm:$0xff]  }
 0x645   :  { %4399 = vmatprep.subr.bf16.mxu1 %v9606_v61  ;;  %v3789_v61 = vpack.c.bf16 %v3785_v3, %v11075_v17  ;;  %v9637_v3 = vld [vmem:[%s12502_s4 + $0x2a0] ss:$8 sps:$4 sm:$0xff]  }
 0x647   :  { %4041 = vmatmul.mubr.bf16.gmra.mrb[88].mxu1 %v3839_v7  ;;  %v3860_v8 = vrot.slane %v3789_v61, 1  ;;  %v4586_v61 = vrot.slane %v10820_v57, 2  ;;  %v9651_v57 = vld [vmem:[%s12457_s9 + $0x14] ss:$8 sps:$4 sm:$0xff]  }
 0x648   :  { %8275 = vmatprep.mubr.msk.bf16.mxu1 %vm3022_vm6, %v3845_v1  ;;  %4400 = vmatpush1.bf16.msra.mxu1 %v9604_v43  ;;  %v3784_v43 = vld [vmem:[#allocation3 + $0x110] sm:$0x3f] }
 0x649   :  { %4401 = vmatprep.subr.bf16.mxu1 %v9609_v49  ;;  %v3855_v49 = vsel %vm3827_vm9, %v3850_v27, %v3854_v37  ;;  %v3788_v7 = vpack.c.bf16 %v3784_v43, %v11033_v62  ;;  %v3861_v1 = vsel %vm3827_vm9, %v3856_v29, %v3860_v8  ;;  %v9631_v27 = vld [vmem:[%s12502_s4 + $0x280] ss:$8 sps:$4 sm:$0xff]   ;;  %v9639_v29 = vld [vmem:[%s12502_s4 + $0x2a4] ss:$8 sps:$4 sm:$0xff]  }
 0x64c   :  { %4402 = vmatpush1.bf16.msra.mxu1 %v9607_v9  ;;  %v3858_v9 = vrot.slane %v3788_v7, 1  ;;  %v4594_v7 = vrot.slane %v10885_v26, 2  ;;  %v9660_v26 = vld [vmem:[%s12457_s9 + $0x44] ss:$8 sps:$4 sm:$0xff]  }
 0x64d   :  { %4403 = vmatprep.subr.bf16.mxu1 %v9612_v0  ;;  %v4147_v0 = vld [vmem:[#allocation3] sm:$0xf8] }
 0x64e   :  { %v3859_v36 = vsel %vm3827_vm9, %v3854_v37, %v3858_v9 }
 0x64f   :  { %4051 = vmatmul.mubr.bf16.gmra.mrb[92].mxu1 %v3843_v54 }
 0x650   :  { %8276 = vmatprep.mubr.msk.bf16.mxu1 %vm3022_vm6, %v3849_v18  ;;  %4404 = vmatpush1.bf16.msra.mxu1 %v9610_v38  ;;  %v4151_v38 = vpack.c.bf16 %v11279_v4, %v4147_v0 }
 0x651   :  { %4405 = vmatprep.subr.bf16.mxu1 %v9615_v10 }
 0x652   :  { %v4176_v10 = vshrl.u32 %v4151_v38, 16  ;;  %v4179_v54 = vshll.u32 %v4151_v38, 16  ;;  %v4598_v38 = vrot.slane %v10933_v24, 2  ;;  %v9666_v24 = vld [vmem:[%s12457_s9 + $0x64] ss:$8 sps:$4 sm:$0xff]  }
 0x654   :  { %4406 = vmatpush1.bf16.msra.mxu1 %v9613_v33  ;;  %v4178_v18 = vrot.slane %v4176_v10, 1  ;;  %v4181_v33 = vrot.slane %v4179_v54, 2  ;;  %v9658_v10 = vld [vmem:[%s12457_s9 + $0x40] ss:$8 sps:$4 sm:$0xff]   ;;  %v9663_v54 = vld [vmem:[%s12457_s9 + $0x54] ss:$8 sps:$4 sm:$0xff]  }
 0x655   :  { %4407 = vmatprep.subr.bf16.mxu1 %v9618_v59 }
 0x656   :  { %v4182_v59 = vor.u32 %v4181_v33, %v4178_v18  ;;  %v4599_v33 = vsel %vm2771_vm5, %v4594_v7, %v4598_v38 }
 0x657   :  { %4061 = vmatmul.mubr.bf16.gmra.mrb[96].mxu1 %v3847_v58  ;;  %v9625_v58 = vld [vmem:[%s12502_s4 + $0x260] ss:$8 sps:$4 sm:$0xff]  }
 0x658   :  { %8277 = vmatprep.mubr.msk.bf16.mxu1 %vm3022_vm6, %v3853_v2  ;;  %4408 = vmatpush1.bf16.msra.mxu1 %v9616_v60  ;;  %v4186_v60 = vsel %vm4174_vm8, %v4182_v59, %v10847_v40  ;;  %v9630_v40 = vld [vmem:[%s12502_s4 + $0x274] ss:$8 sps:$4 sm:$0xff]   ;;  %v9633_v2 = vld [vmem:[%s12502_s4 + $0x284] ss:$8 sps:$4 sm:$0xff]   ;;  %v4596_v59 = vrot.slane %v10878_v22, 2 }
 0x659   :  { %4742 = vmatprep.subr.bf16.mxu1 %v9621_v48  ;;  %v9627_v48 = vld [vmem:[%s12502_s4 + $0x264] ss:$8 sps:$4 sm:$0xff]   ;;  %v9667_v22 = vld [vmem:[%s12457_s9 + $0x70] ss:$8 sps:$4 sm:$0xff]  }
 0x65f   :  { %4071 = vmatmul.mubr.bf16.gmra.mrb[100].mxu1 %v3851_v21  ;;  %v9645_v21 = vld [vmem:[%s12502_s4 + $0x2c4] ss:$8 sps:$4 sm:$0xff]  }
 0x660   :  { %8278 = vmatprep.mubr.msk.bf16.mxu1 %vm3022_vm6, %v3857_v44  ;;  %v9643_v44 = vld [vmem:[%s12502_s4 + $0x2c0] ss:$8 sps:$4 sm:$0xff]  }
 0x667   :  { %4081 = vmatmul.mubr.bf16.gmra.mrb[104].mxu1 %v3855_v49  ;;  %v4588_v49 = vrot.slane %v10816_v52, 2  ;;  %v9655_v52 = vld [vmem:[%s12457_s9 + $0x30] ss:$8 sps:$4 sm:$0xff]  }
 0x668   :  { %8279 = vmatprep.mubr.msk.bf16.mxu1 %vm3022_vm6, %v3861_v1  ;;  %v9652_v1 = vld [vmem:[%s12457_s9 + $0x20] ss:$8 sps:$4 sm:$0xff]  }
 0x66f   :  { %4091 = vmatmul.mubr.bf16.gmra.mrb[108].mxu1 %v3859_v36 }
 0x670   :  { %8280 = vmatprep.mubr.msk.bf16.mxu1 %vm3022_vm6, %v3860_v8  ;;  %v9646_v8 = vld [vmem:[%s12457_s9] ss:$8 sps:$4 sm:$0xff]  }
 0x677   :  { %4101 = vmatmul.mubr.bf16.gmra.mrb[112].mxu1 %v3858_v9  ;;  %v9657_v9 = vld [vmem:[%s12457_s9 + $0x34] ss:$8 sps:$4 sm:$0xff]  }
 0x678   :  { %8317 = vmatprep.mubr.msk.bf16.mxu1 %vm3022_vm6, %v10882_v23  ;;  %v9622_v23 = vld [vmem:[%s12502_s4 + $0x250] ss:$8 sps:$4 sm:$0xff]  }
 0x67f   :  { %4424 = vmatmul.mubr.bf16.vlgmr.msra.gmra.mrb[80].mxu1 %v4186_v60  ;;  %v9669_v60 = vld [vmem:[%s12457_s9 + $0x74] ss:$8 sps:$4 sm:$0xff]  }
 0x680   :  { %8318 = vmatprep.mubr.msk.bf16.mxu1 %vm3022_vm6, %v10930_v14  ;;  %4743 = vmatpush1.bf16.msra.mxu1 %v9619_v50  ;;  %v9628_v14 = vld [vmem:[%s12502_s4 + $0x270] ss:$8 sps:$4 sm:$0xff]   ;;  %v4602_v50 = vrot.slane %v10975_v25, 2  ;;  %v9672_v25 = vld [vmem:[%s12457_s9 + $0x84] ss:$8 sps:$4 sm:$0xff]  }
 0x681   :  { %4744 = vmatprep.subr.bf16.mxu1 %v9624_v42  ;;  %v9664_v42 = vld [vmem:[%s12457_s9 + $0x60] ss:$8 sps:$4 sm:$0xff]  }
 0x684   :  { %4745 = vmatpush1.bf16.msra.mxu1 %v9622_v23 }
 0x685   :  { %4746 = vmatprep.subr.bf16.mxu1 %v9627_v48  ;;  %v4603_v48 = vsel %vm2771_vm5, %v4598_v38, %v4602_v50 }
 0x687   :  { %4434 = vmatmul.mubr.bf16.gmra.mrb[84].mxu1 %v10920_v46  ;;  %v9636_v46 = vld [vmem:[%s12502_s4 + $0x294] ss:$8 sps:$4 sm:$0xff]  }
 0x688   :  { %8319 = vmatprep.mubr.msk.bf16.mxu1 %vm3022_vm6, %v10972_v16  ;;  %4747 = vmatpush1.bf16.msra.mxu1 %v9625_v58  ;;  %v9634_v16 = vld [vmem:[%s12502_s4 + $0x290] ss:$8 sps:$4 sm:$0xff]   ;;  %v4600_v58 = vrot.slane %v10924_v11, 2 }
 0x689   :  { %4748 = vmatprep.subr.bf16.mxu1 %v9630_v40  ;;  %v4606_v40 = vrot.slane %v11024_v55, 2  ;;  %v9673_v11 = vld [vmem:[%s12457_s9 + $0x90] ss:$8 sps:$4 sm:$0xff]   ;;  %v9678_v55 = vld [vmem:[%s12457_s9 + $0xa4] ss:$8 sps:$4 sm:$0xff]  }
 0x68c   :  { %4749 = vmatpush1.bf16.msra.mxu1 %v9628_v14  ;;  %v9670_v14 = vld [vmem:[%s12457_s9 + $0x80] ss:$8 sps:$4 sm:$0xff]  }
 0x68d   :  { %4750 = vmatprep.subr.bf16.mxu1 %v9633_v2  ;;  %v9675_v2 = vld [vmem:[%s12457_s9 + $0x94] ss:$8 sps:$4 sm:$0xff]  }
 0x68f   :  { %4444 = vmatmul.mubr.bf16.gmra.mrb[88].mxu1 %v10979_v28  ;;  %v9642_v28 = vld [vmem:[%s12502_s4 + $0x2b4] ss:$8 sps:$4 sm:$0xff]  }
 0x690   :  { %8320 = vmatprep.mubr.msk.bf16.mxu1 %vm3022_vm6, %v11021_v5  ;;  %4751 = vmatpush1.bf16.msra.mxu1 %v9631_v27  ;;  %v9640_v5 = vld [vmem:[%s12502_s4 + $0x2b0] ss:$8 sps:$4 sm:$0xff]   ;;  %v4601_v27 = vsel %vm2771_vm5, %v4596_v59, %v4600_v58 }
 0x691   :  { %4752 = vmatprep.subr.bf16.mxu1 %v9636_v46  ;;  %v4607_v46 = vsel %vm2771_vm5, %v4602_v50, %v4606_v40 }
 0x694   :  { %4753 = vmatpush1.bf16.msra.mxu1 %v9634_v16  ;;  %v4604_v16 = vrot.slane %v10967_v15, 2 }
 0x695   :  { %4754 = vmatprep.subr.bf16.mxu1 %v9639_v29  ;;  %v4610_v29 = vrot.slane %v11051_v56, 2  ;;  %v9679_v56 = vld [vmem:[%s12457_s9 + $0xb0] ss:$8 sps:$4 sm:$0xff]  }
 0x697   :  { %4454 = vmatmul.mubr.bf16.gmra.mrb[92].mxu1 %v11013_v41  ;;  %v9648_v41 = vld [vmem:[%s12457_s9 + $0x4] ss:$8 sps:$4 sm:$0xff]  }
 0x698   :  { %8321 = vmatprep.mubr.msk.bf16.mxu1 %vm3022_vm6, %v11048_v51  ;;  %4755 = vmatpush1.bf16.msra.mxu1 %v9637_v3  ;;  %v4551_v51 = vld [vmem:[#allocation3 + $0x8] sm:$0xf0]  ;;  %v4553_v3 = vld [vmem:[#allocation3 + $0x118] sm:$0xff] }
 0x699   :  { %4756 = vmatprep.subr.bf16.mxu1 %v9642_v28  ;;  %v9676_v28 = vld [vmem:[%s12457_s9 + $0xa0] ss:$8 sps:$4 sm:$0xff]   ;;  %v4557_v15 = vpack.c.bf16 %v4553_v3, %v11075_v17  ;;  %v12504_v17 = vpack.c.bf16 %v11040_v19, %v11033_v62  ;;  %v9685_v62 = vld [vmem:[%s12457_s9 + $0xd0] ss:$8 sps:$4 sm:$0xff]  }
 0x69a   :  { %v4901_v19 = vld [vmem:[%s12456_s8] sm:$0x3] }
 0x69c   :  { %4757 = vmatpush1.bf16.msra.mxu1 %v9640_v5  ;;  %v9681_v5 = vld [vmem:[%s12457_s9 + $0xb4] ss:$8 sps:$4 sm:$0xff]  }
 0x69d   :  { %4758 = vmatprep.subr.bf16.mxu1 %v9645_v21  ;;  %v4605_v21 = vsel %vm2771_vm5, %v4600_v58, %v4604_v16 }
 0x69f   :  { %4464 = vmatmul.mubr.bf16.gmra.mrb[96].mxu1 %v11055_v12  ;;  %v9909_v12 = vld [vmem:[#allocation3 + $0x18] sm:$0xff] }
 0x6a0   :  { %8322 = vmatprep.mubr.msk.bf16.mxu1 %vm3022_vm6, %v11063_v31  ;;  %4759 = vmatpush1.bf16.msra.mxu1 %v9643_v44  ;;  %v4555_v31 = vpack.c.bf16 %v9909_v12, %v4551_v51  ;;  %v4611_v44 = vsel %vm2771_vm5, %v4606_v40, %v4610_v29  ;;  %v4614_v51 = vrot.slane %v4557_v15, 2 }
 0x6a1   :  { %5198 = vmatprep.subr.bf16.mxu1 %v9648_v41  ;;  %v4608_v41 = vrot.slane %v11017_v32, 2  ;;  %v9682_v32 = vld [vmem:[%s12457_s9 + $0xc0] ss:$8 sps:$4 sm:$0xff]  }
 0x6a2   :  { %v4585_v37 = vrot.slane %v4555_v31, 2  ;;  %v4615_v31 = vsel %vm2771_vm5, %v4610_v29, %v4614_v51 }
 0x6a3   :  { %v4609_v12 = vsel %vm2771_vm5, %v4604_v16, %v4608_v41 }
 0x6a7   :  { %4474 = vmatmul.mubr.bf16.gmra.mrb[100].mxu1 %v11058_v39  ;;  %v4550_v39 = vld [vmem:[#allocation3] sm:$0xf0] }
 0x6a8   :  { %8323 = vmatprep.mubr.msk.bf16.mxu1 %vm3022_vm6, %v11080_v47  ;;  %v4587_v47 = vsel %vm2771_vm5, %v4585_v37, %v4586_v61 }
 0x6af   :  { %4484 = vmatmul.mubr.bf16.gmra.mrb[104].mxu1 %v11068_v6  ;;  %v4554_v6 = vpack.c.bf16 %v11279_v4, %v4550_v39  ;;  %v4592_v4 = vrot.slane %v10841_v30, 2  ;;  %v9661_v30 = vld [vmem:[%s12457_s9 + $0x50] ss:$8 sps:$4 sm:$0xff]   ;;  %v9684_v39 = vld [vmem:[%s12457_s9 + $0xc4] ss:$8 sps:$4 sm:$0xff]  }
 0x6b0   :  { %8324 = vmatprep.mubr.msk.bf16.mxu1 %vm3022_vm6, %v11094_v13  ;;  %v4583_v13 = vrot.slane %v10805_v20, 2  ;;  %v9649_v20 = vld [vmem:[%s12457_s9 + $0x10] ss:$8 sps:$4 sm:$0xff]  }
 0x6b1   :  { %v4593_v18 = vsel %vm2771_vm5, %v4588_v49, %v4592_v4  ;;  %v4597_v23 = vsel %vm2771_vm5, %v4592_v4, %v4596_v59 }
 0x6b2   :  { %v4589_v0 = vsel %vm2771_vm5, %v4583_v13, %v4588_v49 }
 0x6b7   :  { %4494 = vmatmul.mubr.bf16.gmra.mrb[108].mxu1 %v11098_v63  ;;  %v4590_v63 = vrot.slane %v10845_v35, 2  ;;  %v9654_v35 = vld [vmem:[%s12457_s9 + $0x24] ss:$8 sps:$4 sm:$0xff]  }
 0x6b8   :  { %8325 = vmatprep.mubr.msk.bf16.mxu1 %vm3022_vm6, %v11087_v45  ;;  %v4582_v45 = vrot.slane %v4554_v6, 2  ;;  %v11493_v6 = vrot.slane %v4901_v19, %v10615_v34 }
 0x6b9   :  { %v4591_v43 = vsel %vm2771_vm5, %v4586_v61, %v4590_v63  ;;  %v4595_v36 = vsel %vm2771_vm5, %v4590_v63, %v4594_v7  ;;  %v4612_v61 = vrot.slane %v12504_v17, 2 }
 0x6bb   :  { %v4613_v37 = vsel %vm2771_vm5, %v4608_v41, %v4612_v61 }
 0x6bf   :  { %4504 = vmatmul.mubr.bf16.gmra.mrb[112].mxu1 %v11089_v53  ;;  %v4584_v53 = vsel %vm2771_vm5, %v4582_v45, %v4583_v13  ;;  %v12505_v13 = vld [vmem:[#allocation18_spill] sm:$0xff] }
 0x6c0   :  { %8362 = vmatprep.mubr.msk.bf16.mxu1 %vm3022_vm6, %v4587_v47  ;;  %v9687_v47 = vld [vmem:[%s12457_s9 + $0xd4] ss:$8 sps:$4 sm:$0xff]   ;;  %v11496_v63 = vrot.slane %v4901_v19, %v12505_v13 }
 0x6c7   :  { %4775 = vmatmul.mubr.bf16.vlgmr.msra.gmra.mrb[80].mxu1 %v4584_v53 }
 0x6c8   :  { %8363 = vmatprep.mubr.msk.bf16.mxu1 %vm3022_vm6, %v4591_v43  ;;  %5199 = vmatpush1.bf16.msra.mxu1 %v9646_v8 }
 0x6c9   :  { %5200 = vmatprep.subr.bf16.mxu1 %v9651_v57 }
 0x6cc   :  { %5201 = vmatpush1.bf16.msra.mxu1 %v9649_v20 }
 0x6cd   :  { %5202 = vmatprep.subr.bf16.mxu1 %v9654_v35 }
 0x6cf   :  { %4785 = vmatmul.mubr.bf16.gmra.mrb[84].mxu1 %v4589_v0 }
 0x6d0   :  { %8364 = vmatprep.mubr.msk.bf16.mxu1 %vm3022_vm6, %v4595_v36  ;;  %5203 = vmatpush1.bf16.msra.mxu1 %v9652_v1 }
 0x6d1   :  { %5204 = vmatprep.subr.bf16.mxu1 %v9657_v9 }
 0x6d4   :  { %5205 = vmatpush1.bf16.msra.mxu1 %v9655_v52 }
 0x6d5   :  { %5206 = vmatprep.subr.bf16.mxu1 %v9660_v26 }
 0x6d7   :  { %4795 = vmatmul.mubr.bf16.gmra.mrb[88].mxu1 %v4593_v18 }
 0x6d8   :  { %8365 = vmatprep.mubr.msk.bf16.mxu1 %vm3022_vm6, %v4599_v33  ;;  %5207 = vmatpush1.bf16.msra.mxu1 %v9658_v10 }
 0x6d9   :  { %5208 = vmatprep.subr.bf16.mxu1 %v9663_v54 }
 0x6dc   :  { %5209 = vmatpush1.bf16.msra.mxu1 %v9661_v30 }
 0x6dd   :  { %5210 = vmatprep.subr.bf16.mxu1 %v9666_v24 }
 0x6df   :  { %4805 = vmatmul.mubr.bf16.gmra.mrb[92].mxu1 %v4597_v23 }
 0x6e0   :  { %8366 = vmatprep.mubr.msk.bf16.mxu1 %vm3022_vm6, %v4603_v48  ;;  %5211 = vmatpush1.bf16.msra.mxu1 %v9664_v42 }
 0x6e1   :  { %5212 = vmatprep.subr.bf16.mxu1 %v9669_v60 }
 0x6e4   :  { %5213 = vmatpush1.bf16.msra.mxu1 %v9667_v22 }
 0x6e5   :  { %5214 = vmatprep.subr.bf16.mxu1 %v9672_v25 }
 0x6e7   :  { %4815 = vmatmul.mubr.bf16.gmra.mrb[96].mxu1 %v4601_v27 }
 0x6e8   :  { %8367 = vmatprep.mubr.msk.bf16.mxu1 %vm3022_vm6, %v4607_v46  ;;  %5215 = vmatpush1.bf16.msra.mxu1 %v9670_v14 }
 0x6e9   :  { %5216 = vmatprep.subr.bf16.mxu1 %v9675_v2 }
 0x6ec   :  { %5217 = vmatpush1.bf16.msra.mxu1 %v9673_v11 }
 0x6ed   :  { %5218 = vmatprep.subr.bf16.mxu1 %v9678_v55 }
 0x6ef   :  { %4825 = vmatmul.mubr.bf16.gmra.mrb[100].mxu1 %v4605_v21 }
 0x6f0   :  { %8368 = vmatprep.mubr.msk.bf16.mxu1 %vm3022_vm6, %v4611_v44  ;;  %5219 = vmatpush1.bf16.msra.mxu1 %v9676_v28 }
 0x6f1   :  { %5220 = vmatprep.subr.bf16.mxu1 %v9681_v5 }
 0x6f4   :  { %5221 = vmatpush1.bf16.msra.mxu1 %v9679_v56 }
 0x6f5   :  { %5222 = vmatprep.subr.bf16.mxu1 %v9684_v39 }
 0x6f7   :  { %4835 = vmatmul.mubr.bf16.gmra.mrb[104].mxu1 %v4609_v12 }
 0x6f8   :  { %8369 = vmatprep.mubr.msk.bf16.mxu1 %vm3022_vm6, %v4615_v31  ;;  %5223 = vmatpush1.bf16.msra.mxu1 %v9682_v32 }
 0x6f9   :  { %5224 = vmatprep.subr.bf16.mxu1 %v9687_v47 }
 0x6fc   :  { %5225 = vmatpush1.bf16.msra.mxu1 %v9685_v62 }
 0x6ff   :  { %4845 = vmatmul.mubr.bf16.gmra.mrb[108].mxu1 %v4613_v37 }
 0x700   :  { %8370 = vmatprep.mubr.msk.bf16.mxu1 %vm3022_vm6, %v4614_v51 }
 0x707   :  { %4855 = vmatmul.mubr.bf16.gmra.mrb[112].mxu1 %v4612_v61 }
 0x79a   :  { %v4776_v45 = vpop.f32.mrb[80].mxu1 }
 0x79b   :  { %v4913_v8 = vadd.f32 %v11493_v6, %v4776_v45  ;;  %v4778_v57 = vpop.f32.mrb[81].mxu1 }
 0x79c   :  { %v4914_v53 = vadd.f32 %v11496_v63, %v4778_v57  ;;  %v4780_v43 = vpop.f32.mrb[82].mxu1 }
 0x79d   :  { %v4915_v20 = vadd.f32 %v11493_v6, %v4780_v43  ;;  %v4782_v35 = vpop.f32.mrb[83].mxu1  ;;  %v4949_v7 = vmax.f32 %v4913_v8, 0.0 }
 0x79e   :  { %v4916_v49 = vadd.f32 %v11496_v63, %v4782_v35  ;;  %v4950_v9 = vmax.f32 %v4914_v53, 0.0 }
 0x79f   :  { %v4951_v1 = vmax.f32 %v4915_v20, 0.0 }
 0x7a0   :  { %v4952_v0 = vmax.f32 %v4916_v49, 0.0 }
 0x7a1   :  { %v4985_v36 = vpack.c.bf16 %v4951_v1, %v4949_v7 }
 0x7a2   :  { %v4986_v52 = vpack.c.bf16 %v4952_v0, %v4950_v9  ;;  %v4786_v26 = vpop.f32.mrb[84].mxu1 }
 0x7a3   :  { %v4917_v4 = vadd.f32 %v11493_v6, %v4786_v26  ;;  %v4788_v38 = vpop.f32.mrb[85].mxu1 }
 0x7a4   :  { %v4918_v10 = vadd.f32 %v11496_v63, %v4788_v38  ;;  %v4790_v54 = vpop.f32.mrb[86].mxu1  ;;  %8399 = vmatprep.mubr.msk.bf16.mxu1 %vm2370_vm3, %v4986_v52 }
 0x7a5   :  { %v4919_v18 = vadd.f32 %v11493_v6, %v4790_v54  ;;  %v4792_v33 = vpop.f32.mrb[87].mxu1  ;;  %5231 = vmatmul.mubr.bf16.vlgmr.msra.gmra.mrb[116].mxu1 %v4985_v36  ;;  %v4953_v24 = vmax.f32 %v4917_v4, 0.0 }
 0x7a6   :  { %v4920_v30 = vadd.f32 %v11496_v63, %v4792_v33  ;;  %v4954_v50 = vmax.f32 %v4918_v10, 0.0 }
 0x7a7   :  { %v4955_v59 = vmax.f32 %v4919_v18, 0.0 }
 0x7a8   :  { %v4956_v42 = vmax.f32 %v4920_v30, 0.0 }
 0x7a9   :  { %v4987_v60 = vpack.c.bf16 %v4955_v59, %v4953_v24 }
 0x7aa   :  { %v4988_v23 = vpack.c.bf16 %v4956_v42, %v4954_v50  ;;  %v4796_v48 = vpop.f32.mrb[88].mxu1 }
 0x7ab   :  { %v4921_v22 = vadd.f32 %v11493_v6, %v4796_v48  ;;  %v4798_v25 = vpop.f32.mrb[89].mxu1 }
 0x7ac   :  { %v4922_v58 = vadd.f32 %v11496_v63, %v4798_v25  ;;  %v4800_v40 = vpop.f32.mrb[90].mxu1  ;;  %8400 = vmatprep.mubr.msk.bf16.mxu1 %vm2370_vm3, %v4988_v23 }
 0x7ad   :  { %v4923_v14 = vadd.f32 %v11493_v6, %v4800_v40  ;;  %v4802_v2 = vpop.f32.mrb[91].mxu1  ;;  %5241 = vmatmul.mubr.bf16.gmra.mrb[120].mxu1 %v4987_v60  ;;  %v4957_v46 = vmax.f32 %v4921_v22, 0.0 }
 0x7ae   :  { %v4924_v27 = vadd.f32 %v11496_v63, %v4802_v2  ;;  %v4958_v55 = vmax.f32 %v4922_v58, 0.0 }
 0x7af   :  { %v4959_v11 = vmax.f32 %v4923_v14, 0.0 }
 0x7b0   :  { %v4960_v16 = vmax.f32 %v4924_v27, 0.0 }
 0x7b1   :  { %v4989_v29 = vpack.c.bf16 %v4959_v11, %v4957_v46 }
 0x7b2   :  { %v4990_v3 = vpack.c.bf16 %v4960_v16, %v4958_v55  ;;  %v4806_v28 = vpop.f32.mrb[92].mxu1 }
 0x7b3   :  { %v4925_v5 = vadd.f32 %v11493_v6, %v4806_v28  ;;  %v4808_v21 = vpop.f32.mrb[93].mxu1 }
 0x7b4   :  { %v4926_v44 = vadd.f32 %v11496_v63, %v4808_v21  ;;  %v4810_v15 = vpop.f32.mrb[94].mxu1  ;;  %8401 = vmatprep.mubr.msk.bf16.mxu1 %vm2370_vm3, %v4990_v3 }
 0x7b5   :  { %v4927_v56 = vadd.f32 %v11493_v6, %v4810_v15  ;;  %v4812_v41 = vpop.f32.mrb[95].mxu1  ;;  %5251 = vmatmul.mubr.bf16.gmra.mrb[124].mxu1 %v4989_v29  ;;  %v4961_v12 = vmax.f32 %v4925_v5, 0.0 }
 0x7b6   :  { %v4928_v51 = vadd.f32 %v11496_v63, %v4812_v41  ;;  %v4962_v17 = vmax.f32 %v4926_v44, 0.0 }
 0x7b7   :  { %v4963_v31 = vmax.f32 %v4927_v56, 0.0 }
 0x7b8   :  { %v4964_v61 = vmax.f32 %v4928_v51, 0.0 }
 0x7b9   :  { %v4991_v37 = vpack.c.bf16 %v4963_v31, %v4961_v12 }
 0x7ba   :  { %v4992_v32 = vpack.c.bf16 %v4964_v61, %v4962_v17  ;;  %v4816_v39 = vpop.f32.mrb[96].mxu1 }
 0x7bb   :  { %v4929_v47 = vadd.f32 %v11493_v6, %v4816_v39  ;;  %v4818_v62 = vpop.f32.mrb[97].mxu1 }
 0x7bc   :  { %v4930_v19 = vadd.f32 %v11496_v63, %v4818_v62  ;;  %v4820_v45 = vpop.f32.mrb[98].mxu1  ;;  %8402 = vmatprep.mubr.msk.bf16.mxu1 %vm2370_vm3, %v4992_v32 }
 0x7bd   :  { %v4931_v8 = vadd.f32 %v11493_v6, %v4820_v45  ;;  %v4822_v57 = vpop.f32.mrb[99].mxu1  ;;  %5261 = vmatmul.mubr.bf16.gmra.mrb[128].mxu1 %v4991_v37  ;;  %v4965_v43 = vmax.f32 %v4929_v47, 0.0 }
 0x7be   :  { %v4932_v53 = vadd.f32 %v11496_v63, %v4822_v57  ;;  %v4966_v35 = vmax.f32 %v4930_v19, 0.0 }
 0x7bf   :  { %v4967_v20 = vmax.f32 %v4931_v8, 0.0 }
 0x7c0   :  { %v4968_v49 = vmax.f32 %v4932_v53, 0.0 }
 0x7c1   :  { %v4993_v7 = vpack.c.bf16 %v4967_v20, %v4965_v43 }
 0x7c2   :  { %v4994_v1 = vpack.c.bf16 %v4968_v49, %v4966_v35  ;;  %v4826_v9 = vpop.f32.mrb[100].mxu1  ;;  %v9690_v35 = vld [vmem:[%s12458_s10 + $0x4] ss:$8 sps:$4 sm:$0xff]  }
 0x7c3   :  { %v4933_v0 = vadd.f32 %v11493_v6, %v4826_v9  ;;  %v4828_v36 = vpop.f32.mrb[101].mxu1  ;;  %8421 = vmatprep.mubr.msk.bf16.mxu0 %vm5401_vm10, %v9690_v35  ;;  %v9710_v49 = vld [vmem:[%s12461_s13 + $0xc4] ss:$8 sps:$4 sm:$0xff]   ;;  %v9711_v9 = vld [vmem:[%s12461_s13 + $0xd0] ss:$8 sps:$4 sm:$0xff]  }
 0x7c4   :  { %v4934_v52 = vadd.f32 %v11496_v63, %v4828_v36  ;;  %v4830_v26 = vpop.f32.mrb[102].mxu1  ;;  %8403 = vmatprep.mubr.msk.bf16.mxu1 %vm2370_vm3, %v4994_v1  ;;  %v9713_v1 = vld [vmem:[%s12461_s13 + $0xd4] ss:$8 sps:$4 sm:$0xff]   ;;  %v9714_v36 = vld [vmem:[%s12461_s13 + $0xe0] ss:$8 sps:$4 sm:$0xff]  }
 0x7c5   :  { %v4935_v4 = vadd.f32 %v11493_v6, %v4830_v26  ;;  %v4832_v38 = vpop.f32.mrb[103].mxu1  ;;  %5271 = vmatmul.mubr.bf16.gmra.mrb[132].mxu1 %v4993_v7  ;;  %v4969_v54 = vmax.f32 %v4933_v0, 0.0  ;;  %v9708_v7 = vld [vmem:[%s12461_s13 + $0xc0] ss:$8 sps:$4 sm:$0xff]   ;;  %v9716_v0 = vld [vmem:[%s12461_s13 + $0xe4] ss:$8 sps:$4 sm:$0xff]  }
 0x7c6   :  { %v4936_v10 = vadd.f32 %v11496_v63, %v4832_v38  ;;  %v4970_v33 = vmax.f32 %v4934_v52, 0.0  ;;  %v9719_v52 = vld [vmem:[%s12461_s13 + $0xf4] ss:$8 sps:$4 sm:$0xff]   ;;  %v9717_v38 = vld [vmem:[%s12461_s13 + $0xf0] ss:$8 sps:$4 sm:$0xff]  }
 0x7c7   :  { %v4971_v18 = vmax.f32 %v4935_v4, 0.0 }
 0x7c8   :  { %v4972_v30 = vmax.f32 %v4936_v10, 0.0 }
 0x7c9   :  { %v4995_v24 = vpack.c.bf16 %v4971_v18, %v4969_v54  ;;  %v9722_v54 = vld [vmem:[%s12461_s13 + $0x104] ss:$8 sps:$4 sm:$0xff]  }
 0x7ca   :  { %v4996_v59 = vpack.c.bf16 %v4972_v30, %v4970_v33  ;;  %v4836_v50 = vpop.f32.mrb[104].mxu1 }
 0x7cb   :  { %v4937_v42 = vadd.f32 %v11493_v6, %v4836_v50  ;;  %v4838_v60 = vpop.f32.mrb[105].mxu1 }
 0x7cc   :  { %v4938_v23 = vadd.f32 %v11496_v63, %v4838_v60  ;;  %v4840_v48 = vpop.f32.mrb[106].mxu1  ;;  %8404 = vmatprep.mubr.msk.bf16.mxu1 %vm2370_vm3, %v4996_v59 }
 0x7cd   :  { %v4939_v22 = vadd.f32 %v11493_v6, %v4840_v48  ;;  %v4842_v25 = vpop.f32.mrb[107].mxu1  ;;  %5281 = vmatmul.mubr.bf16.gmra.mrb[136].mxu1 %v4995_v24  ;;  %v4973_v40 = vmax.f32 %v4937_v42, 0.0  ;;  %v9720_v24 = vld [vmem:[%s12461_s13 + $0x100] ss:$8 sps:$4 sm:$0xff]  }
 0x7ce   :  { %v4940_v58 = vadd.f32 %v11496_v63, %v4842_v25  ;;  %v4974_v2 = vmax.f32 %v4938_v23, 0.0 }
 0x7cf   :  { %v4975_v14 = vmax.f32 %v4939_v22, 0.0 }
 0x7d0   :  { %v4976_v27 = vmax.f32 %v4940_v58, 0.0 }
 0x7d1   :  { %v4997_v46 = vpack.c.bf16 %v4975_v14, %v4973_v40 }
 0x7d2   :  { %v4998_v11 = vpack.c.bf16 %v4976_v27, %v4974_v2  ;;  %v4846_v55 = vpop.f32.mrb[108].mxu1 }
 0x7d3   :  { %v4941_v16 = vadd.f32 %v11493_v6, %v4846_v55  ;;  %v4848_v29 = vpop.f32.mrb[109].mxu1 }
 0x7d4   :  { %v4942_v3 = vadd.f32 %v11496_v63, %v4848_v29  ;;  %v4850_v28 = vpop.f32.mrb[110].mxu1  ;;  %8405 = vmatprep.mubr.msk.bf16.mxu1 %vm2370_vm3, %v4998_v11 }
 0x7d5   :  { %v4943_v5 = vadd.f32 %v11493_v6, %v4850_v28  ;;  %v4852_v21 = vpop.f32.mrb[111].mxu1  ;;  %5291 = vmatmul.mubr.bf16.gmra.mrb[140].mxu1 %v4997_v46  ;;  %v4977_v15 = vmax.f32 %v4941_v16, 0.0 }
 0x7d6   :  { %v4944_v44 = vadd.f32 %v11496_v63, %v4852_v21  ;;  %v4978_v41 = vmax.f32 %v4942_v3, 0.0 }
 0x7d7   :  { %v4979_v56 = vmax.f32 %v4943_v5, 0.0 }
 0x7d8   :  { %v4980_v51 = vmax.f32 %v4944_v44, 0.0 }
 0x7d9   :  { %v4999_v12 = vpack.c.bf16 %v4979_v56, %v4977_v15 }
 0x7da   :  { %v5000_v31 = vpack.c.bf16 %v4980_v51, %v4978_v41  ;;  %v4856_v17 = vpop.f32.mrb[112].mxu1 }
 0x7db   :  { %v4945_v61 = vadd.f32 %v11493_v6, %v4856_v17  ;;  %v4858_v37 = vpop.f32.mrb[113].mxu1 }
 0x7dc   :  { %v4946_v32 = vadd.f32 %v11496_v63, %v4858_v37  ;;  %v4860_v39 = vpop.f32.mrb[114].mxu1  ;;  %8406 = vmatprep.mubr.msk.bf16.mxu1 %vm2370_vm3, %v5000_v31 }
 0x7dd   :  { %v4947_v47 = vadd.f32 %v11493_v6, %v4860_v39  ;;  %v4862_v62 = vpop.f32.mrb[115].mxu1  ;;  %5301 = vmatmul.mubr.bf16.gmra.mrb[144].mxu1 %v4999_v12  ;;  %v4981_v45 = vmax.f32 %v4945_v61, 0.0  ;;  %v9705_v6 = vld [vmem:[%s12461_s13 + $0xb0] ss:$8 sps:$4 sm:$0xff]  }
 0x7de   :  { %v4948_v19 = vadd.f32 %v11496_v63, %v4862_v62  ;;  %v4982_v57 = vmax.f32 %v4946_v32, 0.0  ;;  %v9707_v63 = vld [vmem:[%s12461_s13 + $0xb4] ss:$8 sps:$4 sm:$0xff]  }
 0x7df   :  { %v4983_v8 = vmax.f32 %v4947_v47, 0.0  ;;  %5933 = vmatprep.subr.bf16.mxu1 %v9707_v63 }
 0x7e0   :  { %v4984_v53 = vmax.f32 %v4948_v19, 0.0  ;;  %5934 = vmatpush1.bf16.msra.mxu1 %v9705_v6 }
 0x7e1   :  { %v5001_v43 = vpack.c.bf16 %v4983_v8, %v4981_v45  ;;  %5935 = vmatprep.subr.bf16.mxu1 %v9710_v49 }
 0x7e2   :  { %v5002_v20 = vpack.c.bf16 %v4984_v53, %v4982_v57 }
 0x7e4   :  { %8407 = vmatprep.mubr.msk.bf16.mxu1 %vm2370_vm3, %v5002_v20  ;;  %5936 = vmatpush1.bf16.msra.mxu1 %v9708_v7 }
 0x7e5   :  { %5311 = vmatmul.mubr.bf16.gmra.mrb[148].mxu1 %v5001_v43  ;;  %5937 = vmatprep.subr.bf16.mxu1 %v9713_v1 }
 0x7e8   :  { %5938 = vmatpush1.bf16.msra.mxu1 %v9711_v9  ;;  %v9688_v9 = vld [vmem:[%s12458_s10] ss:$8 sps:$4 sm:$0xff]  }
 0x7e9   :  { %5939 = vmatprep.subr.bf16.mxu1 %v9716_v0  ;;  %v9691_v0 = vld [vmem:[%s12458_s10 + $0x14] ss:$8 sps:$4 sm:$0xff]  }
 0x7ec   :  { %5940 = vmatpush1.bf16.msra.mxu1 %v9714_v36  ;;  %v12506_v36 = vmov 0  }
 0x7ed   :  { %5941 = vmatprep.subr.bf16.mxu1 %v9719_v52  ;;  %v9693_v52 = vld [vmem:[%s12458_s10 + $0x10] ss:$8 sps:$4 sm:$0xff]  }
 0x7f0   :  { %5942 = vmatpush1.bf16.msra.mxu1 %v9717_v38  ;;  %v9697_v38 = vld [vmem:[%s12458_s10 + $0x34] ss:$8 sps:$4 sm:$0xff]  }
 0x7f1   :  { %5943 = vmatprep.subr.bf16.mxu1 %v9722_v54  ;;  %v9700_v54 = vld [vmem:[%s12458_s10 + $0x44] ss:$8 sps:$4 sm:$0xff]  }
 0x7f4   :  { %5944 = vmatpush1.bf16.msra.mxu1 %v9720_v24 }
 0x878   :  { %v5232_v26 = vpop.f32.mrb[116].mxu1 }
 0x879   :  { %v5234_v4 = vpop.f32.mrb[117].mxu1 }
 0x87a   :  { %v5236_v10 = vpop.f32.mrb[118].mxu1 }
 0x87b   :  { %v5332_v18 = vpack.c.bf16 %v5236_v10, %v5232_v26  ;;  %v5238_v33 = vpop.f32.mrb[119].mxu1  ;;  %v9694_v26 = vld [vmem:[%s12458_s10 + $0x24] ss:$8 sps:$4 sm:$0xff]   ;;  %v9699_v10 = vld [vmem:[%s12458_s10 + $0x30] ss:$8 sps:$4 sm:$0xff]  }
 0x87c   :  { %v5333_v30 = vpack.c.bf16 %v5238_v33, %v5234_v4  ;;  %v9696_v4 = vld [vmem:[%s12458_s10 + $0x20] ss:$8 sps:$4 sm:$0xff]  }
 0x87d   :  { %v9702_v33 = vld [vmem:[%s12458_s10 + $0x40] ss:$8 sps:$4 sm:$0xff]  }
 0x87e   :  { %5426 = vmatprep.subr.bf16.mxu0 %v5333_v30 }
 0x87f   :  { %5427 = vmatpush1.bf16.msra.mxu0 %v5332_v18  ;;  %v5331_v18 = vld [vmem:[%s12458_s10 + $0x50] sm:$0xff] }
 0x880   :  { %v5242_v59 = vpop.f32.mrb[120].mxu1  ;;  %v8419_v30 = vcombine.high %v5331_v18, %v5331_v18  ;;  %v8418_v24 = vcombine.low %v5331_v18, %v5331_v18  ;;  %v5560_v18 = vld [vmem:[#allocation11 + $0x48] sm:$0xff] }
 0x881   :  { %v5244_v50 = vpop.f32.mrb[121].mxu1 }
 0x882   :  { %v5246_v42 = vpop.f32.mrb[122].mxu1 }
 0x883   :  { %v5334_v60 = vpack.c.bf16 %v5246_v42, %v5242_v59  ;;  %v5248_v23 = vpop.f32.mrb[123].mxu1  ;;  %v9723_v59 = vld [vmem:[%s12461_s13 + $0x110] ss:$8 sps:$4 sm:$0xff]   ;;  %v9726_v42 = vld [vmem:[%s12461_s13 + $0x120] ss:$8 sps:$4 sm:$0xff]  }
 0x884   :  { %v5335_v48 = vpack.c.bf16 %v5248_v23, %v5244_v50  ;;  %v9725_v50 = vld [vmem:[%s12461_s13 + $0x114] ss:$8 sps:$4 sm:$0xff]   ;;  %v9729_v23 = vld [vmem:[%s12461_s13 + $0x130] ss:$8 sps:$4 sm:$0xff]  }
 0x885   :  { %5945 = vmatprep.subr.bf16.mxu1 %v9725_v50 }
 0x886   :  { %5428 = vmatprep.subr.bf16.mxu0 %v5335_v48  ;;  %5946 = vmatpush1.bf16.msra.mxu1 %v9723_v59  ;;  %v9731_v48 = vld [vmem:[%s12461_s13 + $0x134] ss:$8 sps:$4 sm:$0xff]  }
 0x887   :  { %5429 = vmatpush1.bf16.msra.mxu0 %v5334_v60  ;;  %v9728_v60 = vld [vmem:[%s12461_s13 + $0x124] ss:$8 sps:$4 sm:$0xff]   ;;  %v5561_v59 = vld [vmem:[#allocation11 + $0x50] sm:$0xff] }
 0x888   :  { %v5252_v22 = vpop.f32.mrb[124].mxu1  ;;  %5947 = vmatprep.subr.bf16.mxu1 %v9728_v60 }
 0x889   :  { %v5254_v25 = vpop.f32.mrb[125].mxu1 }
 0x88a   :  { %v5256_v58 = vpop.f32.mrb[126].mxu1  ;;  %5948 = vmatpush1.bf16.msra.mxu1 %v9726_v42 }
 0x88b   :  { %v5336_v40 = vpack.c.bf16 %v5256_v58, %v5252_v22  ;;  %v5258_v14 = vpop.f32.mrb[127].mxu1  ;;  %5949 = vmatprep.subr.bf16.mxu1 %v9731_v48  ;;  %v9732_v22 = vld [vmem:[%s12461_s13 + $0x140] ss:$8 sps:$4 sm:$0xff]   ;;  %v9735_v58 = vld [vmem:[%s12461_s13 + $0x150] ss:$8 sps:$4 sm:$0xff]  }
 0x88c   :  { %v5337_v2 = vpack.c.bf16 %v5258_v14, %v5254_v25  ;;  %v9734_v25 = vld [vmem:[%s12461_s13 + $0x144] ss:$8 sps:$4 sm:$0xff]  }
 0x88d   :  { %v9740_v14 = vld [vmem:[%s12461_s13 + $0x4] ss:$8 sps:$4 sm:$0xff]  }
 0x88e   :  { %5430 = vmatprep.subr.bf16.mxu0 %v5337_v2  ;;  %5950 = vmatpush1.bf16.msra.mxu1 %v9729_v23  ;;  %v5517_v2 = vld [vmem:[%s12459_s11] sm:$0x3]  ;;  %v5562_v23 = vld [vmem:[#allocation11 + $0x58] sm:$0xff] }
 0x88f   :  { %5431 = vmatpush1.bf16.msra.mxu0 %v5336_v40  ;;  %5951 = vmatprep.subr.bf16.mxu1 %v9734_v25  ;;  %v9737_v40 = vld [vmem:[%s12461_s13 + $0x154] ss:$8 sps:$4 sm:$0xff]  }
 0x890   :  { %v5262_v27 = vpop.f32.mrb[128].mxu1 }
 0x891   :  { %v5264_v46 = vpop.f32.mrb[129].mxu1 }
 0x892   :  { %v5266_v11 = vpop.f32.mrb[130].mxu1  ;;  %5952 = vmatpush1.bf16.msra.mxu1 %v9732_v22 }
 0x893   :  { %v5338_v55 = vpack.c.bf16 %v5266_v11, %v5262_v27  ;;  %v5268_v16 = vpop.f32.mrb[131].mxu1  ;;  %5953 = vmatprep.subr.bf16.mxu1 %v9737_v40  ;;  %v11658_v27 = vrot.slane %v5517_v2, %v10615_v34 }
 0x894   :  { %v5339_v29 = vpack.c.bf16 %v5268_v16, %v5264_v46  ;;  %v11661_v46 = vrot.slane %v5517_v2, %v12505_v13 }
 0x896   :  { %5432 = vmatprep.subr.bf16.mxu0 %v5339_v29  ;;  %5954 = vmatpush1.bf16.msra.mxu1 %v9735_v58 }
 0x897   :  { %5433 = vmatpush1.bf16.msra.mxu0 %v5338_v55  ;;  %6148 = vmatprep.subr.bf16.mxu1 %v9740_v14  ;;  %v5551_v55 = vld [vmem:[#allocation11] sm:$0xff] }
 0x898   :  { %v5272_v3 = vpop.f32.mrb[132].mxu1 }
 0x899   :  { %v5274_v28 = vpop.f32.mrb[133].mxu1 }
 0x89a   :  { %v5276_v5 = vpop.f32.mrb[134].mxu1 }
 0x89b   :  { %v5340_v21 = vpack.c.bf16 %v5276_v5, %v5272_v3  ;;  %v5278_v44 = vpop.f32.mrb[135].mxu1  ;;  %v5552_v3 = vld [vmem:[#allocation11 + $0x8] sm:$0xff] }
 0x89c   :  { %v5341_v15 = vpack.c.bf16 %v5278_v44, %v5274_v28 }
 0x89e   :  { %5434 = vmatprep.subr.bf16.mxu0 %v5341_v15 }
 0x89f   :  { %5435 = vmatpush1.bf16.msra.mxu0 %v5340_v21  ;;  %v5553_v21 = vld [vmem:[#allocation11 + $0x10] sm:$0xff] }
 0x8a0   :  { %v5282_v56 = vpop.f32.mrb[136].mxu1 }
 0x8a1   :  { %v5284_v41 = vpop.f32.mrb[137].mxu1 }
 0x8a2   :  { %v5286_v51 = vpop.f32.mrb[138].mxu1 }
 0x8a3   :  { %v5342_v12 = vpack.c.bf16 %v5286_v51, %v5282_v56  ;;  %v5288_v31 = vpop.f32.mrb[139].mxu1 }
 0x8a4   :  { %v5343_v17 = vpack.c.bf16 %v5288_v31, %v5284_v41  ;;  %v5554_v41 = vld [vmem:[#allocation11 + $0x18] sm:$0xff] }
 0x8a6   :  { %5436 = vmatprep.subr.bf16.mxu0 %v5343_v17 }
 0x8a7   :  { %5437 = vmatpush1.bf16.msra.mxu0 %v5342_v12 }
 0x8a8   :  { %v5292_v61 = vpop.f32.mrb[140].mxu1 }
 0x8a9   :  { %v5294_v37 = vpop.f32.mrb[141].mxu1 }
 0x8aa   :  { %v5296_v32 = vpop.f32.mrb[142].mxu1 }
 0x8ab   :  { %v5344_v39 = vpack.c.bf16 %v5296_v32, %v5292_v61  ;;  %v5298_v47 = vpop.f32.mrb[143].mxu1  ;;  %v5555_v32 = vld [vmem:[#allocation11 + $0x20] sm:$0xff] }
 0x8ac   :  { %v5345_v62 = vpack.c.bf16 %v5298_v47, %v5294_v37 }
 0x8ae   :  { %5438 = vmatprep.subr.bf16.mxu0 %v5345_v62  ;;  %v5556_v62 = vld [vmem:[#allocation11 + $0x28] sm:$0xff] }
 0x8af   :  { %5439 = vmatpush1.bf16.msra.mxu0 %v5344_v39 }
 0x8b0   :  { %v5302_v19 = vpop.f32.mrb[144].mxu1 }
 0x8b1   :  { %v5304_v45 = vpop.f32.mrb[145].mxu1 }
 0x8b2   :  { %v5306_v8 = vpop.f32.mrb[146].mxu1 }
 0x8b3   :  { %v5346_v57 = vpack.c.bf16 %v5306_v8, %v5302_v19  ;;  %v5308_v53 = vpop.f32.mrb[147].mxu1  ;;  %v5557_v8 = vld [vmem:[#allocation11 + $0x30] sm:$0xff] }
 0x8b4   :  { %v5347_v43 = vpack.c.bf16 %v5308_v53, %v5304_v45 }
 0x8b6   :  { %5440 = vmatprep.subr.bf16.mxu0 %v5347_v43 }
 0x8b7   :  { %5441 = vmatpush1.bf16.msra.mxu0 %v5346_v57 }
 0x8b8   :  { %v5312_v20 = vpop.f32.mrb[148].mxu1 }
 0x8b9   :  { %v5314_v35 = vpop.f32.mrb[149].mxu1 }
 0x8ba   :  { %v5316_v6 = vpop.f32.mrb[150].mxu1 }
 0x8bb   :  { %v5348_v63 = vpack.c.bf16 %v5316_v6, %v5312_v20  ;;  %v5318_v49 = vpop.f32.mrb[151].mxu1  ;;  %v5558_v20 = vld [vmem:[#allocation11 + $0x38] sm:$0xff] }
 0x8bc   :  { %v5349_v7 = vpack.c.bf16 %v5318_v49, %v5314_v35 }
 0x8bd   :  { %v5421_v1 = vsel %vm2771_vm5, %v5348_v63, 0 }
 0x8be   :  { %8420 = vmatprep.subr.msk.bf16.mxu0 %vm2771_vm5, %v5349_v7 }
 0x8bf   :  { %5443 = vmatpush1.bf16.msra.mxu0 %v5421_v1 }
 0x8c0   :  { %7397 = vmatprep.subr.bf16.mxu0 %v12506_v36 }
 0x8c2   :  { %5459 = vmatmul.mubr.bf16.vlgmr.msra.gmra.mrb[84].mxu0 %v9688_v9 }
 0x8c3   :  { %8422 = vmatprep.mubr.msk.bf16.mxu0 %vm5401_vm10, %v9691_v0 }
 0x8ca   :  { %5469 = vmatmul.mubr.bf16.gmra.mrb[88].mxu0 %v9693_v52 }
 0x8cb   :  { %8423 = vmatprep.mubr.msk.bf16.mxu0 %vm5401_vm10, %v9694_v26 }
 0x8d2   :  { %5479 = vmatmul.mubr.bf16.gmra.mrb[92].mxu0 %v9696_v4  ;;  %v5559_v4 = vld [vmem:[#allocation11 + $0x40] sm:$0xff] }
 0x8d3   :  { %8424 = vmatprep.mubr.msk.bf16.mxu0 %vm5401_vm10, %v9697_v38 }
 0x8da   :  { %5489 = vmatmul.mubr.bf16.gmra.mrb[96].mxu0 %v9699_v10 }
 0x8db   :  { %8425 = vmatprep.mubr.msk.bf16.mxu0 %vm5401_vm10, %v9700_v54 }
 0x8e2   :  { %5499 = vmatmul.mubr.bf16.gmra.mrb[100].mxu0 %v9702_v33 }
 0x8e3   :  { %8426 = vmatprep.mubr.msk.bf16.mxu0 %vm5401_vm10, %v8419_v30 }
 0x8ea   :  { %5509 = vmatmul.mubr.bf16.gmra.mrb[104].mxu0 %v8418_v24 }
 0x995   :  { %v5460_v11 = vpop.f32.mrb[84].mxu0 }
 0x996   :  { %v5529_v16 = vmul.f32 %v11658_v27, %v5460_v11  ;;  %v5462_v29 = vpop.f32.mrb[85].mxu0 }
 0x997   :  { %v5530_v28 = vmul.f32 %v11661_v46, %v5462_v29  ;;  %v5464_v5 = vpop.f32.mrb[86].mxu0 }
 0x998   :  { %v11665_v44 = vadd.f32 %v5551_v55, %v5529_v16  ;;  %v5531_v15 = vmul.f32 %v11658_v27, %v5464_v5  ;;  %v5466_v56 = vpop.f32.mrb[87].mxu0 }
 0x999   :  { %v5574_v51 = vadd.f32 %v5552_v3, %v5530_v28  ;;  %v5532_v12 = vmul.f32 %v11661_v46, %v5466_v56 }
 0x99a   :  { %5595 = vst [vmem:[#allocation4] sm:$0xff] %v11665_v44  ;;  %v11670_v31 = vadd.f32 %v5553_v21, %v5531_v15 }
 0x99b   :  { %5597 = vst.msk [vmem:[#allocation4 + $0x8] sm:$0xff] %vm5596_vm11, %v5574_v51  ;;  %v5576_v17 = vadd.f32 %v5554_v41, %v5532_v12  ;;  %v5563_v51 = vld [vmem:[#allocation11 + $0x60] sm:$0xff] }
 0x99c   :  { %v5640_v61 = vpack.c.bf16 %v11670_v31, %v11665_v44  ;;  %v9782_v44 = vld [vmem:[%s12461_s13 + $0x194] ss:$8 sps:$4 sm:$0xff]  }
 0x99d   :  { %5599 = vst.msk [vmem:[#allocation4 + $0x18] sm:$0xff] %vm5596_vm11, %v5576_v17  ;;  %v5470_v37 = vpop.f32.mrb[88].mxu0 }
 0x99e   :  { %v5533_v39 = vmul.f32 %v11658_v27, %v5470_v37  ;;  %v5472_v47 = vpop.f32.mrb[89].mxu0 }
 0x99f   :  { %v5534_v19 = vmul.f32 %v11661_v46, %v5472_v47  ;;  %v5474_v45 = vpop.f32.mrb[90].mxu0 }
 0x9a0   :  { %v5577_v57 = vadd.f32 %v5555_v32, %v5533_v39  ;;  %v5535_v53 = vmul.f32 %v11658_v27, %v5474_v45  ;;  %v5476_v43 = vpop.f32.mrb[91].mxu0 }
 0x9a1   :  { %v5578_v35 = vadd.f32 %v5556_v62, %v5534_v19  ;;  %v5536_v6 = vmul.f32 %v11661_v46, %v5476_v43  ;;  %v5674_v63 = vld [vmem:[#allocation4] sm:$0xfe]  ;;  %v5564_v62 = vld [vmem:[#allocation11 + $0x68] sm:$0xff]  ;;  %v5565_v43 = vld [vmem:[#allocation11 + $0x70] sm:$0xff] }
 0x9a2   :  { %v5579_v49 = vadd.f32 %v5557_v8, %v5535_v53  ;;  %v5678_v7 = vpack.c.bf16 %v11670_v31, %v5674_v63  ;;  %v5675_v0 = vld [vmem:[#allocation4 + $0x8] sm:$0xfe]  ;;  %v6551_v29 = vld [vmem:[#allocation4] sm:$0xf8] }
 0x9a3   :  { %5601 = vst.msk [vmem:[#allocation4 + $0x28] sm:$0xff] %vm5596_vm11, %v5578_v35  ;;  %v5580_v1 = vadd.f32 %v5558_v20, %v5536_v6  ;;  %v6240_v22 = vld [vmem:[#allocation4 + $0x8] sm:$0xfc]  ;;  %v11702_v32 = vpack.c.bf16 %v11670_v31, %v6551_v29 }
 0x9a4   :  { %v11682_v9 = vld [vmem:[#allocation4 + $0x18] sm:$0xff]  ;;  %v11684_v52 = vpack.c.bf16 %v5579_v49, %v5577_v57  ;;  %v5708_v33 = vshll.u32 %v5678_v7, 16  ;;  %v6552_v14 = vld [vmem:[#allocation4 + $0x8] sm:$0xf8]  ;;  %v5706_v15 = vshrl.u32 %v5678_v7, 16 }
 0x9a5   :  { %5603 = vst.msk [vmem:[#allocation4 + $0x38] sm:$0xff] %vm5596_vm11, %v5580_v1  ;;  %v5480_v26 = vpop.f32.mrb[92].mxu0  ;;  %v5679_v38 = vpack.c.bf16 %v11682_v9, %v5675_v0  ;;  %v6244_v40 = vpack.c.bf16 %v11682_v9, %v6240_v22  ;;  %v6556_v16 = vpack.c.bf16 %v11682_v9, %v6552_v14  ;;  %v5566_v1 = vld [vmem:[#allocation11 + $0x78] sm:$0xff]  ;;  %v6583_v14 = vshrl.u32 %v11702_v32, 16 }
 0x9a6   :  { %v5537_v10 = vmul.f32 %v11658_v27, %v5480_v26  ;;  %v5482_v54 = vpop.f32.mrb[93].mxu0  ;;  %v5710_v11 = vrot.slane %v5708_v33, 1  ;;  %v5713_v55 = vshll.u32 %v11684_v52, 16  ;;  %v9738_v33 = vld [vmem:[%s12461_s13] ss:$8 sps:$4 sm:$0xff]  }
 0x9a7   :  { %v5538_v30 = vmul.f32 %v11661_v46, %v5482_v54  ;;  %v5484_v24 = vpop.f32.mrb[94].mxu0  ;;  %v5720_v48 = vshll.u32 %v5679_v38, 16  ;;  %v5718_v17 = vshrl.u32 %v5679_v38, 16  ;;  %v6285_v37 = vrot.slane %v6244_v40, 1 }
 0x9a8   :  { %v5581_v50 = vadd.f32 %v5559_v4, %v5537_v10  ;;  %v5539_v42 = vmul.f32 %v11658_v27, %v5484_v24  ;;  %v5486_v60 = vpop.f32.mrb[95].mxu0  ;;  %v5711_v19 = vor.u32 %v5710_v11, %v5706_v15  ;;  %v5715_v45 = vrot.slane %v5713_v55, 1  ;;  %v5567_v11 = vld [vmem:[#allocation11 + $0x80] sm:$0xff]  ;;  %v5568_v15 = vld [vmem:[#allocation11 + $0x88] sm:$0xff] }
 0x9a9   :  { %v5582_v25 = vadd.f32 %v5560_v18, %v5538_v30  ;;  %v5540_v58 = vmul.f32 %v11661_v46, %v5486_v60  ;;  %v5722_v21 = vrot.slane %v5720_v48, 1  ;;  %v6595_v8 = vshrl.u32 %v6556_v16, 16 }
 0x9aa   :  { %v5583_v2 = vadd.f32 %v5561_v59, %v5539_v42  ;;  %v5623_v28 = vld [vmem:[#allocation4 + $0x28] sm:$0xff]  ;;  %v6598_v6 = vshll.u32 %v6556_v16, 16  ;;  %v5729_v24 = vshrl.u32 %v11684_v52, 16  ;;  %v9743_v42 = vld [vmem:[%s12461_s13 + $0x14] ss:$8 sps:$4 sm:$0xff]   ;;  %v5716_v48 = vsel %vm3157_vm7, %v5711_v19, %v5715_v45 }
 0x9ab   :  { %5605 = vst.msk [vmem:[#allocation4 + $0x48] sm:$0xff] %vm5596_vm11, %v5582_v25  ;;  %v5584_v3 = vadd.f32 %v5562_v23, %v5540_v58  ;;  %v5723_v0 = vor.u32 %v5722_v21, %v5718_v17  ;;  %v11728_v60 = vrot.slane %v6595_v8, 1 }
 0x9ac   :  { %v5625_v5 = vld [vmem:[#allocation4 + $0x38] sm:$0xff]  ;;  %v11696_v56 = vpack.c.bf16 %v5583_v2, %v5581_v50  ;;  %v6600_v23 = vrot.slane %v6598_v6, 2  ;;  %v5731_v58 = vor.u32 %v5729_v24, %v5715_v45 }
 0x9ad   :  { %5607 = vst.msk [vmem:[#allocation4 + $0x58] sm:$0xff] %vm5596_vm11, %v5584_v3  ;;  %v5490_v41 = vpop.f32.mrb[96].mxu0  ;;  %v11699_v12 = vpack.c.bf16 %v5625_v5, %v5623_v28  ;;  %v6586_v28 = vshll.u32 %v11702_v32, 16  ;;  %v9746_v32 = vld [vmem:[%s12461_s13 + $0x24] ss:$8 sps:$4 sm:$0xff]  }
 0x9ae   :  { %v5541_v39 = vmul.f32 %v11658_v27, %v5490_v41  ;;  %v5492_v47 = vpop.f32.mrb[97].mxu0  ;;  %v5733_v26 = vshll.u32 %v11696_v56, 16  ;;  %v5745_v3 = vshrl.u32 %v11696_v56, 16  ;;  %v6601_v8 = vor.u32 %v6600_v23, %v11728_v60 }
 0x9af   :  { %v5542_v57 = vmul.f32 %v11661_v46, %v5492_v47  ;;  %v5494_v53 = vpop.f32.mrb[98].mxu0  ;;  %v5725_v20 = vshll.u32 %v11699_v12, 16  ;;  %v6286_v35 = vrot.slane %v11699_v12, 1  ;;  %v5737_v30 = vshrl.u32 %v11699_v12, 16 }
 0x9b0   :  { %v5585_v63 = vadd.f32 %v5563_v51, %v5541_v39  ;;  %v5543_v49 = vmul.f32 %v11658_v27, %v5494_v53  ;;  %v5496_v7 = vpop.f32.mrb[99].mxu0  ;;  %v5735_v29 = vrot.slane %v5733_v26, 1  ;;  %v9741_v51 = vld [vmem:[%s12461_s13 + $0x10] ss:$8 sps:$4 sm:$0xff]  }
 0x9b1   :  { %v5586_v4 = vadd.f32 %v5564_v62, %v5542_v57  ;;  %v5544_v38 = vmul.f32 %v11661_v46, %v5496_v7  ;;  %v5727_v10 = vrot.slane %v5725_v20, 1  ;;  %v11716_v54 = vsel %vm3827_vm9, %v6285_v37, %v6286_v35  ;;  %v5569_v62 = vld [vmem:[#allocation11 + $0x90] sm:$0xff] }
 0x9b2   :  { %v5587_v18 = vadd.f32 %v5565_v43, %v5543_v49  ;;  %v5627_v22 = vld [vmem:[#allocation4 + $0x48] sm:$0xff]  ;;  %v6602_v17 = vrot.slane %v5737_v30, 1  ;;  %v6603_v37 = vrot.slane %v5725_v20, 2  ;;  %v5570_v20 = vld [vmem:[#allocation11 + $0x98] sm:$0xff] }
 0x9b3   :  { %5609 = vst.msk [vmem:[#allocation4 + $0x68] sm:$0xff] %vm5596_vm11, %v5586_v4  ;;  %v5588_v59 = vadd.f32 %v5566_v1, %v5544_v38  ;;  %v5728_v50 = vsel %vm3157_vm7, %v5723_v0, %v5727_v10  ;;  %v5739_v41 = vor.u32 %v5737_v30, %v5727_v10  ;;  %v9744_v38 = vld [vmem:[%s12461_s13 + $0x20] ss:$8 sps:$4 sm:$0xff]  }
 0x9b4   :  { %8471 = vmatprep.mubr.msk.bf16.mxu1 %vm5596_vm11, %v5728_v50  ;;  %v5629_v25 = vld [vmem:[#allocation4 + $0x58] sm:$0xff]  ;;  %v11732_v40 = vpack.c.bf16 %v5587_v18, %v5585_v63  ;;  %v11755_v63 = vrot.slane %v6583_v14, 1  ;;  %v6604_v18 = vor.u32 %v6603_v37, %v6602_v17  ;;  %v5736_v50 = vsel %vm3157_vm7, %v5731_v58, %v5735_v29  ;;  %v5571_v14 = vld [vmem:[#allocation11 + $0xa0] sm:$0xff] }
 0x9b5   :  { %5611 = vst.msk [vmem:[#allocation4 + $0x78] sm:$0xff] %vm5596_vm11, %v5588_v59  ;;  %v5500_v2 = vpop.f32.mrb[100].mxu0  ;;  %5966 = vmatmul.mubr.bf16.vlgmr.msra.gmra.mrb[152].mxu1 %v5716_v48  ;;  %v11736_v16 = vpack.c.bf16 %v5629_v25, %v5627_v22  ;;  %v5747_v48 = vor.u32 %v5745_v3, %v5735_v29 }
 0x9b6   :  { %v5545_v5 = vmul.f32 %v11658_v27, %v5500_v2  ;;  %v5502_v21 = vpop.f32.mrb[101].mxu0  ;;  %6149 = vmatpush1.bf16.msra.mxu1 %v9738_v33  ;;  %v5749_v10 = vshll.u32 %v11732_v40, 16  ;;  %v6588_v33 = vrot.slane %v6586_v28, 2  ;;  %v11781_v25 = vsel %vm4174_vm8, %v6601_v8, %v6604_v18 }
 0x9b7   :  { %v5546_v39 = vmul.f32 %v11661_v46, %v5502_v21  ;;  %v5504_v47 = vpop.f32.mrb[102].mxu0  ;;  %v5741_v19 = vshll.u32 %v11736_v16, 16  ;;  %6150 = vmatprep.subr.bf16.mxu1 %v9743_v42  ;;  %v6290_v45 = vrot.slane %v11736_v16, 1  ;;  %v5753_v6 = vshrl.u32 %v11736_v16, 16 }
 0x9b8   :  { %v5589_v57 = vadd.f32 %v5567_v11, %v5545_v5  ;;  %v5547_v53 = vmul.f32 %v11658_v27, %v5504_v47  ;;  %v5506_v43 = vpop.f32.mrb[103].mxu0  ;;  %v6590_v42 = vrot.slane %v5729_v24, 1  ;;  %v6591_v24 = vrot.slane %v5713_v55, 2 }
 0x9b9   :  { %v5590_v49 = vadd.f32 %v5568_v15, %v5546_v39  ;;  %v5548_v7 = vmul.f32 %v11661_v46, %v5506_v43  ;;  %v5743_v1 = vrot.slane %v5741_v19, 1  ;;  %v11763_v0 = vsel %vm3827_vm9, %v6286_v35, %v6290_v45  ;;  %v9749_v35 = vld [vmem:[%s12461_s13 + $0x34] ss:$8 sps:$4 sm:$0xff]   ;;  %v5572_v15 = vld [vmem:[#allocation11 + $0xa8] sm:$0xff] }
 0x9ba   :  { %v5591_v4 = vadd.f32 %v5569_v62, %v5547_v53  ;;  %6151 = vmatpush1.bf16.msra.mxu1 %v9741_v51  ;;  %v5631_v60 = vld [vmem:[#allocation4 + $0x68] sm:$0xff]  ;;  %v5761_v11 = vshrl.u32 %v11732_v40, 16  ;;  %v6610_v28 = vrot.slane %v5753_v6, 1  ;;  %v6611_v5 = vrot.slane %v5741_v19, 2  ;;  %v9747_v51 = vld [vmem:[%s12461_s13 + $0x30] ss:$8 sps:$4 sm:$0xff]  }
 0x9bb   :  { %5613 = vst.msk [vmem:[#allocation4 + $0x88] sm:$0xff] %vm5596_vm11, %v5590_v49  ;;  %v5592_v30 = vadd.f32 %v5570_v20, %v5548_v7  ;;  %v5744_v59 = vsel %vm3157_vm7, %v5739_v41, %v5743_v1  ;;  %6152 = vmatprep.subr.bf16.mxu1 %v9746_v32  ;;  %v5755_v41 = vor.u32 %v5753_v6, %v5743_v1  ;;  %v11792_v55 = vrot.slane %v5749_v10, 1  ;;  %v6896_v49 = vld [vmem:[#allocation4 + $0x8] sm:$0xf0]  ;;  %v9750_v7 = vld [vmem:[%s12461_s13 + $0x40] ss:$8 sps:$4 sm:$0xff]  }
 0x9bc   :  { %8472 = vmatprep.mubr.msk.bf16.mxu1 %vm5596_vm11, %v5744_v59  ;;  %v5633_v23 = vld [vmem:[#allocation4 + $0x78] sm:$0xff]  ;;  %v11778_v22 = vpack.c.bf16 %v5591_v4, %v5589_v57  ;;  %v6589_v17 = vor.u32 %v6588_v33, %v11755_v63  ;;  %v6612_v63 = vor.u32 %v6611_v5, %v6610_v28  ;;  %v6606_v4 = vrot.slane %v5745_v3, 1 }
 0x9bd   :  { %5615 = vst.msk [vmem:[#allocation4 + $0x98] sm:$0xff] %vm5596_vm11, %v5592_v30  ;;  %v5510_v58 = vpop.f32.mrb[104].mxu0  ;;  %5976 = vmatmul.mubr.bf16.gmra.mrb[156].mxu1 %v5736_v50  ;;  %v11786_v2 = vpack.c.bf16 %v5633_v23, %v5631_v60  ;;  %v5752_v33 = vsel %vm3157_vm7, %v5747_v48, %v11792_v55  ;;  %v9755_v30 = vld [vmem:[%s12461_s13 + $0x54] ss:$8 sps:$4 sm:$0xff]   ;;  %v6607_v3 = vrot.slane %v5733_v26, 2  ;;  %v6614_v23 = vrot.slane %v5761_v11, 1 }
 0x9be   :  { %v5549_v29 = vmul.f32 %v11658_v27, %v5510_v58  ;;  %v5512_v21 = vpop.f32.mrb[105].mxu0  ;;  %6153 = vmatpush1.bf16.msra.mxu1 %v9744_v38  ;;  %v9752_v27 = vld [vmem:[%s12461_s13 + $0x44] ss:$8 sps:$4 sm:$0xff]   ;;  %v5765_v62 = vshll.u32 %v11778_v22, 16  ;;  %v5777_v53 = vshrl.u32 %v11778_v22, 16  ;;  %v6900_v38 = vpack.c.bf16 %v11682_v9, %v6896_v49 }
 0x9bf   :  { %v5550_v37 = vmul.f32 %v11661_v46, %v5512_v21  ;;  %v5514_v39 = vpop.f32.mrb[106].mxu0  ;;  %v5757_v47 = vshll.u32 %v11786_v2, 16  ;;  %6154 = vmatprep.subr.bf16.mxu1 %v9749_v35  ;;  %v6294_v19 = vrot.slane %v11786_v2, 1  ;;  %v5769_v57 = vshrl.u32 %v11786_v2, 16 }
 0x9c0   :  { %v11805_v32 = vadd.f32 %v5571_v14, %v5549_v29  ;;  %v5515_v8 = vpop.f32.mrb[107].mxu0  ;;  %v6592_v46 = vor.u32 %v6591_v24, %v6590_v42  ;;  %v11832_v59 = vsel %vm4174_vm8, %v6604_v18, %v6612_v63  ;;  %v6615_v48 = vrot.slane %v5749_v10, 2  ;;  %v9753_v14 = vld [vmem:[%s12461_s13 + $0x50] ss:$8 sps:$4 sm:$0xff]  }
 0x9c1   :  { %v5594_v43 = vadd.f32 %v5572_v15, %v5550_v37  ;;  %v5759_v20 = vrot.slane %v5757_v47, 1  ;;  %v11812_v6 = vsel %vm3827_vm9, %v6290_v45, %v6294_v19  ;;  %v6618_v35 = vrot.slane %v5769_v57, 1 }
 0x9c2   :  { %5616 = vst [vmem:[#allocation4 + $0xa0] sm:$0xff] %v11805_v32  ;;  %6155 = vmatpush1.bf16.msra.mxu1 %v9747_v51  ;;  %v11819_v1 = vsel %vm4174_vm8, %v6589_v17, %v6592_v46  ;;  %v5635_v50 = vld [vmem:[#allocation4 + $0x88] sm:$0xff]  ;;  %v6619_v60 = vrot.slane %v5757_v47, 2  ;;  %v6608_v18 = vor.u32 %v6607_v3, %v6606_v4  ;;  %v6622_v58 = vrot.slane %v5777_v53, 1  ;;  %v9759_v3 = vld [vmem:[%s12461_s13 + $0x70] ss:$8 sps:$4 sm:$0xff]  }
 0x9c3   :  { %5617 = vst.msk [vmem:[#allocation4 + $0xa8] sm:$0xff] %vm5596_vm11, %v5594_v43  ;;  %v5760_v45 = vsel %vm3157_vm7, %v5755_v41, %v5759_v20  ;;  %6156 = vmatprep.subr.bf16.mxu1 %v9752_v27  ;;  %v6623_v26 = vrot.slane %v5765_v62, 2  ;;  %v6616_v5 = vor.u32 %v6615_v48, %v6614_v23  ;;  %v6933_v29 = vrot.slane %v6900_v38, 2  ;;  %v9758_v41 = vld [vmem:[%s12461_s13 + $0x64] ss:$8 sps:$4 sm:$0xff]  }
 0x9c4   :  { %8473 = vmatprep.mubr.msk.bf16.mxu1 %vm5596_vm11, %v5760_v45  ;;  %v5637_v42 = vld [vmem:[#allocation4 + $0x98] sm:$0xff]  ;;  %v6620_v28 = vor.u32 %v6619_v60, %v6618_v35  ;;  %v6934_v21 = vrot.slane %v11699_v12, 2  ;;  %v5767_v15 = vrot.slane %v5765_v62, 1  ;;  %v11855_v17 = vsel %vm4174_vm8, %v6592_v46, %v6608_v18  ;;  %v9764_v60 = vld [vmem:[%s12461_s13 + $0x84] ss:$8 sps:$4 sm:$0xff]  }
 0x9c5   :  { %5986 = vmatmul.mubr.bf16.gmra.mrb[160].mxu1 %v5752_v33  ;;  %v11841_v24 = vpack.c.bf16 %v5637_v42, %v5635_v50  ;;  %v11861_v39 = vsel %vm4174_vm8, %v6608_v18, %v6616_v5  ;;  %v11863_v47 = vor.u32 %v6623_v26, %v6622_v58  ;;  %v5771_v62 = vor.u32 %v5769_v57, %v5759_v20  ;;  %v9761_v45 = vld [vmem:[%s12461_s13 + $0x74] ss:$8 sps:$4 sm:$0xff]  }
 0x9c6   :  { %6157 = vmatpush1.bf16.msra.mxu1 %v9750_v7  ;;  %v11858_v37 = vsel %vm4174_vm8, %v6612_v63, %v6620_v28  ;;  %v11866_v27 = vsel %vm2771_vm5, %v6933_v29, %v6934_v21  ;;  %v5763_v63 = vor.u32 %v5761_v11, %v11792_v55  ;;  %v9756_v7 = vld [vmem:[%s12461_s13 + $0x60] ss:$8 sps:$4 sm:$0xff]   ;;  %v5779_v26 = vor.u32 %v5777_v53, %v5767_v15 }
 0x9c7   :  { %v5773_v10 = vshll.u32 %v11841_v24, 16  ;;  %6158 = vmatprep.subr.bf16.mxu1 %v9755_v30  ;;  %v6298_v51 = vrot.slane %v11841_v24, 1  ;;  %v5785_v43 = vshrl.u32 %v11841_v24, 16  ;;  %v11882_v20 = vsel %vm4174_vm8, %v6616_v5, %v11863_v47  ;;  %v9767_v5 = vld [vmem:[%s12461_s13 + $0x94] ss:$8 sps:$4 sm:$0xff]  }
 0x9c8   :  { %v5768_v11 = vsel %vm3157_vm7, %v5763_v63, %v5767_v15  ;;  %v6942_v53 = vrot.slane %v11786_v2, 2  ;;  %v9770_v63 = vld [vmem:[%s12461_s13 + $0xa4] ss:$8 sps:$4 sm:$0xff]  }
 0x9c9   :  { %v5775_v8 = vrot.slane %v5773_v10, 1  ;;  %v5676_v49 = vld [vmem:[#allocation4 + $0xa0] sm:$0x1f]  ;;  %v11872_v46 = vsel %vm3827_vm9, %v6294_v19, %v6298_v51  ;;  %v6626_v30 = vrot.slane %v5785_v43, 1  ;;  %v6627_v50 = vrot.slane %v5773_v10, 2 }
 0x9ca   :  { %6159 = vmatpush1.bf16.msra.mxu1 %v9753_v14  ;;  %v5677_v4 = vld [vmem:[#allocation4 + $0xa8] sm:$0x1f]  ;;  %v5680_v57 = vpack.c.bf16 %v5676_v49, %v5676_v49  ;;  %v6938_v10 = vrot.slane %v11736_v16, 2 }
 0x9cb   :  { %v5776_v38 = vsel %vm3157_vm7, %v5771_v62, %v5775_v8  ;;  %6160 = vmatprep.subr.bf16.mxu1 %v9758_v41  ;;  %v5681_v19 = vpack.c.bf16 %v5677_v4, %v5677_v4  ;;  %v5787_v42 = vor.u32 %v5785_v43, %v5775_v8  ;;  %v11897_v58 = vor.u32 %v6627_v50, %v6626_v30  ;;  %v9762_v14 = vld [vmem:[%s12461_s13 + $0x80] ss:$8 sps:$4 sm:$0xff]   ;;  %v9791_v50 = vld [vmem:[%s12461_s13 + $0x1c4] ss:$8 sps:$4 sm:$0xff]  }
 0x9cc   :  { %8474 = vmatprep.mubr.msk.bf16.mxu1 %vm5596_vm11, %v5776_v38  ;;  %v5781_v55 = vshll.u32 %v5680_v57, 16  ;;  %v11916_v15 = vsel %vm2771_vm5, %v6934_v21, %v6938_v10  ;;  %v6946_v8 = vrot.slane %v11841_v24, 2  ;;  %v11924_v43 = vsel %vm2771_vm5, %v6938_v10, %v6942_v53  ;;  %v5619_v38 = vld [vmem:[#allocation4 + $0x8] sm:$0xff]  ;;  %v5638_v10 = vld [vmem:[#allocation4 + $0xa0] sm:$0xf] }
 0x9cd   :  { %5996 = vmatmul.mubr.bf16.gmra.mrb[164].mxu1 %v5768_v11  ;;  %v5789_v33 = vshll.u32 %v5681_v19, 16  ;;  %v5796_v48 = vshrl.u32 %v5681_v19, 16  ;;  %v11910_v29 = vsel %vm4174_vm8, %v6620_v28, %v11897_v58  ;;  %v9765_v28 = vld [vmem:[%s12461_s13 + $0x90] ss:$8 sps:$4 sm:$0xff]   ;;  %v5793_v49 = vshrl.u32 %v5680_v57, 16 }
 0x9ce   :  { %6161 = vmatpush1.bf16.msra.mxu1 %v9756_v7  ;;  %v5783_v23 = vrot.slane %v5781_v55, 1  ;;  %v11932_v21 = vsel %vm2771_vm5, %v6942_v53, %v6946_v8  ;;  %v9768_v7 = vld [vmem:[%s12461_s13 + $0xa0] ss:$8 sps:$4 sm:$0xff]   ;;  %v9773_v57 = vld [vmem:[%s12461_s13 + $0x164] ss:$8 sps:$4 sm:$0xff]   ;;  %v5641_v19 = vpack.c.bf16 %v11682_v9, %v5619_v38 }
 0x9cf   :  { %v5791_v35 = vrot.slane %v5789_v33, 1  ;;  %6162 = vmatprep.subr.bf16.mxu1 %v9761_v45  ;;  %v9771_v45 = vld [vmem:[%s12461_s13 + $0x160] ss:$8 sps:$4 sm:$0xff]   ;;  %v9776_v11 = vld [vmem:[%s12461_s13 + $0x174] ss:$8 sps:$4 sm:$0xff]  }
 0x9d0   :  { %v5784_v41 = vsel %vm3157_vm7, %v5779_v26, %v5783_v23  ;;  %v5795_v4 = vor.u32 %v5793_v49, %v5783_v23  ;;  %v9774_v9 = vld [vmem:[%s12461_s13 + $0x170] ss:$8 sps:$4 sm:$0xff]   ;;  %v9779_v55 = vld [vmem:[%s12461_s13 + $0x184] ss:$8 sps:$4 sm:$0xff]   ;;  %v9777_v33 = vld [vmem:[%s12461_s13 + $0x180] ss:$8 sps:$4 sm:$0xff]  }
 0x9d1   :  { %v5792_v18 = vsel %vm3157_vm7, %v5787_v42, %v5791_v35  ;;  %v5798_v62 = vor.u32 %v5796_v48, %v5791_v35  ;;  %v9783_v30 = vld [vmem:[%s12461_s13 + $0x1a0] ss:$8 sps:$4 sm:$0xff]   ;;  %v9792_v35 = vld [vmem:[%s12461_s13 + $0x1d0] ss:$8 sps:$4 sm:$0xff]   ;;  %v9809_v38 = vld [vmem:[%s12461_s13 + $0x224] ss:$8 sps:$4 sm:$0xff]  }
 0x9d2   :  { %8475 = vmatprep.mubr.msk.bf16.mxu1 %vm5596_vm11, %v5792_v18  ;;  %6163 = vmatpush1.bf16.msra.mxu1 %v9759_v3  ;;  %v9786_v3 = vld [vmem:[%s12461_s13 + $0x1b0] ss:$8 sps:$4 sm:$0xff]   ;;  %v9789_v42 = vld [vmem:[%s12461_s13 + $0x1c0] ss:$8 sps:$4 sm:$0xff]   ;;  %v9800_v18 = vld [vmem:[%s12461_s13 + $0x1f4] ss:$8 sps:$4 sm:$0xff]  }
 0x9d3   :  { %6164 = vmatprep.subr.bf16.mxu1 %v9764_v60  ;;  %v9797_v60 = vld [vmem:[%s12461_s13 + $0x1e4] ss:$8 sps:$4 sm:$0xff]   ;;  %v5639_v23 = vld [vmem:[#allocation4 + $0xa8] sm:$0xf] }
 0x9d4   :  { %v9795_v48 = vld [vmem:[%s12461_s13 + $0x1e0] ss:$8 sps:$4 sm:$0xff]   ;;  %v5651_v26 = vpack.c.bf16 %v5639_v23, %v5639_v23 }
 0x9d5   :  { %6006 = vmatmul.mubr.bf16.gmra.mrb[168].mxu1 %v5784_v41  ;;  %v9801_v41 = vld [vmem:[%s12461_s13 + $0x200] ss:$8 sps:$4 sm:$0xff]  }
 0x9d6   :  { %8476 = vmatprep.mubr.msk.bf16.mxu1 %vm5596_vm11, %v5798_v62  ;;  %6165 = vmatpush1.bf16.msra.mxu1 %v9762_v14  ;;  %v9798_v14 = vld [vmem:[%s12461_s13 + $0x1f0] ss:$8 sps:$4 sm:$0xff]   ;;  %v5650_v62 = vpack.c.bf16 %v5638_v10, %v5638_v10  ;;  %v6239_v53 = vld [vmem:[#allocation4] sm:$0xfc] }
 0x9d7   :  { %6166 = vmatprep.subr.bf16.mxu1 %v9767_v5  ;;  %v9803_v5 = vld [vmem:[%s12461_s13 + $0x204] ss:$8 sps:$4 sm:$0xff]   ;;  %v6243_v49 = vpack.c.bf16 %v11670_v31, %v6239_v53  ;;  %v9828_v10 = vld [vmem:[%s12461_s13 + $0x290] ss:$8 sps:$4 sm:$0xff]   ;;  %v9836_v53 = vld [vmem:[%s12461_s13 + $0x2b4] ss:$8 sps:$4 sm:$0xff]  }
 0x9da   :  { %6167 = vmatpush1.bf16.msra.mxu1 %v9765_v28  ;;  %v9806_v28 = vld [vmem:[%s12461_s13 + $0x214] ss:$8 sps:$4 sm:$0xff]  }
 0x9db   :  { %6168 = vmatprep.subr.bf16.mxu1 %v9770_v63  ;;  %v6283_v63 = vrot.slane %v11684_v52, 1 }
 0x9dd   :  { %6016 = vmatmul.mubr.bf16.gmra.mrb[172].mxu1 %v5795_v4  ;;  %v9804_v4 = vld [vmem:[%s12461_s13 + $0x210] ss:$8 sps:$4 sm:$0xff]  }
 0x9de   :  { %8499 = vmatprep.mubr.msk.bf16.mxu1 %vm5596_vm11, %v5641_v19  ;;  %6169 = vmatpush1.bf16.msra.mxu1 %v9768_v7  ;;  %v6282_v7 = vrot.slane %v6243_v49, 1  ;;  %v9812_v19 = vld [vmem:[%s12461_s13 + $0x234] ss:$8 sps:$4 sm:$0xff]   ;;  %v9839_v49 = vld [vmem:[%s12461_s13 + $0x2c4] ss:$8 sps:$4 sm:$0xff]  }
 0x9df   :  { %6438 = vmatprep.subr.bf16.mxu1 %v9773_v57 }
 0x9e0   :  { %v6284_v57 = vsel %vm3827_vm9, %v6282_v7, %v6283_v63  ;;  %v9842_v7 = vld [vmem:[%s12461_s13 + $0x2d4] ss:$8 sps:$4 sm:$0xff]  }
 0x9e5   :  { %6181 = vmatmul.mubr.bf16.vlgmr.msra.gmra.mrb[152].mxu1 %v5640_v61  ;;  %v9780_v61 = vld [vmem:[%s12461_s13 + $0x190] ss:$8 sps:$4 sm:$0xff]  }
 0x9e6   :  { %8500 = vmatprep.mubr.msk.bf16.mxu1 %vm5596_vm11, %v11699_v12  ;;  %6439 = vmatpush1.bf16.msra.mxu1 %v9771_v45  ;;  %v9785_v12 = vld [vmem:[%s12461_s13 + $0x1a4] ss:$8 sps:$4 sm:$0xff]   ;;  %v6288_v45 = vrot.slane %v11696_v56, 1 }
 0x9e7   :  { %6440 = vmatprep.subr.bf16.mxu1 %v9776_v11  ;;  %v9810_v11 = vld [vmem:[%s12461_s13 + $0x230] ss:$8 sps:$4 sm:$0xff]  }
 0x9ea   :  { %6441 = vmatpush1.bf16.msra.mxu1 %v9774_v9  ;;  %v6289_v9 = vsel %vm3827_vm9, %v6283_v63, %v6288_v45  ;;  %v9837_v63 = vld [vmem:[%s12461_s13 + $0x2c0] ss:$8 sps:$4 sm:$0xff]  }
 0x9eb   :  { %6442 = vmatprep.subr.bf16.mxu1 %v9779_v55  ;;  %v9813_v55 = vld [vmem:[%s12461_s13 + $0x240] ss:$8 sps:$4 sm:$0xff]  }
 0x9ed   :  { %6191 = vmatmul.mubr.bf16.gmra.mrb[156].mxu1 %v11684_v52 }
 0x9ee   :  { %8501 = vmatprep.mubr.msk.bf16.mxu1 %vm5596_vm11, %v11736_v16  ;;  %6443 = vmatpush1.bf16.msra.mxu1 %v9777_v33  ;;  %v9788_v16 = vld [vmem:[%s12461_s13 + $0x1b4] ss:$8 sps:$4 sm:$0xff]  }
 0x9ef   :  { %6444 = vmatprep.subr.bf16.mxu1 %v9782_v44  ;;  %v9818_v33 = vld [vmem:[%s12461_s13 + $0x254] ss:$8 sps:$4 sm:$0xff]   ;;  %v6292_v44 = vrot.slane %v11732_v40, 1 }
 0x9f2   :  { %6445 = vmatpush1.bf16.msra.mxu1 %v9780_v61  ;;  %v9816_v61 = vld [vmem:[%s12461_s13 + $0x250] ss:$8 sps:$4 sm:$0xff]  }
 0x9f3   :  { %6446 = vmatprep.subr.bf16.mxu1 %v9785_v12  ;;  %v6242_v12 = vld [vmem:[#allocation4 + $0xa8] sm:$0x3f] }
 0x9f5   :  { %6201 = vmatmul.mubr.bf16.gmra.mrb[160].mxu1 %v11696_v56 }
 0x9f6   :  { %8502 = vmatprep.mubr.msk.bf16.mxu1 %vm5596_vm11, %v11786_v2  ;;  %6447 = vmatpush1.bf16.msra.mxu1 %v9783_v30  ;;  %v9794_v2 = vld [vmem:[%s12461_s13 + $0x1d4] ss:$8 sps:$4 sm:$0xff]   ;;  %v6293_v30 = vsel %vm3827_vm9, %v6288_v45, %v6292_v44 }
 0x9f7   :  { %6448 = vmatprep.subr.bf16.mxu1 %v9788_v16  ;;  %v6246_v16 = vpack.c.bf16 %v6242_v12, %v6242_v12 }
 0x9fa   :  { %6449 = vmatpush1.bf16.msra.mxu1 %v9786_v3  ;;  %v9819_v3 = vld [vmem:[%s12461_s13 + $0x260] ss:$8 sps:$4 sm:$0xff]  }
 0x9fb   :  { %6450 = vmatprep.subr.bf16.mxu1 %v9791_v50  ;;  %v9824_v50 = vld [vmem:[%s12461_s13 + $0x274] ss:$8 sps:$4 sm:$0xff]  }
 0x9fd   :  { %6211 = vmatmul.mubr.bf16.gmra.mrb[164].mxu1 %v11732_v40 }
 0x9fe   :  { %8503 = vmatprep.mubr.msk.bf16.mxu1 %vm5596_vm11, %v11841_v24  ;;  %6451 = vmatpush1.bf16.msra.mxu1 %v9789_v42  ;;  %v6296_v42 = vrot.slane %v11778_v22, 1  ;;  %v9872_v24 = vld [vmem:[%s12463_s15 + $0x10] sm:$0xff]  }
 0x9ff   :  { %6452 = vmatprep.subr.bf16.mxu1 %v9794_v2  ;;  %v6302_v2 = vrot.slane %v6246_v16, 1 }
 0xa00   :  { %v6297_v23 = vsel %vm3827_vm9, %v6292_v44, %v6296_v42  ;;  %v9852_v44 = vld [vmem:[%s12461_s13 + $0x310] ss:$8 sps:$4 sm:$0xff]  }
 0xa02   :  { %6453 = vmatpush1.bf16.msra.mxu1 %v9792_v35  ;;  %v6241_v35 = vld [vmem:[#allocation4 + $0xa0] sm:$0x3f] }
 0xa03   :  { %6454 = vmatprep.subr.bf16.mxu1 %v9797_v60  ;;  %v9822_v60 = vld [vmem:[%s12461_s13 + $0x270] ss:$8 sps:$4 sm:$0xff]  }
 0xa05   :  { %6221 = vmatmul.mubr.bf16.gmra.mrb[168].mxu1 %v11778_v22 }
 0xa06   :  { %8504 = vmatprep.mubr.msk.bf16.mxu1 %vm5596_vm11, %v5651_v26  ;;  %6455 = vmatpush1.bf16.msra.mxu1 %v9795_v48  ;;  %v6245_v48 = vpack.c.bf16 %v6241_v35, %v6241_v35  ;;  %v9825_v26 = vld [vmem:[%s12461_s13 + $0x280] ss:$8 sps:$4 sm:$0xff]  }
 0xa07   :  { %6456 = vmatprep.subr.bf16.mxu1 %v9800_v18  ;;  %v6303_v18 = vsel %vm3827_vm9, %v6298_v51, %v6302_v2  ;;  %v9833_v51 = vld [vmem:[%s12461_s13 + $0x2a4] ss:$8 sps:$4 sm:$0xff]  }
 0xa0a   :  { %6457 = vmatpush1.bf16.msra.mxu1 %v9798_v14  ;;  %v9830_v14 = vld [vmem:[%s12461_s13 + $0x294] ss:$8 sps:$4 sm:$0xff]  }
 0xa0b   :  { %6458 = vmatprep.subr.bf16.mxu1 %v9803_v5  ;;  %v6300_v5 = vrot.slane %v6245_v48, 1  ;;  %v9867_v48 = vld [vmem:[%s12461_s13 + $0x360] ss:$8 sps:$4 sm:$0xff]  }
 0xa0d   :  { %6231 = vmatmul.mubr.bf16.gmra.mrb[176].mxu1 %v5650_v62  ;;  %v9831_v62 = vld [vmem:[%s12461_s13 + $0x2a0] ss:$8 sps:$4 sm:$0xff]  }
 0xa0e   :  { %8549 = vmatprep.mubr.msk.bf16.mxu1 %vm5596_vm11, %v11716_v54  ;;  %6459 = vmatpush1.bf16.msra.mxu1 %v9801_v41  ;;  %v9807_v54 = vld [vmem:[%s12461_s13 + $0x220] ss:$8 sps:$4 sm:$0xff]   ;;  %v6301_v41 = vsel %vm3827_vm9, %v6296_v42, %v6300_v5  ;;  %v9858_v42 = vld [vmem:[%s12461_s13 + $0x330] ss:$8 sps:$4 sm:$0xff]  }
 0xa0f   :  { %6782 = vmatprep.subr.bf16.mxu1 %v9806_v28  ;;  %v9834_v28 = vld [vmem:[%s12461_s13 + $0x2b0] ss:$8 sps:$4 sm:$0xff]  }
 0xa15   :  { %6471 = vmatmul.mubr.bf16.vlgmr.msra.gmra.mrb[152].mxu1 %v6284_v57  ;;  %v6554_v57 = vld [vmem:[#allocation4 + $0xa8] sm:$0x7f] }
 0xa16   :  { %8550 = vmatprep.mubr.msk.bf16.mxu1 %vm5596_vm11, %v11763_v0  ;;  %6783 = vmatpush1.bf16.msra.mxu1 %v9804_v4  ;;  %v9815_v0 = vld [vmem:[%s12461_s13 + $0x244] ss:$8 sps:$4 sm:$0xff]  }
 0xa17   :  { %6784 = vmatprep.subr.bf16.mxu1 %v9809_v38  ;;  %v9845_v4 = vld [vmem:[%s12461_s13 + $0x2e4] ss:$8 sps:$4 sm:$0xff]   ;;  %v9843_v38 = vld [vmem:[%s12461_s13 + $0x2e0] ss:$8 sps:$4 sm:$0xff]  }
 0xa1a   :  { %6785 = vmatpush1.bf16.msra.mxu1 %v9807_v54  ;;  %v9846_v54 = vld [vmem:[%s12461_s13 + $0x2f0] ss:$8 sps:$4 sm:$0xff]  }
 0xa1b   :  { %6786 = vmatprep.subr.bf16.mxu1 %v9812_v19  ;;  %v9851_v19 = vld [vmem:[%s12461_s13 + $0x304] ss:$8 sps:$4 sm:$0xff]  }
 0xa1d   :  { %6481 = vmatmul.mubr.bf16.gmra.mrb[156].mxu1 %v6289_v9 }
 0xa1e   :  { %8551 = vmatprep.mubr.msk.bf16.mxu1 %vm5596_vm11, %v11812_v6  ;;  %6787 = vmatpush1.bf16.msra.mxu1 %v9810_v11  ;;  %v9821_v6 = vld [vmem:[%s12461_s13 + $0x264] ss:$8 sps:$4 sm:$0xff]  }
 0xa1f   :  { %6788 = vmatprep.subr.bf16.mxu1 %v9815_v0  ;;  %v6553_v0 = vld [vmem:[#allocation4 + $0xa0] sm:$0x7f] }
 0xa20   :  { %v6557_v9 = vpack.c.bf16 %v6553_v0, %v6553_v0 }
 0xa22   :  { %6789 = vmatpush1.bf16.msra.mxu1 %v9813_v55  ;;  %v6631_v12 = vshrl.u32 %v6557_v9, 16 }
 0xa23   :  { %6790 = vmatprep.subr.bf16.mxu1 %v9818_v33 }
 0xa24   :  { %v6633_v16 = vrot.slane %v6631_v12, 1 }
 0xa25   :  { %6491 = vmatmul.mubr.bf16.gmra.mrb[160].mxu1 %v6293_v30 }
 0xa26   :  { %8552 = vmatprep.mubr.msk.bf16.mxu1 %vm5596_vm11, %v11872_v46  ;;  %6791 = vmatpush1.bf16.msra.mxu1 %v9816_v61  ;;  %v9827_v46 = vld [vmem:[%s12461_s13 + $0x284] ss:$8 sps:$4 sm:$0xff]  }
 0xa27   :  { %6792 = vmatprep.subr.bf16.mxu1 %v9821_v6  ;;  %v9857_v61 = vld [vmem:[%s12461_s13 + $0x324] ss:$8 sps:$4 sm:$0xff]   ;;  %v6634_v6 = vshll.u32 %v6557_v9, 16 }
 0xa2a   :  { %6793 = vmatpush1.bf16.msra.mxu1 %v9819_v3  ;;  %v6636_v3 = vrot.slane %v6634_v6, 2 }
 0xa2b   :  { %6794 = vmatprep.subr.bf16.mxu1 %v9824_v50 }
 0xa2c   :  { %v6637_v35 = vor.u32 %v6636_v3, %v6633_v16 }
 0xa2d   :  { %6501 = vmatmul.mubr.bf16.gmra.mrb[164].mxu1 %v6297_v23  ;;  %v9869_v23 = vld [vmem:[%s12461_s13 + $0x364] ss:$8 sps:$4 sm:$0xff]  }
 0xa2e   :  { %8553 = vmatprep.mubr.msk.bf16.mxu1 %vm5596_vm11, %v6303_v18  ;;  %6795 = vmatpush1.bf16.msra.mxu1 %v9822_v60  ;;  %v6638_v60 = vsel %vm4174_vm8, %v11863_v47, %v6637_v35  ;;  %v6895_v47 = vld [vmem:[#allocation4] sm:$0xf0] }
 0xa2f   :  { %6796 = vmatprep.subr.bf16.mxu1 %v9827_v46  ;;  %v9864_v46 = vld [vmem:[%s12461_s13 + $0x350] ss:$8 sps:$4 sm:$0xff]   ;;  %v6899_v18 = vpack.c.bf16 %v11670_v31, %v6895_v47  ;;  %v6898_v31 = vld [vmem:[#allocation4 + $0xa8] sm:$0xff] }
 0xa32   :  { %6797 = vmatpush1.bf16.msra.mxu1 %v9825_v26  ;;  %v6931_v26 = vrot.slane %v11684_v52, 2 }
 0xa33   :  { %6798 = vmatprep.subr.bf16.mxu1 %v9830_v14  ;;  %v6930_v14 = vrot.slane %v6899_v18, 2 }
 0xa35   :  { %6511 = vmatmul.mubr.bf16.gmra.mrb[168].mxu1 %v6301_v41  ;;  %v6902_v41 = vpack.c.bf16 %v6898_v31, %v6898_v31 }
 0xa36   :  { %8554 = vmatprep.mubr.msk.bf16.mxu1 %vm5596_vm11, %v6302_v2  ;;  %6799 = vmatpush1.bf16.msra.mxu1 %v9828_v10  ;;  %v9863_v2 = vld [vmem:[%s12461_s13 + $0x344] ss:$8 sps:$4 sm:$0xff]   ;;  %v6936_v10 = vrot.slane %v11696_v56, 2 }
 0xa37   :  { %6800 = vmatprep.subr.bf16.mxu1 %v9833_v51 }
 0xa38   :  { %v6937_v51 = vsel %vm2771_vm5, %v6931_v26, %v6936_v10 }
 0xa3a   :  { %6801 = vmatpush1.bf16.msra.mxu1 %v9831_v62  ;;  %v6950_v62 = vrot.slane %v6902_v41, 2 }
 0xa3b   :  { %6802 = vmatprep.subr.bf16.mxu1 %v9836_v53  ;;  %v6901_v53 = vpack.c.bf16 %v11805_v32, %v11805_v32  ;;  %v9871_v32 = vld [vmem:[%s12463_s15 + $0x8] sm:$0xff]  }
 0xa3d   :  { %6521 = vmatmul.mubr.bf16.gmra.mrb[180].mxu1 %v6300_v5  ;;  %v6932_v5 = vsel %vm2771_vm5, %v6930_v14, %v6931_v26 }
 0xa3e   :  { %8599 = vmatprep.mubr.msk.bf16.mxu1 %vm5596_vm11, %v11781_v25  ;;  %6803 = vmatpush1.bf16.msra.mxu1 %v9834_v28  ;;  %v9840_v25 = vld [vmem:[%s12461_s13 + $0x2d0] ss:$8 sps:$4 sm:$0xff]   ;;  %v9874_v28 = vld [vmem:[%s12463_s15 + $0x20] sm:$0xff]  }
 0xa3f   :  { %7086 = vmatprep.subr.bf16.mxu1 %v9839_v49  ;;  %v9875_v49 = vld [vmem:[%s12463_s15 + $0x28] sm:$0xff]  }
 0xa45   :  { %6815 = vmatmul.mubr.bf16.vlgmr.msra.gmra.mrb[152].mxu1 %v11819_v1  ;;  %v9848_v1 = vld [vmem:[%s12461_s13 + $0x2f4] ss:$8 sps:$4 sm:$0xff]  }
 0xa46   :  { %8600 = vmatprep.mubr.msk.bf16.mxu1 %vm5596_vm11, %v11832_v59  ;;  %7087 = vmatpush1.bf16.msra.mxu1 %v9837_v63  ;;  %v6558_v59 = vpack.c.bf16 %v6554_v57, %v6554_v57  ;;  %v9876_v63 = vld [vmem:[%s12463_s15 + $0x30] sm:$0xff]  }
 0xa47   :  { %7088 = vmatprep.subr.bf16.mxu1 %v9842_v7  ;;  %v9877_v7 = vld [vmem:[%s12463_s15 + $0x38] sm:$0xff]  }
 0xa48   :  { %v6640_v45 = vshrl.u32 %v6558_v59, 16  ;;  %v6643_v11 = vshll.u32 %v6558_v59, 16  ;;  %v9879_v59 = vld [vmem:[%s12463_s15 + $0x48] sm:$0xff]  }
 0xa4a   :  { %7089 = vmatpush1.bf16.msra.mxu1 %v9840_v25  ;;  %v6642_v55 = vrot.slane %v6640_v45, 1  ;;  %v6645_v33 = vrot.slane %v6643_v11, 2  ;;  %v9882_v45 = vld [vmem:[%s12463_s15 + $0x60] sm:$0xff]   ;;  %v9883_v11 = vld [vmem:[%s12463_s15 + $0x68] sm:$0xff]  }
 0xa4b   :  { %7090 = vmatprep.subr.bf16.mxu1 %v9845_v4 }
 0xa4c   :  { %v6646_v30 = vor.u32 %v6645_v33, %v6642_v55 }
 0xa4d   :  { %6825 = vmatmul.mubr.bf16.gmra.mrb[156].mxu1 %v11855_v17  ;;  %v9849_v17 = vld [vmem:[%s12461_s13 + $0x300] ss:$8 sps:$4 sm:$0xff]  }
 0xa4e   :  { %8601 = vmatprep.mubr.msk.bf16.mxu1 %vm5596_vm11, %v11858_v37  ;;  %7091 = vmatpush1.bf16.msra.mxu1 %v9843_v38  ;;  %v9854_v37 = vld [vmem:[%s12461_s13 + $0x314] ss:$8 sps:$4 sm:$0xff]   ;;  %v6647_v50 = vsel %vm4174_vm8, %v11897_v58, %v6646_v30  ;;  %v9878_v38 = vld [vmem:[%s12463_s15 + $0x40] sm:$0xff]  }
 0xa4f   :  { %7092 = vmatprep.subr.bf16.mxu1 %v9848_v1  ;;  %v9866_v58 = vld [vmem:[%s12461_s13 + $0x354] ss:$8 sps:$4 sm:$0xff]  }
 0xa52   :  { %7093 = vmatpush1.bf16.msra.mxu1 %v9846_v54  ;;  %v9880_v54 = vld [vmem:[%s12463_s15 + $0x50] sm:$0xff]  }
 0xa53   :  { %7094 = vmatprep.subr.bf16.mxu1 %v9851_v19  ;;  %v9881_v19 = vld [vmem:[%s12463_s15 + $0x58] sm:$0xff]  }
 0xa55   :  { %6835 = vmatmul.mubr.bf16.gmra.mrb[160].mxu1 %v11861_v39  ;;  %v9855_v39 = vld [vmem:[%s12461_s13 + $0x320] ss:$8 sps:$4 sm:$0xff]  }
 0xa56   :  { %8602 = vmatprep.mubr.msk.bf16.mxu1 %vm5596_vm11, %v11910_v29  ;;  %7095 = vmatpush1.bf16.msra.mxu1 %v9849_v17  ;;  %v9860_v29 = vld [vmem:[%s12461_s13 + $0x334] ss:$8 sps:$4 sm:$0xff]  }
 0xa57   :  { %7096 = vmatprep.subr.bf16.mxu1 %v9854_v37 }
 0xa5a   :  { %7097 = vmatpush1.bf16.msra.mxu1 %v9852_v44 }
 0xa5b   :  { %7098 = vmatprep.subr.bf16.mxu1 %v9857_v61 }
 0xa5d   :  { %6845 = vmatmul.mubr.bf16.gmra.mrb[164].mxu1 %v11882_v20  ;;  %v9861_v20 = vld [vmem:[%s12461_s13 + $0x340] ss:$8 sps:$4 sm:$0xff]  }
 0xa5e   :  { %8603 = vmatprep.mubr.msk.bf16.mxu1 %vm5596_vm11, %v6647_v50  ;;  %7099 = vmatpush1.bf16.msra.mxu1 %v9855_v39 }
 0xa5f   :  { %7100 = vmatprep.subr.bf16.mxu1 %v9860_v29 }
 0xa62   :  { %7101 = vmatpush1.bf16.msra.mxu1 %v9858_v42  ;;  %v7199_v42 = vld [vmem:[%s12462_s14] sm:$0x3] }
 0xa63   :  { %7102 = vmatprep.subr.bf16.mxu1 %v9863_v2 }
 0xa65   :  { %6855 = vmatmul.mubr.bf16.gmra.mrb[168].mxu1 %v6638_v60 }
 0xa66   :  { %8604 = vmatprep.mubr.msk.bf16.mxu1 %vm5596_vm11, %v6646_v30  ;;  %7103 = vmatpush1.bf16.msra.mxu1 %v9861_v20  ;;  %v12285_v20 = vrot.slane %v7199_v42, %v12505_v13 }
 0xa67   :  { %7104 = vmatprep.subr.bf16.mxu1 %v9866_v58 }
 0xa6a   :  { %7105 = vmatpush1.bf16.msra.mxu1 %v9864_v46 }
 0xa6b   :  { %7106 = vmatprep.subr.bf16.mxu1 %v9869_v23 }
 0xa6d   :  { %6865 = vmatmul.mubr.bf16.gmra.mrb[184].mxu1 %v6637_v35  ;;  %v12282_v35 = vrot.slane %v7199_v42, %v10615_v34 }
 0xa6e   :  { %8649 = vmatprep.mubr.msk.bf16.mxu1 %vm5596_vm11, %v11866_v27  ;;  %7107 = vmatpush1.bf16.msra.mxu1 %v9867_v48  ;;  %v6940_v27 = vrot.slane %v11732_v40, 2  ;;  %v6951_v40 = vsel %vm2771_vm5, %v6946_v8, %v6950_v62  ;;  %v9873_v8 = vld [vmem:[%s12463_s15 + $0x18] sm:$0xff]  }
 0xa70   :  { %v6941_v52 = vsel %vm2771_vm5, %v6936_v10, %v6940_v27 }
 0xa75   :  { %7119 = vmatmul.mubr.bf16.vlgmr.msra.gmra.mrb[152].mxu1 %v6932_v5 }
 0xa76   :  { %8650 = vmatprep.mubr.msk.bf16.mxu1 %vm5596_vm11, %v11916_v15  ;;  %v6944_v15 = vrot.slane %v11778_v22, 2 }
 0xa78   :  { %v6945_v56 = vsel %vm2771_vm5, %v6940_v27, %v6944_v15 }
 0xa7d   :  { %7129 = vmatmul.mubr.bf16.gmra.mrb[156].mxu1 %v6937_v51 }
 0xa7e   :  { %8651 = vmatprep.mubr.msk.bf16.mxu1 %vm5596_vm11, %v11924_v43  ;;  %v6948_v43 = vrot.slane %v6901_v53, 2 }
 0xa80   :  { %v6949_v22 = vsel %vm2771_vm5, %v6944_v15, %v6948_v43 }
 0xa85   :  { %7139 = vmatmul.mubr.bf16.gmra.mrb[160].mxu1 %v6941_v52 }
 0xa86   :  { %8652 = vmatprep.mubr.msk.bf16.mxu1 %vm5596_vm11, %v11932_v21  ;;  %v9870_v21 = vld [vmem:[%s12463_s15] sm:$0xff]  }
 0xa87   :  { %7398 = vmatpush1.bf16.msra.mxu0 %v9870_v21 }
 0xa88   :  { %7399 = vmatprep.subr.bf16.mxu0 %v12506_v36 }
 0xa8b   :  { %7400 = vmatpush1.bf16.msra.mxu0 %v9871_v32 }
 0xa8c   :  { %7401 = vmatprep.subr.bf16.mxu0 %v12506_v36 }
 0xa8d   :  { %7149 = vmatmul.mubr.bf16.gmra.mrb[164].mxu1 %v6945_v56 }
 0xa8e   :  { %8653 = vmatprep.mubr.msk.bf16.mxu1 %vm5596_vm11, %v6951_v40 }
 0xa8f   :  { %7402 = vmatpush1.bf16.msra.mxu0 %v9872_v24 }
 0xa90   :  { %7403 = vmatprep.subr.bf16.mxu0 %v12506_v36 }
 0xa93   :  { %7404 = vmatpush1.bf16.msra.mxu0 %v9873_v8 }
 0xa94   :  { %7405 = vmatprep.subr.bf16.mxu0 %v12506_v36 }
 0xa95   :  { %7159 = vmatmul.mubr.bf16.gmra.mrb[168].mxu1 %v6949_v22 }
 0xa96   :  { %8654 = vmatprep.mubr.msk.bf16.mxu1 %vm5596_vm11, %v6950_v62 }
 0xa97   :  { %7406 = vmatpush1.bf16.msra.mxu0 %v9874_v28 }
 0xa98   :  { %7407 = vmatprep.subr.bf16.mxu0 %v12506_v36 }
 0xa9b   :  { %7408 = vmatpush1.bf16.msra.mxu0 %v9875_v49 }
 0xa9c   :  { %7409 = vmatprep.subr.bf16.mxu0 %v12506_v36 }
 0xa9d   :  { %7169 = vmatmul.mubr.bf16.gmra.mrb[188].mxu1 %v6948_v43 }
 0xa9f   :  { %7410 = vmatpush1.bf16.msra.mxu0 %v9876_v63 }
 0xaa0   :  { %7411 = vmatprep.subr.bf16.mxu0 %v12506_v36 }
 0xaa3   :  { %7412 = vmatpush1.bf16.msra.mxu0 %v9877_v7 }
 0xaa4   :  { %7413 = vmatprep.subr.bf16.mxu0 %v12506_v36 }
 0xaa7   :  { %7414 = vmatpush1.bf16.msra.mxu0 %v9878_v38 }
 0xaa8   :  { %7415 = vmatprep.subr.bf16.mxu0 %v12506_v36 }
 0xaab   :  { %7416 = vmatpush1.bf16.msra.mxu0 %v9879_v59 }
 0xaac   :  { %7417 = vmatprep.subr.bf16.mxu0 %v12506_v36 }
 0xaaf   :  { %7418 = vmatpush1.bf16.msra.mxu0 %v9880_v54 }
 0xab0   :  { %v6017_v25 = vpop.f32.mrb[172].mxu1  ;;  %7419 = vmatprep.subr.bf16.mxu0 %v12506_v36 }
 0xab1   :  { %v6019_v4 = vpop.f32.mrb[173].mxu1 }
 0xab2   :  { %v6021_v57 = vpop.f32.mrb[174].mxu1 }
 0xab3   :  { %v6022_v1 = vpop.f32.mrb[175].mxu1  ;;  %7420 = vmatpush1.bf16.msra.mxu0 %v9881_v19 }
 0xab4   :  { %7421 = vmatprep.subr.bf16.mxu0 %v12506_v36 }
 0xab7   :  { %7422 = vmatpush1.bf16.msra.mxu0 %v9882_v45 }
 0xab8   :  { %7423 = vmatprep.subr.bf16.mxu0 %v12506_v36 }
 0xabb   :  { %7424 = vmatpush1.bf16.msra.mxu0 %v9883_v11 }
 0xae0   :  { %v6232_v0 = vpop.f32.mrb[176].mxu1 }
 0xae1   :  { %v6233_v17 = vadd.f32 %v6232_v0, %v6017_v25  ;;  %v6234_v37 = vpop.f32.mrb[177].mxu1 }
 0xae2   :  { %v6235_v9 = vadd.f32 %v6234_v37, %v6019_v4  ;;  %v6236_v55 = vpop.f32.mrb[178].mxu1 }
 0xae3   :  { %v6237_v33 = vpop.f32.mrb[179].mxu1 }
 0xb10   :  { %v6522_v44 = vpop.f32.mrb[180].mxu1 }
 0xb11   :  { %v6549_v61 = vadd.f32 %v6522_v44, %v6233_v17  ;;  %v6524_v12 = vpop.f32.mrb[181].mxu1 }
 0xb12   :  { %v6550_v6 = vadd.f32 %v6524_v12, %v6235_v9  ;;  %v6526_v30 = vpop.f32.mrb[182].mxu1 }
 0xb13   :  { %v6527_v39 = vpop.f32.mrb[183].mxu1 }
 0xb40   :  { %v6866_v29 = vpop.f32.mrb[184].mxu1 }
 0xb41   :  { %v12274_v16 = vadd.f32 %v6866_v29, %v6549_v61  ;;  %v6868_v36 = vpop.f32.mrb[185].mxu1 }
 0xb42   :  { %v12276_v3 = vadd.f32 %v6868_v36, %v6550_v6  ;;  %v6870_v50 = vpop.f32.mrb[186].mxu1 }
 0xb43   :  { %v6871_v2 = vpop.f32.mrb[187].mxu1 }
 0xb48   :  { %v7120_v58 = vpop.f32.mrb[152].mxu1 }
 0xb49   :  { %v7211_v60 = vadd.f32 %v12282_v35, %v7120_v58  ;;  %v7122_v46 = vpop.f32.mrb[153].mxu1 }
 0xb4a   :  { %v7212_v23 = vadd.f32 %v12285_v20, %v7122_v46  ;;  %v7124_v48 = vpop.f32.mrb[154].mxu1 }
 0xb4b   :  { %v7213_v47 = vadd.f32 %v12282_v35, %v7124_v48  ;;  %v7126_v18 = vpop.f32.mrb[155].mxu1  ;;  %v7233_v14 = vmax.f32 %v7211_v60, 0.0 }
 0xb4c   :  { %v7214_v26 = vadd.f32 %v12285_v20, %v7126_v18  ;;  %v7234_v10 = vmax.f32 %v7212_v23, 0.0 }
 0xb4d   :  { %v7235_v5 = vmax.f32 %v7213_v47, 0.0 }
 0xb4e   :  { %v7236_v34 = vmax.f32 %v7214_v26, 0.0 }
 0xb4f   :  { %v7255_v51 = vpack.c.bf16 %v7235_v5, %v7233_v14 }
 0xb50   :  { %v7256_v27 = vpack.c.bf16 %v7236_v34, %v7234_v10  ;;  %v7130_v13 = vpop.f32.mrb[156].mxu1 }
 0xb51   :  { %v7215_v31 = vadd.f32 %v12282_v35, %v7130_v13  ;;  %v7132_v52 = vpop.f32.mrb[157].mxu1 }
 0xb52   :  { %v7216_v41 = vadd.f32 %v12285_v20, %v7132_v52  ;;  %v7134_v15 = vpop.f32.mrb[158].mxu1  ;;  %8669 = vmatprep.mubr.msk.bf16.mxu0 %vm2370_vm3, %v7256_v27 }
 0xb53   :  { %v7217_v62 = vadd.f32 %v12282_v35, %v7134_v15  ;;  %v7136_v56 = vpop.f32.mrb[159].mxu1  ;;  %7430 = vmatmul.mubr.bf16.vlgmr.msra.gmra.mrb[108].mxu0 %v7255_v51  ;;  %v7237_v40 = vmax.f32 %v7215_v31, 0.0 }
 0xb54   :  { %v7218_v53 = vadd.f32 %v12285_v20, %v7136_v56  ;;  %v7238_v21 = vmax.f32 %v7216_v41, 0.0 }
 0xb55   :  { %v7239_v43 = vmax.f32 %v7217_v62, 0.0 }
 0xb56   :  { %v7240_v22 = vmax.f32 %v7218_v53, 0.0 }
 0xb57   :  { %v7257_v32 = vpack.c.bf16 %v7239_v43, %v7237_v40 }
 0xb58   :  { %v7258_v24 = vpack.c.bf16 %v7240_v22, %v7238_v21  ;;  %v7140_v8 = vpop.f32.mrb[160].mxu1 }
 0xb59   :  { %v7219_v28 = vadd.f32 %v12282_v35, %v7140_v8  ;;  %v7142_v49 = vpop.f32.mrb[161].mxu1 }
 0xb5a   :  { %v7220_v63 = vadd.f32 %v12285_v20, %v7142_v49  ;;  %v7144_v7 = vpop.f32.mrb[162].mxu1  ;;  %8670 = vmatprep.mubr.msk.bf16.mxu0 %vm2370_vm3, %v7258_v24 }
 0xb5b   :  { %v7221_v25 = vadd.f32 %v12282_v35, %v7144_v7  ;;  %v7146_v4 = vpop.f32.mrb[163].mxu1  ;;  %7438 = vmatmul.mubr.bf16.gmra.mrb[112].mxu0 %v7257_v32  ;;  %v7241_v57 = vmax.f32 %v7219_v28, 0.0 }
 0xb5c   :  { %v7222_v38 = vadd.f32 %v12285_v20, %v7146_v4  ;;  %v7242_v59 = vmax.f32 %v7220_v63, 0.0 }
 0xb5d   :  { %v7243_v1 = vmax.f32 %v7221_v25, 0.0 }
 0xb5e   :  { %v7244_v54 = vmax.f32 %v7222_v38, 0.0 }
 0xb5f   :  { %v7259_v19 = vpack.c.bf16 %v7243_v1, %v7241_v57 }
 0xb60   :  { %v7260_v45 = vpack.c.bf16 %v7244_v54, %v7242_v59  ;;  %v7150_v11 = vpop.f32.mrb[164].mxu1 }
 0xb61   :  { %v7223_v0 = vadd.f32 %v12282_v35, %v7150_v11  ;;  %v7152_v17 = vpop.f32.mrb[165].mxu1 }
 0xb62   :  { %v7224_v37 = vadd.f32 %v12285_v20, %v7152_v17  ;;  %v7154_v9 = vpop.f32.mrb[166].mxu1  ;;  %8671 = vmatprep.mubr.msk.bf16.mxu0 %vm2370_vm3, %v7260_v45 }
 0xb63   :  { %v7225_v55 = vadd.f32 %v12282_v35, %v7154_v9  ;;  %v7156_v33 = vpop.f32.mrb[167].mxu1  ;;  %7446 = vmatmul.mubr.bf16.gmra.mrb[116].mxu0 %v7259_v19  ;;  %v7245_v61 = vmax.f32 %v7223_v0, 0.0 }
 0xb64   :  { %v7226_v44 = vadd.f32 %v12285_v20, %v7156_v33  ;;  %v7246_v6 = vmax.f32 %v7224_v37, 0.0 }
 0xb65   :  { %v7247_v12 = vmax.f32 %v7225_v55, 0.0 }
 0xb66   :  { %v7248_v30 = vmax.f32 %v7226_v44, 0.0 }
 0xb67   :  { %v7261_v39 = vpack.c.bf16 %v7247_v12, %v7245_v61  ;;  %v9885_v61 = vld [vmem:[%s12464_s16 + $0x8] ss:$0 sps:$4 sm:$0xff]   ;;  %v9886_v12 = vld [vmem:[%s12467_s19] sm:$0xff]  }
 0xb68   :  { %v7262_v29 = vpack.c.bf16 %v7248_v30, %v7246_v6  ;;  %v7160_v36 = vpop.f32.mrb[168].mxu1  ;;  %v12507_v6 = vmov 0.0   ;;  %v9887_v30 = vld [vmem:[%s12467_s19 + $0x8] sm:$0xff]  }
 0xb69   :  { %v7227_v50 = vadd.f32 %v12282_v35, %v7160_v36  ;;  %v7162_v42 = vpop.f32.mrb[169].mxu1  ;;  %v9890_v36 = vld [vmem:[%s12467_s19 + $0x20] sm:$0xff]  }
 0xb6a   :  { %v7228_v2 = vadd.f32 %v12285_v20, %v7162_v42  ;;  %v7164_v58 = vpop.f32.mrb[170].mxu1  ;;  %8672 = vmatprep.mubr.msk.bf16.mxu0 %vm2370_vm3, %v7262_v29  ;;  %v9889_v29 = vld [vmem:[%s12467_s19 + $0x18] sm:$0xff]   ;;  %v8679_v42 = vld [vmem:[%s12465_s17] ss:$0 sm:$0xff] }
 0xb6b   :  { %v7229_v60 = vadd.f32 %v12282_v35, %v7164_v58  ;;  %v7166_v46 = vpop.f32.mrb[171].mxu1  ;;  %7454 = vmatmul.mubr.bf16.gmra.mrb[120].mxu0 %v7261_v39  ;;  %v7249_v48 = vmax.f32 %v7227_v50, 0.0  ;;  %v9888_v39 = vld [vmem:[%s12467_s19 + $0x10] sm:$0xff]   ;;  %v9891_v50 = vld [vmem:[%s12467_s19 + $0x28] sm:$0xff]   ;;  %v8680_v58 = vld [vmem:[%s12466_s18] ss:$0 sm:$0xff] }
 0xb6c   :  { %v7230_v23 = vadd.f32 %v12285_v20, %v7166_v46  ;;  %v7250_v18 = vmax.f32 %v7228_v2, 0.0 }
 0xb6d   :  { %v7251_v47 = vmax.f32 %v7229_v60, 0.0 }
 0xb6e   :  { %v7252_v26 = vmax.f32 %v7230_v23, 0.0 }
 0xb6f   :  { %v7263_v14 = vpack.c.bf16 %v7251_v47, %v7249_v48 }
 0xb70   :  { %v7264_v5 = vpack.c.bf16 %v7252_v26, %v7250_v18  ;;  %v7170_v10 = vpop.f32.mrb[188].mxu1  ;;  %v9892_v18 = vld [vmem:[%s12467_s19 + $0x30] sm:$0xff]  }
 0xb71   :  { %v7197_v34 = vadd.f32 %v7170_v10, %v12274_v16  ;;  %v7172_v51 = vpop.f32.mrb[189].mxu1  ;;  %v9884_v16 = vld [vmem:[%s12464_s16] sm:$0xff]   ;;  %v9895_v10 = vld [vmem:[%s12467_s19 + $0x48] sm:$0xff]  }
 0xb72   :  { %v7198_v27 = vadd.f32 %v7172_v51, %v12276_v3  ;;  %v7174_v13 = vpop.f32.mrb[190].mxu1  ;;  %8673 = vmatprep.mubr.msk.bf16.mxu0 %vm2370_vm3, %v7264_v5  ;;  %v9894_v5 = vld [vmem:[%s12467_s19 + $0x40] sm:$0xff]  }
 0xb73   :  { %v7231_v31 = vadd.f32 %v12282_v35, %v7197_v34  ;;  %v7175_v52 = vpop.f32.mrb[191].mxu1  ;;  %7462 = vmatmul.mubr.bf16.gmra.mrb[124].mxu0 %v7263_v14  ;;  %v9893_v14 = vld [vmem:[%s12467_s19 + $0x38] sm:$0xff]   ;;  %v9896_v34 = vld [vmem:[%s12467_s19 + $0x50] sm:$0xff]  }
 0xb74   :  { %v7232_v41 = vadd.f32 %v12285_v20, %v7198_v27  ;;  %v9897_v27 = vld [vmem:[%s12467_s19 + $0x58] sm:$0xff]  }
 0xb75   :  { %v7253_v15 = vmax.f32 %v7231_v31, 0.0  ;;  %v9898_v31 = vld [vmem:[%s12467_s19 + $0x60] sm:$0xff]  }
 0xb76   :  { %v7254_v62 = vmax.f32 %v7232_v41, 0.0  ;;  %v9899_v41 = vld [vmem:[%s12467_s19 + $0x68] sm:$0xff]  }
 0xb77   :  { %v7265_v53 = vpack.c.bf16 %v7253_v15, %v7253_v15  ;;  %v9900_v15 = vld [vmem:[%s12467_s19 + $0x70] sm:$0xff]  }
 0xb78   :  { %v7266_v56 = vpack.c.bf16 %v7254_v62, %v7254_v62  ;;  %v9901_v62 = vld [vmem:[%s12467_s19 + $0x78] sm:$0xff]  }
 0xb7a   :  { %8674 = vmatprep.mubr.msk.bf16.mxu0 %vm2370_vm3, %v7266_v56  ;;  %v9902_v56 = vld [vmem:[%s12467_s19 + $0x80] sm:$0xff]  }
 0xb7b   :  { %7470 = vmatmul.mubr.bf16.gmra.mrb[128].mxu0 %v7265_v53 }
 0xb7c   :  { %8818 = vmatprep.mubr.msk.bf16.mxu0 %vm7494_vm12, %v9884_v16  ;;  %v9903_v16 = vld [vmem:[%s12467_s19 + $0x88] sm:$0xff]  }
 0xc26   :  { %v7431_v3 = vpop.f32.mrb[108].mxu0 }
 0xc27   :  { %v7433_v35 = vpop.f32.mrb[109].mxu0 }
 0xc28   :  { %v7434_v40 = vpop.f32.mrb[110].mxu0  ;;  %v9904_v35 = vld [vmem:[%s12469_s21] sm:$0xff]  }
 0xc29   :  { %v7480_v43 = vpack.c.bf16 %v7434_v40, %v7431_v3  ;;  %v7436_v21 = vpop.f32.mrb[111].mxu0 }
 0xc2a   :  { %v9906_v21 = vld [vmem:[%s12469_s21 + $0x10] sm:$0xff]  }
 0xc2b   :  { %8806 = vmatprep.subr.bf16.mxu0 %v7480_v43 }
 0xc2c   :  { %8807 = vmatpush3.bf16.msra.mxu0 %v7480_v43  ;;  %v9905_v43 = vld [vmem:[%s12469_s21 + $0x8] sm:$0xff]  }
 0xc2e   :  { %v7439_v20 = vpop.f32.mrb[112].mxu0 }
 0xc2f   :  { %v7441_v22 = vpop.f32.mrb[113].mxu0 }
 0xc30   :  { %v7442_v32 = vpop.f32.mrb[114].mxu0  ;;  %v8688_v22 = vld [vmem:[%s12468_s20] ss:$0 sm:$0xff] }
 0xc31   :  { %v7481_v24 = vpack.c.bf16 %v7442_v32, %v7439_v20  ;;  %v7444_v8 = vpop.f32.mrb[115].mxu0  ;;  %v9907_v20 = vld [vmem:[%s12469_s21 + $0x18] sm:$0xff]   ;;  %s10039_s21 = smov [#allocation13]  }
 0xc32   :  { %s7953_s14 = sshll.u32 %s10039_s21, 4  ;;  %s7954_s14 = int_to_ptr.vmem [resolvable:$true] %s7953_s14 }
 0xc33   :  { %8808 = vmatprep.subr.bf16.mxu0 %v7481_v24  ;;  %s9998_s20 = scalar_lea.vmem %s7954_s14, 128  ;;  %p10003_p5 = scmp.lt.s32.totalorder %s7954_s14, %s7954_s14 }
 0xc34   :  { %8809 = vmatpush3.bf16.msra.mxu0 %v7481_v24  ;;  %p9999_p4 = scmp.ne.s32.totalorder %s7954_s14, %s9998_s20  ;;  %p10004_p6 = scmp.lt.s32.totalorder %s9998_s20, %s9998_s20 }
 0xc36   :  { %v7447_v28 = vpop.f32.mrb[116].mxu0  ;;  %p10005_p7 = por %p10004_p6, %p10003_p5 }
 0xc37   :  { %v7449_v49 = vpop.f32.mrb[117].mxu0 }
 0xc38   :  { %v7450_v63 = vpop.f32.mrb[118].mxu0  ;;  %p10006_p8 = pnand %p10005_p7, %p9999_p4 }
 0xc39   :  { %v7482_v7 = vpack.c.bf16 %v7450_v63, %v7447_v28  ;;  %v7452_v25 = vpop.f32.mrb[119].mxu0 }
 0xc3a   :  { %v8727_v25 = vld [vmem:[%s12508_s6] ss:$0 sm:$0xff] }
 0xc3b   :  { %8810 = vmatprep.subr.bf16.mxu0 %v7482_v7 }
 0xc3c   :  { %8811 = vmatpush3.bf16.msra.mxu0 %v7482_v7 }
 0xc3e   :  { %v7455_v4 = vpop.f32.mrb[120].mxu0 }
 0xc3f   :  { %v7457_v38 = vpop.f32.mrb[121].mxu0 }
 0xc40   :  { %v7458_v57 = vpop.f32.mrb[122].mxu0 }
 0xc41   :  { %v7483_v1 = vpack.c.bf16 %v7458_v57, %v7455_v4  ;;  %v7460_v59 = vpop.f32.mrb[123].mxu0 }
 0xc43   :  { %8812 = vmatprep.subr.bf16.mxu0 %v7483_v1 }
 0xc44   :  { %8813 = vmatpush3.bf16.msra.mxu0 %v7483_v1 }
 0xc46   :  { %v7463_v54 = vpop.f32.mrb[124].mxu0 }
 0xc47   :  { %v7465_v19 = vpop.f32.mrb[125].mxu0 }
 0xc48   :  { %v7466_v45 = vpop.f32.mrb[126].mxu0 }
 0xc49   :  { %v7484_v11 = vpack.c.bf16 %v7466_v45, %v7463_v54  ;;  %v7468_v0 = vpop.f32.mrb[127].mxu0 }
 0xc4b   :  { %8814 = vmatprep.subr.bf16.mxu0 %v7484_v11 }
 0xc4c   :  { %8815 = vmatpush3.bf16.msra.mxu0 %v7484_v11 }
 0xc4e   :  { %v7471_v17 = vpop.f32.mrb[128].mxu0 }
 0xc4f   :  { %v7485_v37 = vpack.c.bf16 %v7471_v17, %v7471_v17  ;;  %v7473_v9 = vpop.f32.mrb[129].mxu0 }
 0xc50   :  { %v7474_v55 = vpop.f32.mrb[130].mxu0 }
 0xc51   :  { %v7503_v33 = vsel %vm7501_vm13, %v7485_v37, 0  ;;  %v7475_v44 = vpop.f32.mrb[131].mxu0  ;;  %9399 = vmatprep.subr.msk.bf16.mxu0 %vm7501_vm13, %v7485_v37 }
 0xc52   :  { %8817 = vmatpush3.bf16.msra.mxu0 %v7503_v33 }
 0xc53   :  { %8822 = vmatprep.subr.bf16.mxu0 %v12507_v6 }
 0xc55   :  { %8819 = vmatmul.mubr.msk.bf16.vlgmr.msra.gmra.mrb[132].mxu0 %vm7494_vm12, %v9885_v61 }
 0xc56   :  { %8823 = vmatpush3.bf16.msra.mxu0 %v9886_v12  ;;  %8834 = vmatprep.mubr.msk.bf16.mxu0 %vm10038_vm14, %v12507_v6 }
 0xc57   :  { %8824 = vmatprep.subr.bf16.mxu0 %v12507_v6 }
 0xc5a   :  { %8825 = vmatpush3.bf16.msra.mxu0 %v9887_v30 }
 0xc5b   :  { %8826 = vmatprep.subr.bf16.mxu0 %v12507_v6 }
 0xc5e   :  { %8827 = vmatpush3.bf16.msra.mxu0 %v9888_v39 }
 0xc5f   :  { %8828 = vmatprep.subr.bf16.mxu0 %v12507_v6 }
 0xc62   :  { %8829 = vmatpush3.bf16.msra.mxu0 %v9889_v29 }
 0xc63   :  { %8830 = vmatprep.subr.bf16.mxu0 %v12507_v6 }
 0xc66   :  { %8831 = vmatpush3.bf16.msra.mxu0 %v9890_v36 }
 0xc67   :  { %8832 = vmatprep.subr.bf16.mxu0 %v12507_v6 }
 0xc6a   :  { %8833 = vmatpush3.bf16.msra.mxu0 %v9891_v50 }
 0xc6b   :  { %8838 = vmatprep.subr.bf16.mxu0 %v12507_v6 }
 0xd28   :  { %v8820_v2 = vpop.f32.mrb[132].mxu0 }
 0xd29   :  { %v7539_v60 = vpop.f32.mrb[133].mxu0  ;;  %v7562_v53 = vmul.f32 %v8820_v2, %v8679_v42 }
 0xd2a   :  { %v7560_v46 = vmul.f32 %v8679_v42, %v7539_v60  ;;  %v8821_v23 = vpop.f32.mrb[134].mxu0 }
 0xd2b   :  { %v7542_v48 = vpop.f32.mrb[135].mxu0  ;;  %v7572_v3 = vadd.f32 %v8680_v58, %v7562_v53 }
 0xd2c   :  { %v7570_v47 = vadd.f32 %v8680_v58, %v7560_v46  ;;  %v7561_v51 = vmul.f32 %v8679_v42, %v7542_v48 }
 0xd2d   :  { %v7767_v40 = vpack.c.bf16 %v7572_v3, %v7572_v3 }
 0xd2e   :  { %v7574_v26 = vpack.c.bf16 %v7570_v47, %v7570_v47  ;;  %v7571_v13 = vadd.f32 %v8680_v58, %v7561_v51 }
 0xd30   :  { %8835 = vmatmul.mubr.msk.bf16.vlgmr.msra.gmra.mrb[136].mxu0 %vm2370_vm3, %v7574_v26  ;;  %v7673_v52 = vpack.c.bf16 %v7571_v13, %v7571_v13 }
 0xd31   :  { %8839 = vmatpush3.bf16.msra.mxu0 %v9892_v18  ;;  %8850 = vmatprep.mubr.msk.bf16.mxu0 %vm10038_vm14, %v12507_v6 }
 0xd32   :  { %8840 = vmatprep.subr.bf16.mxu0 %v12507_v6 }
 0xd35   :  { %8841 = vmatpush3.bf16.msra.mxu0 %v9893_v14 }
 0xd36   :  { %8842 = vmatprep.subr.bf16.mxu0 %v12507_v6 }
 0xd39   :  { %8843 = vmatpush3.bf16.msra.mxu0 %v9894_v5 }
 0xd3a   :  { %8844 = vmatprep.subr.bf16.mxu0 %v12507_v6 }
 0xd3d   :  { %8845 = vmatpush3.bf16.msra.mxu0 %v9895_v10 }
 0xd3e   :  { %8846 = vmatprep.subr.bf16.mxu0 %v12507_v6 }
 0xd41   :  { %8847 = vmatpush3.bf16.msra.mxu0 %v9896_v34 }
 0xd42   :  { %8848 = vmatprep.subr.bf16.mxu0 %v12507_v6 }
 0xd45   :  { %8849 = vmatpush3.bf16.msra.mxu0 %v9897_v27 }
 0xd46   :  { %8854 = vmatprep.subr.bf16.mxu0 %v12507_v6 }
 0xd48   :  { %8851 = vmatmul.mubr.msk.bf16.vlgmr.msra.gmra.mrb[136].mxu0 %vm2370_vm3, %v7673_v52 }
 0xd49   :  { %8855 = vmatpush3.bf16.msra.mxu0 %v9898_v31  ;;  %8866 = vmatprep.mubr.msk.bf16.mxu0 %vm10038_vm14, %v12507_v6 }
 0xd4a   :  { %8856 = vmatprep.subr.bf16.mxu0 %v12507_v6 }
 0xd4d   :  { %8857 = vmatpush3.bf16.msra.mxu0 %v9899_v41 }
 0xd4e   :  { %8858 = vmatprep.subr.bf16.mxu0 %v12507_v6 }
 0xd51   :  { %8859 = vmatpush3.bf16.msra.mxu0 %v9900_v15 }
 0xd52   :  { %8860 = vmatprep.subr.bf16.mxu0 %v12507_v6 }
 0xd55   :  { %8861 = vmatpush3.bf16.msra.mxu0 %v9901_v62 }
 0xd56   :  { %8862 = vmatprep.subr.bf16.mxu0 %v12507_v6 }
 0xd59   :  { %8863 = vmatpush3.bf16.msra.mxu0 %v9902_v56 }
 0xd5a   :  { %8864 = vmatprep.subr.bf16.mxu0 %v12507_v6 }
 0xd5d   :  { %8865 = vmatpush3.bf16.msra.mxu0 %v9903_v16 }
 0xd5e   :  { %8870 = vmatprep.subr.bf16.mxu0 %v12507_v6 }
 0xd60   :  { %8867 = vmatmul.mubr.msk.bf16.vlgmr.msra.gmra.mrb[136].mxu0 %vm2370_vm3, %v7767_v40 }
 0xd61   :  { %8871 = vmatpush3.bf16.msra.mxu0 %v9904_v35  ;;  %8878 = vmatprep.mubr.msk.bf16.mxu0 %vm10038_vm14, %v12507_v6 }
 0xd62   :  { %8872 = vmatprep.subr.bf16.mxu0 %v12507_v6 }
 0xd65   :  { %8873 = vmatpush3.bf16.msra.mxu0 %v9905_v43 }
 0xd66   :  { %8874 = vmatprep.subr.bf16.mxu0 %v12507_v6 }
 0xd69   :  { %8875 = vmatpush3.bf16.msra.mxu0 %v9906_v21 }
 0xd6a   :  { %8876 = vmatprep.subr.bf16.mxu0 %v12507_v6 }
 0xd6d   :  { %8877 = vmatpush3.bf16.msra.mxu0 %v9907_v20 }
 0xe33   :  { %v7854_v32 = vpop.f32.mrb[136].mxu0 }
 0xe34   :  { %v8910_v24 = vadd.f32 %v8688_v22, %v7854_v32  ;;  %v8868_v8 = vpop.f32.mrb[137].mxu0 }
 0xe35   :  { %v7857_v28 = vpop.f32.mrb[138].mxu0 }
 0xe36   :  { %v7861_v49 = vmax.f32 %v8910_v24, 0.0  ;;  %v8869_v63 = vpop.f32.mrb[139].mxu0 }
 0xe38   :  { %v7862_v7 = vpack.c.bf16 %v7861_v49, %v7861_v49 }
 0xe3a   :  { %8879 = vmatmul.mubr.msk.bf16.vlgmr.msra.gmra.mrb[140].mxu0 %vm7902_vm15, %v7862_v7 }
 0xf0d   :  { %v7940_v4 = vpop.f32.mrb[140].mxu0 }
 0xf0e   :  { %v7941_v38 = vadd.f32 %v8727_v25, %v7940_v4  ;;  %v8880_v57 = vpop.f32.mrb[141].mxu0 }
 0xf0f   :  { %v7943_v1 = vpop.f32.mrb[142].mxu0 }
 0xf10   :  { %7946 = vst [vmem:[#allocation13] sm:$0xff] %v7941_v38  ;;  %v8881_v59 = vpop.f32.mrb[143].mxu0 }
 0xf11   :  { %10009 = shalt.err (!%p10006_p8)
}
 0xf12   :  { %s12509_s25 = sld [smem:[#allocation28_spill]] }
 0xf18   :  { %s10010_s26 = scalar_lea.hbm %s12509_s25, 128 }
 0xf19   :  { %p10011_p9 = scmp.ne.s32.totalorder %s12509_s25, %s10010_s26  ;;  %p10014_p10 = scmp.lt.u32.totalorder %s10010_s26, %s12509_s25 }
 0xf1b   :  { %p10016_p11 = pnand %p10014_p10, %p10011_p9 }
 0xf1d   :  { %10019 = shalt.err (!%p10016_p11)
}
 0xf1e   :  { %7956 = dma.vmem_to_hbm [thread:$0]  %s7954_s14, 128, %s12509_s25, [#allocation7]  }
 0xf1f   :  { %10026 = dma.done.wait [#allocation7], 128  }
 0xf20   :  { %10027 = vsyncadd [#allocation7], 4294967168 }
 0xf21   :  { %7960 = vsyncpa [#allocation6], 1 }
 0xf22   :  { %7961 = vsyncpa [#allocation9], 1 }
 0xf23   :  { %7962 = vsyncpa [#allocation12], 1 }
 0xf24   :  { %7963 = vsyncpa [#allocation7], 1 }

</bundles_post_ra>
